<compile_context>
chip_gen: v7x
topology: tpu7x:2x2x1
jax: 0.10.0
libtpu: 0.0.40
codegen_flags: <defaults>
</compile_context>

<pallas_src>
import numpy as np
import jax
import jax.numpy as jnp
from jax import lax
from jax.experimental import pallas as pl
from jax.experimental.pallas import tpu as pltpu

C0, C1, C2, C3 = 3, 16, 32, 64   # conv channel sizes from the module
CP = 128                         # padded channel width (lane-aligned)


def _round8(n):
    return ((n + 7) // 8) * 8


def build_cnn_encoder(B, H, W, num_actions):
    H1, W1 = H - 1, W - 1          # after Conv2d(3,16,(2,2)), VALID
    Hp, Wp = H1 // 2, W1 // 2      # after MaxPool2d((2,2)), floor mode
    H2, W2 = Hp - 1, Wp - 1        # after Conv2d(16,32,(2,2))
    Hf, Wf = H2 - 1, W2 - 1        # after Conv2d(32,64,(2,2))
    A = num_actions
    P = Hf * Wf                    # number of final spatial positions
    E = P * C3                     # image embedding size (NCHW flatten)
    S = H * W                      # per-batch row stride in the flat layout

    # Row-shift offsets of the 2x2 taps in the flat (row = h*W + w) layout.
    offs1 = (0, 1, W, W + 1)                 # conv1 on the raw image grid
    offs2 = (0, 2, 2 * W, 2 * W + 2)         # conv2/conv3 on the pooled grid
    offs4 = tuple(2 * h * W + 2 * w for h in range(Hf) for w in range(Wf))

    # Rows each stage computes (valid rows + harmless finite garbage rows);
    # each stage only needs to cover the rows its consumer actually reads.
    M4 = _round8((B - 1) * S + 1)                # final gather rows
    M3 = _round8(M4 + max(offs4))                # conv3 output rows
    M2 = _round8(M3 + offs2[-1])                 # conv2 output rows
    MP = _round8(M2 + offs2[-1])                 # maxpool output rows
    M1 = _round8(MP + offs1[-1])                 # conv1 output rows
    NIN = _round8(max(M1 + offs1[-1], B * S))    # padded flat input rows

    # 0/1 batch-select matrix: picks row b*S (batch b anchor) out of the
    # gathered slab, compressing M4 rows down to B rows before the permute.
    sel_np = np.zeros((B, M4), np.float32)
    for b in range(B):
        sel_np[b, b * S] = 1.0
    sel_const = jnp.asarray(sel_np)

    # 0/1 permutation mapping the gathered lanes [pos*CP + c] to the PyTorch
    # NCHW flatten order [c*P + pos].  Built once with numpy (trace constant).
    perm_np = np.zeros((P * CP, E), np.float32)
    for pos in range(P):
        for c in range(C3):
            perm_np[pos * CP + c, c * P + pos] = 1.0
    perm_const = jnp.asarray(perm_np)

    def kernel(x_ref, act_ref, w1_ref, b1_ref, w2_ref, b2_ref, w3_ref,
               b3_ref, sel_ref, perm_ref, out_ref):
        f32 = jnp.float32

        def conv(src, offs, m_out, w_ref, b_ref):
            # im2col: lane-concat the 4 taps (each CP lanes, 128-aligned), then
            # ONE MXU matmul covering all batch elements and spatial positions.
            lhs = jnp.concatenate([src[o:o + m_out, :] for o in offs], axis=-1)
            y = jnp.dot(lhs, w_ref[...], preferred_element_type=f32)
            return jnp.maximum(y + b_ref[...], 0.0)

        x0 = x_ref[...]                                      # (NIN, CP)
        y1 = conv(x0, offs1, M1, w1_ref, b1_ref)             # conv1 + ReLU
        # MaxPool2d((2,2)), floor mode: VPU max of 4 shifted slabs; pooled
        # values land on anchor rows (2i)*W + (2j); other rows are never read.
        yp = jnp.maximum(jnp.maximum(y1[0:MP, :], y1[1:MP + 1, :]),
                         jnp.maximum(y1[W:MP + W, :], y1[W + 1:MP + W + 1, :]))
        y2 = conv(yp, offs2, M2, w2_ref, b2_ref)             # conv2 + ReLU
        y3 = conv(y2, offs2, M3, w3_ref, b3_ref)             # conv3 + ReLU

        # Gather the Hf*Wf final positions along lanes (aligned vreg copies),
        # compress to B anchor rows with a tiny select matmul, then permute to
        # the PyTorch NCHW flatten order with one small 0/1 matmul.
        gat = jnp.concatenate([y3[o:o + M4, :] for o in offs4], axis=-1)
        g_b = jnp.dot(sel_ref[...], gat, preferred_element_type=f32)   # (B, P*CP)
        img = jnp.dot(g_b, perm_ref[...], preferred_element_type=f32)  # (B, E)

        # one-hot action encoding (torch scatter_ of 1.0), appended in-kernel.
        acts = act_ref[...]                                   # (B, 1) int32
        lanes = lax.broadcasted_iota(jnp.int32, (B, A), 1)
        onehot = (lanes == acts).astype(f32)

        # Single full-ref store of the final (B, E + A) slab.
        out_ref[...] = jnp.concatenate([img, onehot], axis=-1)

    def spec2d(shape):
        return pl.BlockSpec(shape, lambda i: (0, 0))

    call = pl.pallas_call(
        kernel,
        out_shape=jax.ShapeDtypeStruct((B, E + A), jnp.float32),
        grid=(1,),
        in_specs=[
            spec2d((NIN, CP)),                        # padded flat image
            spec2d((B, 1)),                           # actions (int32)
            spec2d((4 * CP, CP)), spec2d((1, CP)),    # conv1 w, b
            spec2d((4 * CP, CP)), spec2d((1, CP)),    # conv2 w, b
            spec2d((4 * CP, CP)), spec2d((1, CP)),    # conv3 w, b
            spec2d((B, M4)),                          # batch row-select matrix
            spec2d((P * CP, E)),                      # NCHW flatten permutation
        ],
        out_specs=spec2d((B, E + A)),
        compiler_params=pltpu.CompilerParams(
            dimension_semantics=("arbitrary",)),
    )

    def pack_w(w_hwio, cin):
        # (2, 2, cin, cout) HWIO -> (4*CP, CP): taps stacked along K, zero pad.
        cout = w_hwio.shape[-1]
        w = w_hwio.reshape(4, cin, cout)
        w = jnp.pad(w, ((0, 0), (0, CP - cin), (0, CP - cout)))
        return w.reshape(4 * CP, CP)

    def pack_b(b):
        return jnp.pad(b.reshape(1, -1), ((0, 0), (0, CP - b.shape[0])))

    @jax.jit
    def forward(obs, actions, params):
        w1, b1, w2, b2, w3, b3 = params
        # Layout plumbing only (no compute hoisted out of the kernel).
        x = obs.astype(jnp.float32).reshape(B * S, C0)
        x = jnp.pad(x, ((0, NIN - B * S), (0, CP - C0)))
        acts = actions.astype(jnp.int32).reshape(B, 1)
        return call(x, acts,
                    pack_w(w1, C0), pack_b(b1),
                    pack_w(w2, C1), pack_b(b2),
                    pack_w(w3, C2), pack_b(b3),
                    sel_const, perm_const)

    return forward


def reference_forward(obs, actions, params, num_actions):
    """Pure-JAX (XLA) reference matching the PyTorch module."""
    w1, b1, w2, b2, w3, b3 = params   # w*: (2, 2, Cin, Cout) HWIO

    def conv_relu(x, w, b):
        dn = lax.conv_dimension_numbers(x.shape, w.shape,
                                        ('NHWC', 'HWIO', 'NHWC'))
        y = lax.conv_general_dilated(x, w, (1, 1), 'VALID',
                                     dimension_numbers=dn)
        return jnp.maximum(y + b, 0.0)

    x = conv_relu(obs, w1, b1)
    x = lax.reduce_window(x, -jnp.inf, lax.max,
                          (1, 2, 2, 1), (1, 2, 2, 1), 'VALID')
    x = conv_relu(x, w2, b2)
    x = conv_relu(x, w3, b3)
    x = jnp.transpose(x, (0, 3, 1, 2)).reshape(x.shape[0], -1)  # NCHW flatten
    onehot = jax.nn.one_hot(actions, num_actions, dtype=jnp.float32)
    return jnp.concatenate([x, onehot], axis=-1)


if __name__ == "__main__":
    B, H, W, A = 2, 10, 10, 6   # obs_space['image'] = (10, 10, 3); action_space.n = 6

    key = jax.random.PRNGKey(0)
    ks = jax.random.split(key, 8)
    w1 = jax.random.normal(ks[0], (2, 2, C0, C1), jnp.float32) * 0.2
    b1 = jax.random.normal(ks[1], (C1,), jnp.float32) * 0.1
    w2 = jax.random.normal(ks[2], (2, 2, C1, C2), jnp.float32) * 0.1
    b2 = jax.random.normal(ks[3], (C2,), jnp.float32) * 0.1
    w3 = jax.random.normal(ks[4], (2, 2, C2, C3), jnp.float32) * 0.1
    b3 = jax.random.normal(ks[5], (C3,), jnp.float32) * 0.1
    params = (w1, b1, w2, b2, w3, b3)

    obs = jax.random.uniform(ks[6], (B, H, W, C0), jnp.float32)
    actions = jax.random.randint(ks[7], (B,), 0, A, jnp.int32)

    forward = build_cnn_encoder(B, H, W, A)
    out = jax.block_until_ready(forward(obs, actions, params))

    expected_emb = ((H - 1) // 2 - 2) * ((W - 1) // 2 - 2) * 64
    assert out.shape == (B, expected_emb + A), out.shape

    ref = reference_forward(obs, actions, params, A)
    err = float(jnp.max(jnp.abs(out - ref)))
    assert err < 1e-2, f"max abs err vs reference: {err}"

    print("KERNEL_OK")
</pallas_src>

<mosaic_0001>
module attributes {stable_mosaic.version = 11 : i64} {
  func.func @kernel(%arg0: i32, %arg1: memref<208x128xf32, #tpu.memory_space<vmem>>, %arg2: memref<2x1xi32, #tpu.memory_space<vmem>>, %arg3: memref<512x128xf32, #tpu.memory_space<vmem>>, %arg4: memref<1x128xf32, #tpu.memory_space<vmem>>, %arg5: memref<512x128xf32, #tpu.memory_space<vmem>>, %arg6: memref<1x128xf32, #tpu.memory_space<vmem>>, %arg7: memref<512x128xf32, #tpu.memory_space<vmem>>, %arg8: memref<1x128xf32, #tpu.memory_space<vmem>>, %arg9: memref<2x104xf32, #tpu.memory_space<vmem>>, %arg10: memref<512x256xf32, #tpu.memory_space<vmem>>, %arg11: memref<2x262xf32, #tpu.memory_space<vmem>>) attributes {dimension_semantics = [#tpu.dimension_semantics<arbitrary>], iteration_bounds = array<i64: 1>, scalar_prefetch = 0 : i64, scratch_operands = 0 : i64, tpu.core_type = #tpu.core_type<tc>, window_params = [{pipeline_mode = #tpu.pipeline_mode<synchronous>, transform_indices = @transform_0, window_bounds = array<i64: 208, 128>}, {pipeline_mode = #tpu.pipeline_mode<synchronous>, transform_indices = @transform_1, window_bounds = array<i64: 2, 1>}, {pipeline_mode = #tpu.pipeline_mode<synchronous>, transform_indices = @transform_2, window_bounds = array<i64: 512, 128>}, {pipeline_mode = #tpu.pipeline_mode<synchronous>, transform_indices = @transform_3, window_bounds = array<i64: 1, 128>}, {pipeline_mode = #tpu.pipeline_mode<synchronous>, transform_indices = @transform_4, window_bounds = array<i64: 512, 128>}, {pipeline_mode = #tpu.pipeline_mode<synchronous>, transform_indices = @transform_5, window_bounds = array<i64: 1, 128>}, {pipeline_mode = #tpu.pipeline_mode<synchronous>, transform_indices = @transform_6, window_bounds = array<i64: 512, 128>}, {pipeline_mode = #tpu.pipeline_mode<synchronous>, transform_indices = @transform_7, window_bounds = array<i64: 1, 128>}, {pipeline_mode = #tpu.pipeline_mode<synchronous>, transform_indices = @transform_8, window_bounds = array<i64: 2, 104>}, {pipeline_mode = #tpu.pipeline_mode<synchronous>, transform_indices = @transform_9, window_bounds = array<i64: 512, 256>}, {pipeline_mode = #tpu.pipeline_mode<synchronous>, transform_indices = @transform_10, window_bounds = array<i64: 2, 262>}]} {
    %c0 = arith.constant 0 : index
    %c0_0 = arith.constant 0 : index
    %0 = vector.load %arg1[%c0, %c0_0] : memref<208x128xf32, #tpu.memory_space<vmem>>, vector<208x128xf32>
    %1 = vector.extract_strided_slice %0 {offsets = [0, 0], sizes = [192, 128], strides = [1, 1]} : vector<208x128xf32> to vector<192x128xf32>
    %2 = vector.extract_strided_slice %0 {offsets = [1, 0], sizes = [192, 128], strides = [1, 1]} : vector<208x128xf32> to vector<192x128xf32>
    %3 = vector.extract_strided_slice %0 {offsets = [10, 0], sizes = [192, 128], strides = [1, 1]} : vector<208x128xf32> to vector<192x128xf32>
    %4 = vector.extract_strided_slice %0 {offsets = [11, 0], sizes = [192, 128], strides = [1, 1]} : vector<208x128xf32> to vector<192x128xf32>
    %5 = tpu.concatenate %1, %2, %3, %4 in 1 : vector<192x128xf32>, vector<192x128xf32>, vector<192x128xf32>, vector<192x128xf32> -> vector<192x512xf32>
    %c0_1 = arith.constant 0 : index
    %c0_2 = arith.constant 0 : index
    %6 = vector.load %arg3[%c0_1, %c0_2] : memref<512x128xf32, #tpu.memory_space<vmem>>, vector<512x128xf32>
    %cst = arith.constant dense<0.000000e+00> : vector<192x128xf32>
    %7 = tpu.matmul %5, %6, %cst {dimension_numbers = #tpu.dot_dimension_numbers<[1], [0], [0], [1], [0, 0, 1, 1], [], []>} : vector<192x512xf32>, vector<512x128xf32>, vector<192x128xf32> -> vector<192x128xf32>
    %c0_3 = arith.constant 0 : index
    %c0_4 = arith.constant 0 : index
    %8 = vector.load %arg4[%c0_3, %c0_4] : memref<1x128xf32, #tpu.memory_space<vmem>>, vector<1x128xf32>
    %9 = vector.broadcast %8 : vector<1x128xf32> to vector<192x128xf32>
    %10 = arith.addf %7, %9 : vector<192x128xf32>
    %cst_5 = arith.constant 0.000000e+00 : f32
    %11 = vector.broadcast %cst_5 : f32 to vector<192x128xf32>
    %12 = arith.maximumf %10, %11 : vector<192x128xf32>
    %13 = vector.extract_strided_slice %12 {offsets = [0, 0], sizes = [176, 128], strides = [1, 1]} : vector<192x128xf32> to vector<176x128xf32>
    %14 = vector.extract_strided_slice %12 {offsets = [1, 0], sizes = [176, 128], strides = [1, 1]} : vector<192x128xf32> to vector<176x128xf32>
    %15 = arith.maximumf %13, %14 : vector<176x128xf32>
    %16 = vector.extract_strided_slice %12 {offsets = [10, 0], sizes = [176, 128], strides = [1, 1]} : vector<192x128xf32> to vector<176x128xf32>
    %17 = vector.extract_strided_slice %12 {offsets = [11, 0], sizes = [176, 128], strides = [1, 1]} : vector<192x128xf32> to vector<176x128xf32>
    %18 = arith.maximumf %16, %17 : vector<176x128xf32>
    %19 = arith.maximumf %15, %18 : vector<176x128xf32>
    %20 = vector.extract_strided_slice %19 {offsets = [0, 0], sizes = [152, 128], strides = [1, 1]} : vector<176x128xf32> to vector<152x128xf32>
    %21 = vector.extract_strided_slice %19 {offsets = [2, 0], sizes = [152, 128], strides = [1, 1]} : vector<176x128xf32> to vector<152x128xf32>
    %22 = vector.extract_strided_slice %19 {offsets = [20, 0], sizes = [152, 128], strides = [1, 1]} : vector<176x128xf32> to vector<152x128xf32>
    %23 = vector.extract_strided_slice %19 {offsets = [22, 0], sizes = [152, 128], strides = [1, 1]} : vector<176x128xf32> to vector<152x128xf32>
    %24 = tpu.concatenate %20, %21, %22, %23 in 1 : vector<152x128xf32>, vector<152x128xf32>, vector<152x128xf32>, vector<152x128xf32> -> vector<152x512xf32>
    %c0_6 = arith.constant 0 : index
    %c0_7 = arith.constant 0 : index
    %25 = vector.load %arg5[%c0_6, %c0_7] : memref<512x128xf32, #tpu.memory_space<vmem>>, vector<512x128xf32>
    %cst_8 = arith.constant dense<0.000000e+00> : vector<152x128xf32>
    %26 = tpu.matmul %24, %25, %cst_8 {dimension_numbers = #tpu.dot_dimension_numbers<[1], [0], [0], [1], [0, 0, 1, 1], [], []>} : vector<152x512xf32>, vector<512x128xf32>, vector<152x128xf32> -> vector<152x128xf32>
    %c0_9 = arith.constant 0 : index
    %c0_10 = arith.constant 0 : index
    %27 = vector.load %arg6[%c0_9, %c0_10] : memref<1x128xf32, #tpu.memory_space<vmem>>, vector<1x128xf32>
    %28 = vector.broadcast %27 : vector<1x128xf32> to vector<152x128xf32>
    %29 = arith.addf %26, %28 : vector<152x128xf32>
    %cst_11 = arith.constant 0.000000e+00 : f32
    %30 = vector.broadcast %cst_11 : f32 to vector<152x128xf32>
    %31 = arith.maximumf %29, %30 : vector<152x128xf32>
    %32 = vector.extract_strided_slice %31 {offsets = [0, 0], sizes = [128, 128], strides = [1, 1]} : vector<152x128xf32> to vector<128x128xf32>
    %33 = vector.extract_strided_slice %31 {offsets = [2, 0], sizes = [128, 128], strides = [1, 1]} : vector<152x128xf32> to vector<128x128xf32>
    %34 = vector.extract_strided_slice %31 {offsets = [20, 0], sizes = [128, 128], strides = [1, 1]} : vector<152x128xf32> to vector<128x128xf32>
    %35 = vector.extract_strided_slice %31 {offsets = [22, 0], sizes = [128, 128], strides = [1, 1]} : vector<152x128xf32> to vector<128x128xf32>
    %36 = tpu.concatenate %32, %33, %34, %35 in 1 : vector<128x128xf32>, vector<128x128xf32>, vector<128x128xf32>, vector<128x128xf32> -> vector<128x512xf32>
    %c0_12 = arith.constant 0 : index
    %c0_13 = arith.constant 0 : index
    %37 = vector.load %arg7[%c0_12, %c0_13] : memref<512x128xf32, #tpu.memory_space<vmem>>, vector<512x128xf32>
    %cst_14 = arith.constant dense<0.000000e+00> : vector<128x128xf32>
    %38 = tpu.matmul %36, %37, %cst_14 {dimension_numbers = #tpu.dot_dimension_numbers<[1], [0], [0], [1], [0, 0, 1, 1], [], []>} : vector<128x512xf32>, vector<512x128xf32>, vector<128x128xf32> -> vector<128x128xf32>
    %c0_15 = arith.constant 0 : index
    %c0_16 = arith.constant 0 : index
    %39 = vector.load %arg8[%c0_15, %c0_16] : memref<1x128xf32, #tpu.memory_space<vmem>>, vector<1x128xf32>
    %40 = vector.broadcast %39 : vector<1x128xf32> to vector<128x128xf32>
    %41 = arith.addf %38, %40 : vector<128x128xf32>
    %cst_17 = arith.constant 0.000000e+00 : f32
    %42 = vector.broadcast %cst_17 : f32 to vector<128x128xf32>
    %43 = arith.maximumf %41, %42 : vector<128x128xf32>
    %44 = vector.extract_strided_slice %43 {offsets = [0, 0], sizes = [104, 128], strides = [1, 1]} : vector<128x128xf32> to vector<104x128xf32>
    %45 = vector.extract_strided_slice %43 {offsets = [2, 0], sizes = [104, 128], strides = [1, 1]} : vector<128x128xf32> to vector<104x128xf32>
    %46 = vector.extract_strided_slice %43 {offsets = [20, 0], sizes = [104, 128], strides = [1, 1]} : vector<128x128xf32> to vector<104x128xf32>
    %47 = vector.extract_strided_slice %43 {offsets = [22, 0], sizes = [104, 128], strides = [1, 1]} : vector<128x128xf32> to vector<104x128xf32>
    %48 = tpu.concatenate %44, %45, %46, %47 in 1 : vector<104x128xf32>, vector<104x128xf32>, vector<104x128xf32>, vector<104x128xf32> -> vector<104x512xf32>
    %c0_18 = arith.constant 0 : index
    %c0_19 = arith.constant 0 : index
    %49 = vector.load %arg9[%c0_18, %c0_19] : memref<2x104xf32, #tpu.memory_space<vmem>>, vector<2x104xf32>
    %cst_20 = arith.constant dense<0.000000e+00> : vector<2x512xf32>
    %50 = tpu.matmul %49, %48, %cst_20 {dimension_numbers = #tpu.dot_dimension_numbers<[1], [0], [0], [1], [0, 0, 1, 1], [], []>} : vector<2x104xf32>, vector<104x512xf32>, vector<2x512xf32> -> vector<2x512xf32>
    %c0_21 = arith.constant 0 : index
    %c0_22 = arith.constant 0 : index
    %51 = vector.load %arg10[%c0_21, %c0_22] : memref<512x256xf32, #tpu.memory_space<vmem>>, vector<512x256xf32>
    %cst_23 = arith.constant dense<0.000000e+00> : vector<2x256xf32>
    %52 = tpu.matmul %50, %51, %cst_23 {dimension_numbers = #tpu.dot_dimension_numbers<[1], [0], [0], [1], [0, 0, 1, 1], [], []>} : vector<2x512xf32>, vector<512x256xf32>, vector<2x256xf32> -> vector<2x256xf32>
    %c0_24 = arith.constant 0 : index
    %c0_25 = arith.constant 0 : index
    %53 = vector.load %arg2[%c0_24, %c0_25] : memref<2x1xi32, #tpu.memory_space<vmem>>, vector<2x1xi32>
    %54 = tpu.iota {dimensions = array<i32: 1>} : vector<2x6xi32>
    %55 = vector.broadcast %53 : vector<2x1xi32> to vector<2x6xi32>
    %56 = arith.cmpi eq, %54, %55 : vector<2x6xi32>
    %57 = arith.extui %56 : vector<2x6xi1> to vector<2x6xi32>
    %58 = arith.sitofp %57 : vector<2x6xi32> to vector<2x6xf32>
    %59 = tpu.concatenate %52, %58 in 1 : vector<2x256xf32>, vector<2x6xf32> -> vector<2x262xf32>
    %c0_26 = arith.constant 0 : index
    %c0_27 = arith.constant 0 : index
    %60 = vector.load %arg11[%c0_26, %c0_27] : memref<2x262xf32, #tpu.memory_space<vmem>>, vector<2x262xf32>
    tpu.vector_store %arg11[%c0_26, %c0_27], %59 {strides = array<i32>} : memref<2x262xf32, #tpu.memory_space<vmem>>, vector<2x262xf32>,
    return
  }
  func.func @transform_0(%arg0: i32) -> (i32, i32) {
    %c0_i32 = arith.constant 0 : i32
    %c0_i32_0 = arith.constant 0 : i32
    %c0_i32_1 = arith.constant 0 : i32
    return %c0_i32, %c0_i32_0 : i32, i32
  }
  func.func @transform_1(%arg0: i32) -> (i32, i32) {
    %c0_i32 = arith.constant 0 : i32
    %c0_i32_0 = arith.constant 0 : i32
    %c0_i32_1 = arith.constant 0 : i32
    return %c0_i32, %c0_i32_0 : i32, i32
  }
  func.func @transform_2(%arg0: i32) -> (i32, i32) {
    %c0_i32 = arith.constant 0 : i32
    %c0_i32_0 = arith.constant 0 : i32
    %c0_i32_1 = arith.constant 0 : i32
    return %c0_i32, %c0_i32_0 : i32, i32
  }
  func.func @transform_3(%arg0: i32) -> (i32, i32) {
    %c0_i32 = arith.constant 0 : i32
    %c0_i32_0 = arith.constant 0 : i32
    %c0_i32_1 = arith.constant 0 : i32
    return %c0_i32, %c0_i32_0 : i32, i32
  }
  func.func @transform_4(%arg0: i32) -> (i32, i32) {
    %c0_i32 = arith.constant 0 : i32
    %c0_i32_0 = arith.constant 0 : i32
    %c0_i32_1 = arith.constant 0 : i32
    return %c0_i32, %c0_i32_0 : i32, i32
  }
  func.func @transform_5(%arg0: i32) -> (i32, i32) {
    %c0_i32 = arith.constant 0 : i32
    %c0_i32_0 = arith.constant 0 : i32
    %c0_i32_1 = arith.constant 0 : i32
    return %c0_i32, %c0_i32_0 : i32, i32
  }
  func.func @transform_6(%arg0: i32) -> (i32, i32) {
    %c0_i32 = arith.constant 0 : i32
    %c0_i32_0 = arith.constant 0 : i32
    %c0_i32_1 = arith.constant 0 : i32
    return %c0_i32, %c0_i32_0 : i32, i32
  }
  func.func @transform_7(%arg0: i32) -> (i32, i32) {
    %c0_i32 = arith.constant 0 : i32
    %c0_i32_0 = arith.constant 0 : i32
    %c0_i32_1 = arith.constant 0 : i32
    return %c0_i32, %c0_i32_0 : i32, i32
  }
  func.func @transform_8(%arg0: i32) -> (i32, i32) {
    %c0_i32 = arith.constant 0 : i32
    %c0_i32_0 = arith.constant 0 : i32
    %c0_i32_1 = arith.constant 0 : i32
    return %c0_i32, %c0_i32_0 : i32, i32
  }
  func.func @transform_9(%arg0: i32) -> (i32, i32) {
    %c0_i32 = arith.constant 0 : i32
    %c0_i32_0 = arith.constant 0 : i32
    %c0_i32_1 = arith.constant 0 : i32
    return %c0_i32, %c0_i32_0 : i32, i32
  }
  func.func @transform_10(%arg0: i32) -> (i32, i32) {
    %c0_i32 = arith.constant 0 : i32
    %c0_i32_0 = arith.constant 0 : i32
    %c0_i32_1 = arith.constant 0 : i32
    return %c0_i32, %c0_i32_0 : i32, i32
  }
}

</mosaic_0001>

<bundles_post_ra>
// kernel: forward.1
= control target key start
LH: loop header
LB: loop body
LE: loop exit
PB: predicated region body
PF: predicated region fallthrough
CT: control target
= control target key end

     0   :  { %v3541_v3 = vmov 0.0|0.0   ;;  %vm87_vm0 = vcmask 1046528   ;;  %s5831_s0 = inlined_call_operand.vmem [shape: f32[208,128], index: 0, kind: input, shape index: {}]   ;;  %s5832_s1 = inlined_call_operand.vmem [shape: s32[2,1], index: 1, kind: input, shape index: {}]   ;;  %s5833_s2 = inlined_call_operand.vmem [shape: f32[512,128], index: 2, kind: input, shape index: {}]   ;;  %s5834_s3 = inlined_call_operand.vmem [shape: f32[1,128], index: 3, kind: input, shape index: {}]   ;;  %s5835_s4 = inlined_call_operand.vmem [shape: f32[512,128], index: 4, kind: input, shape index: {}]   ;;  %s5836_s5 = inlined_call_operand.vmem [shape: f32[1,128], index: 5, kind: input, shape index: {}]   ;;  %s5837_s6 = inlined_call_operand.vmem [shape: f32[512,128], index: 6, kind: input, shape index: {}]   ;;  %s5838_s7 = inlined_call_operand.vmem [shape: f32[1,128], index: 7, kind: input, shape index: {}]   ;;  %s5839_s8 = inlined_call_operand.vmem [shape: f32[2,104], index: 8, kind: input, shape index: {}]   ;;  %s5840_s9 = inlined_call_operand.vmem [shape: f32[512,256], index: 9, kind: input, shape index: {}]   ;;  %s5841_s10 = inlined_call_operand.hbm [shape: f32[2,262], index: 10, kind: output, shape index: {}]  }
   0x1   :  { %v310_v0 = vld [vmem:[%s5833_s2] sm:$0xff]  ;;  %v311_v1 = vld [vmem:[%s5833_s2 + $0x8] sm:$0xff]  ;;  %v312_v2 = vld [vmem:[%s5833_s2 + $0x10] sm:$0xff]  ;;  %2924 = vmatprep.subr.bf16.mxu0 %v3541_v3  ;;  %3356 = vmatprep.subr.bf16.mxu1 %v3541_v3 }
   0x2   :  { %v2925_v4 = vpack.c.bf16 %v311_v1, %v310_v0  ;;  %v313_v5 = vld [vmem:[%s5833_s2 + $0x18] sm:$0xff]  ;;  %v314_v7 = vld [vmem:[%s5833_s2 + $0x20] sm:$0xff]  ;;  %v315_v8 = vld [vmem:[%s5833_s2 + $0x28] sm:$0xff] }
   0x3   :  { %v2928_v6 = vpack.c.bf16 %v313_v5, %v312_v2  ;;  %v2931_v9 = vpack.c.bf16 %v315_v8, %v314_v7  ;;  %v316_v10 = vld [vmem:[%s5833_s2 + $0x30] sm:$0xff]  ;;  %v317_v11 = vld [vmem:[%s5833_s2 + $0x38] sm:$0xff]  ;;  %v3634_v12 = vld [vmem:[%s5831_s0] sm:$0xff] }
   0x4   :  { %2926 = vmatpush1.bf16.msra.mxu0 %v2925_v4  ;;  %3372 = vmatpush1.bf16.msra.mxu1 %v2925_v4  ;;  %v2934_v13 = vpack.c.bf16 %v317_v11, %v316_v10  ;;  %v3639_v14 = vld [vmem:[%s5831_s0 + $0x8] sm:$0xff]  ;;  %v88_v15 = vrot.slane %v3634_v12, 1  ;;  %v318_v16 = vld [vmem:[%s5833_s2 + $0x40] sm:$0xff]  ;;  %v320_v21 = vld [vmem:[%s5833_s2 + $0x50] sm:$0xff] }
   0x5   :  { %2927 = vmatprep.subr.bf16.mxu0 %v3541_v3  ;;  %3357 = vmatprep.subr.bf16.mxu1 %v3541_v3  ;;  %v319_v17 = vld [vmem:[%s5833_s2 + $0x48] sm:$0xff]  ;;  %v89_v18 = vrot.slane %v3639_v14, 1  ;;  %v321_v22 = vld [vmem:[%s5833_s2 + $0x58] sm:$0xff]  ;;  %v322_v24 = vld [vmem:[%s5833_s2 + $0x60] sm:$0xff] }
   0x6   :  { %v2937_v20 = vpack.c.bf16 %v319_v17, %v318_v16  ;;  %v2940_v23 = vpack.c.bf16 %v321_v22, %v320_v21  ;;  %v323_v25 = vld [vmem:[%s5833_s2 + $0x68] sm:$0xff]  ;;  %v324_v27 = vld [vmem:[%s5833_s2 + $0x70] sm:$0xff]  ;;  %v325_v28 = vld [vmem:[%s5833_s2 + $0x78] sm:$0xff] }
   0x7   :  { %v90_v19 = vsel %vm87_vm0, %v88_v15, %v89_v18  ;;  %v2943_v26 = vpack.c.bf16 %v323_v25, %v322_v24  ;;  %v2946_v29 = vpack.c.bf16 %v325_v28, %v324_v27 }
   0x8   :  { %2929 = vmatpush1.bf16.msra.mxu0 %v2928_v6  ;;  %3373 = vmatpush1.bf16.msra.mxu1 %v2928_v6 }
   0x9   :  { %2930 = vmatprep.subr.bf16.mxu0 %v3541_v3  ;;  %3358 = vmatprep.subr.bf16.mxu1 %v3541_v3 }
   0xa   :  { %445 = vmatprep.mubr.f32.mxu0 %v90_v19 }
   0xc   :  { %2932 = vmatpush1.bf16.msra.mxu0 %v2931_v9  ;;  %3374 = vmatpush1.bf16.msra.mxu1 %v2931_v9 }
   0xd   :  { %2933 = vmatprep.subr.bf16.mxu0 %v3541_v3  ;;  %3359 = vmatprep.subr.bf16.mxu1 %v3541_v3 }
  0x10   :  { %2935 = vmatpush1.bf16.msra.mxu0 %v2934_v13  ;;  %3375 = vmatpush1.bf16.msra.mxu1 %v2934_v13 }
  0x11   :  { %2936 = vmatprep.subr.bf16.mxu0 %v3541_v3  ;;  %3360 = vmatprep.subr.bf16.mxu1 %v3541_v3 }
  0x14   :  { %2938 = vmatpush1.bf16.msra.mxu0 %v2937_v20  ;;  %3376 = vmatpush1.bf16.msra.mxu1 %v2937_v20 }
  0x15   :  { %2939 = vmatprep.subr.bf16.mxu0 %v3541_v3  ;;  %3361 = vmatprep.subr.bf16.mxu1 %v3541_v3 }
  0x18   :  { %2941 = vmatpush1.bf16.msra.mxu0 %v2940_v23  ;;  %3377 = vmatpush1.bf16.msra.mxu1 %v2940_v23 }
  0x19   :  { %2942 = vmatprep.subr.bf16.mxu0 %v3541_v3  ;;  %3362 = vmatprep.subr.bf16.mxu1 %v3541_v3 }
  0x1c   :  { %2944 = vmatpush1.bf16.msra.mxu0 %v2943_v26 }
  0x1d   :  { %15 = vsyncpa [#allocation3], 0  ;;  %2945 = vmatprep.subr.bf16.mxu0 %v3541_v3  ;;  %v326_v30 = vld [vmem:[%s5833_s2 + $0x80] sm:$0xff]  ;;  %v327_v31 = vld [vmem:[%s5833_s2 + $0x88] sm:$0xff]  ;;  %3378 = vmatpush1.bf16.msra.mxu1 %v2943_v26  ;;  %vm236_vm1 = vcmask 1044480   ;;  %vm162_vm2 = vcmask 1045504  }
  0x1e   :  { %3363 = vmatprep.subr.bf16.mxu1 %v3541_v3  ;;  %v2949_v32 = vpack.c.bf16 %v327_v31, %v326_v30  ;;  %v328_v33 = vld [vmem:[%s5833_s2 + $0x90] sm:$0xff]  ;;  %v329_v34 = vld [vmem:[%s5833_s2 + $0x98] sm:$0xff]  ;;  %v330_v36 = vld [vmem:[%s5833_s2 + $0xa0] sm:$0xff]  ;;  %vm1145_vm3 = vcmask 1041408   ;;  %vm1086_vm4 = vcmask 1043456   ;;  %vm2294_vm5 = vcmask 850944  }
  0x1f   :  { %v2952_v35 = vpack.c.bf16 %v329_v34, %v328_v33  ;;  %v331_v37 = vld [vmem:[%s5833_s2 + $0xa8] sm:$0xff]  ;;  %v332_v39 = vld [vmem:[%s5833_s2 + $0xb0] sm:$0xff]  ;;  %v333_v40 = vld [vmem:[%s5833_s2 + $0xb8] sm:$0xff]  ;;  %vm2739_vm7 = vcmask 1043458   ;;  %vm2741_vm9 = vcmask 46084  }
  0x20   :  { %2947 = vmatpush1.bf16.msra.mxu0 %v2946_v29  ;;  %v2955_v38 = vpack.c.bf16 %v331_v37, %v330_v36  ;;  %v2958_v41 = vpack.c.bf16 %v333_v40, %v332_v39  ;;  %v334_v42 = vld [vmem:[%s5833_s2 + $0xc0] sm:$0xff]  ;;  %v335_v43 = vld [vmem:[%s5833_s2 + $0xc8] sm:$0xff]  ;;  %v336_v45 = vld [vmem:[%s5833_s2 + $0xd0] sm:$0xff] }
  0x21   :  { %2948 = vmatprep.subr.bf16.mxu0 %v3541_v3  ;;  %3379 = vmatpush1.bf16.msra.mxu1 %v2946_v29  ;;  %v2961_v44 = vpack.c.bf16 %v335_v43, %v334_v42  ;;  %v337_v46 = vld [vmem:[%s5833_s2 + $0xd8] sm:$0xff]  ;;  %v338_v48 = vld [vmem:[%s5833_s2 + $0xe0] sm:$0xff]  ;;  %v339_v49 = vld [vmem:[%s5833_s2 + $0xe8] sm:$0xff] }
  0x22   :  { %3364 = vmatprep.subr.bf16.mxu1 %v3541_v3  ;;  %v2964_v47 = vpack.c.bf16 %v337_v46, %v336_v45  ;;  %v2967_v50 = vpack.c.bf16 %v339_v49, %v338_v48  ;;  %v340_v51 = vld [vmem:[%s5833_s2 + $0xf0] sm:$0xff]  ;;  %v341_v52 = vld [vmem:[%s5833_s2 + $0xf8] sm:$0xff]  ;;  %v3744_v53 = vld [vmem:[%s5831_s0 + $0x80] sm:$0xff] }
  0x23   :  { %v3749_v54 = vld [vmem:[%s5831_s0 + $0x10] sm:$0xff]  ;;  %v3755_v55 = vld [vmem:[%s5831_s0 + $0x88] sm:$0xff]  ;;  %v2970_v56 = vpack.c.bf16 %v341_v52, %v340_v51  ;;  %v266_v57 = vrot.slane %v3744_v53, 3  ;;  %v119_v59 = vrot.slane %v3744_v53, 1  ;;  %v192_v60 = vrot.slane %v3744_v53, 2  ;;  %v342_v63 = vld [vmem:[%s5833_s2 + $0x100] sm:$0xff] }
  0x24   :  { %2950 = vmatpush1.bf16.msra.mxu0 %v2949_v32  ;;  %v268_v58 = vrot.slane %v3755_v55, 3  ;;  %v121_v61 = vrot.slane %v3755_v55, 1  ;;  %v194_v62 = vrot.slane %v3755_v55, 2  ;;  %v343_v0 = vld [vmem:[%s5833_s2 + $0x108] sm:$0xff]  ;;  %v91_v1 = vrot.slane %v3749_v54, 1  ;;  %v3779_v4 = vld [vmem:[%s5831_s0 + $0x18] sm:$0xff]  ;;  %vm2740_vm8 = vmor %vm2739_vm7, %vm1145_vm3 }
  0x25   :  { %2951 = vmatprep.subr.bf16.mxu0 %v3541_v3  ;;  %3380 = vmatpush1.bf16.msra.mxu1 %v2949_v32  ;;  %v3793_v7 = vld [vmem:[%s5831_s0 + $0x90] sm:$0xff]  ;;  %v2973_v9 = vpack.c.bf16 %v343_v0, %v342_v63  ;;  %v345_v16 = vld [vmem:[%s5833_s2 + $0x118] sm:$0xff]  ;;  %v93_v17 = vrot.slane %v3779_v4, 1  ;;  %v3815_v20 = vld [vmem:[%s5831_s0 + $0x20] sm:$0xff] }
  0x26   :  { %3365 = vmatprep.subr.bf16.mxu1 %v3541_v3  ;;  %v3774_v2 = vsel %vm236_vm1, %v266_v57, %v268_v58  ;;  %v122_v5 = vsel %vm87_vm0, %v119_v59, %v121_v61  ;;  %v3788_v6 = vsel %vm162_vm2, %v192_v60, %v194_v62  ;;  %v270_v8 = vrot.slane %v3793_v7, 3  ;;  %v344_v15 = vld [vmem:[%s5833_s2 + $0x110] sm:$0xff]  ;;  %v3823_v21 = vld [vmem:[%s5831_s0 + $0x98] sm:$0xff]  ;;  %v346_v28 = vld [vmem:[%s5833_s2 + $0x120] sm:$0xff] }
  0x27   :  { %525 = vmatprep.mubr.f32.mxu1 %v122_v5  ;;  %v123_v10 = vrot.slane %v3793_v7, 1  ;;  %v196_v11 = vrot.slane %v3793_v7, 2  ;;  %v92_v13 = vsel %vm87_vm0, %v89_v18, %v91_v1  ;;  %v272_v23 = vrot.slane %v3823_v21, 3  ;;  %v3847_v31 = vld [vmem:[%s5831_s0 + $0x28] sm:$0xff]  ;;  %v3855_v33 = vld [vmem:[%s5831_s0 + $0xa0] sm:$0xff]  ;;  %v348_v40 = vld [vmem:[%s5833_s2 + $0x130] sm:$0xff] }
  0x28   :  { %2953 = vmatpush1.bf16.msra.mxu0 %v2952_v35  ;;  %v3810_v19 = vsel %vm236_vm1, %v268_v58, %v270_v8  ;;  %v2976_v24 = vpack.c.bf16 %v345_v16, %v344_v15  ;;  %v125_v25 = vrot.slane %v3823_v21, 1  ;;  %v198_v26 = vrot.slane %v3823_v21, 2  ;;  %v3886_v46 = vld [vmem:[%s5831_s0 + $0xa8] sm:$0xff]  ;;  %v3917_v0 = vld [vmem:[%s5831_s0 + $0xb0] sm:$0xff]  ;;  %vm2742_vm10 = vmor %vm2741_vm9, %vm2740_vm8 }
  0x29   :  { %2954 = vmatprep.subr.bf16.mxu0 %v3541_v3  ;;  %3381 = vmatpush1.bf16.msra.mxu1 %v2952_v35  ;;  %v3818_v18 = vsel %vm162_vm2, %v194_v62, %v196_v11  ;;  %v124_v22 = vsel %vm87_vm0, %v121_v61, %v123_v10  ;;  %v94_v27 = vsel %vm87_vm0, %v91_v1, %v93_v17  ;;  %v95_v29 = vrot.slane %v3815_v20, 1  ;;  %v3909_v62 = vld [vmem:[%s5831_s0 + $0x38] sm:$0xff] }
  0x2a   :  { %3366 = vmatprep.subr.bf16.mxu1 %v3541_v3  ;;  %v3842_v30 = vsel %vm236_vm1, %v270_v8, %v272_v23  ;;  %v3850_v32 = vsel %vm162_vm2, %v196_v11, %v198_v26  ;;  %v126_v34 = vsel %vm87_vm0, %v123_v10, %v125_v25  ;;  %v274_v35 = vrot.slane %v3855_v33, 3  ;;  %v352_v11 = vld [vmem:[%s5833_s2 + $0x150] sm:$0xff] }
  0x2b   :  { %v127_v37 = vrot.slane %v3855_v33, 1  ;;  %v96_v39 = vsel %vm87_vm0, %v93_v17, %v95_v29  ;;  %v97_v42 = vrot.slane %v3847_v31, 1  ;;  %v276_v48 = vrot.slane %v3886_v46, 3  ;;  %v3940_v17 = vld [vmem:[%s5831_s0 + $0x40] sm:$0xff] }
  0x2c   :  { %2956 = vmatpush1.bf16.msra.mxu0 %v2955_v38  ;;  %v3873_v43 = vsel %vm236_vm1, %v272_v23, %v274_v35  ;;  %v202_v51 = vrot.slane %v3886_v46, 2  ;;  %v278_v5 = vrot.slane %v3917_v0, 3  ;;  %v131_v8 = vrot.slane %v3917_v0, 1  ;;  %v3948_v23 = vld [vmem:[%s5831_s0 + $0xb8] sm:$0xff] }
  0x2d   :  { %2957 = vmatprep.subr.bf16.mxu0 %v3541_v3  ;;  %3382 = vmatpush1.bf16.msra.mxu1 %v2955_v38  ;;  %v200_v38 = vrot.slane %v3855_v33, 2  ;;  %v98_v52 = vsel %vm87_vm0, %v95_v29, %v97_v42  ;;  %v3904_v61 = vsel %vm236_vm1, %v274_v35, %v276_v48  ;;  %v101_v15 = vrot.slane %v3909_v62, 1  ;;  %v355_v29 = vld [vmem:[%s5833_s2 + $0x168] sm:$0xff] }
  0x2e   :  { %3367 = vmatprep.subr.bf16.mxu1 %v3541_v3  ;;  %v3935_v16 = vsel %vm236_vm1, %v276_v48, %v278_v5  ;;  %v357_v48 = vld [vmem:[%s5833_s2 + $0x178] sm:$0xff] }
  0x2f   :  { %v3881_v45 = vsel %vm162_vm2, %v198_v26, %v200_v38  ;;  %v3912_v63 = vsel %vm162_vm2, %v200_v38, %v202_v51  ;;  %v133_v26 = vrot.slane %v3948_v23, 1  ;;  %v3979_v38 = vld [vmem:[%s5831_s0 + $0xc0] sm:$0xff] }
  0x30   :  { %2959 = vmatpush1.bf16.msra.mxu0 %v2958_v41 }
  0x31   :  { %2960 = vmatprep.subr.bf16.mxu0 %v3541_v3  ;;  %3383 = vmatpush1.bf16.msra.mxu1 %v2958_v41  ;;  %v349_v41 = vld [vmem:[%s5833_s2 + $0x138] sm:$0xff] }
  0x32   :  { %3368 = vmatprep.subr.bf16.mxu1 %v3541_v3  ;;  %v2982_v49 = vpack.c.bf16 %v349_v41, %v348_v40  ;;  %v208_v41 = vrot.slane %v3979_v38, 2 }
  0x34   :  { %2962 = vmatpush1.bf16.msra.mxu0 %v2961_v44 }
  0x35   :  { %2963 = vmatprep.subr.bf16.mxu0 %v3541_v3  ;;  %3384 = vmatpush1.bf16.msra.mxu1 %v2961_v44  ;;  %v3878_v44 = vld [vmem:[%s5831_s0 + $0x30] sm:$0xff] }
  0x36   :  { %3369 = vmatprep.subr.bf16.mxu1 %v3541_v3  ;;  %v99_v58 = vrot.slane %v3878_v44, 1 }
  0x38   :  { %2965 = vmatpush1.bf16.msra.mxu0 %v2964_v47  ;;  %v100_v10 = vsel %vm87_vm0, %v97_v42, %v99_v58 }
  0x39   :  { %2966 = vmatprep.subr.bf16.mxu0 %v3541_v3  ;;  %3385 = vmatpush1.bf16.msra.mxu1 %v2964_v47  ;;  %v128_v47 = vsel %vm87_vm0, %v125_v25, %v127_v37 }
  0x3a   :  { %3370 = vmatprep.subr.bf16.mxu1 %v3541_v3 }
  0x3c   :  { %2968 = vmatpush1.bf16.msra.mxu0 %v2967_v50 }
  0x3d   :  { %2969 = vmatprep.subr.bf16.mxu0 %v3541_v3  ;;  %3386 = vmatpush1.bf16.msra.mxu1 %v2967_v50  ;;  %v129_v50 = vrot.slane %v3886_v46, 1 }
  0x3e   :  { %3371 = vmatprep.subr.bf16.mxu1 %v3541_v3 }
  0x3f   :  { %v130_v1 = vsel %vm87_vm0, %v127_v37, %v129_v50 }
  0x40   :  { %2971 = vmatpush1.bf16.msra.mxu0 %v2970_v56 }
  0x41   :  { %2972 = vmatprep.subr.bf16.mxu0 %v3541_v3  ;;  %3387 = vmatpush1.bf16.msra.mxu1 %v2970_v56  ;;  %v351_v56 = vld [vmem:[%s5833_s2 + $0x148] sm:$0xff] }
  0x42   :  { %3020 = vmatprep.subr.bf16.mxu1 %v3541_v3 }
  0x43   :  { %446 = vmatmul.mubr.f32.vlgmr.msra.gmra.mrb[0].mxu0 %v3634_v12  ;;  %v347_v12 = vld [vmem:[%s5833_s2 + $0x128] sm:$0xff] }
  0x44   :  { %2974 = vmatpush1.bf16.msra.mxu0 %v2973_v9  ;;  %450 = vmatprep.mubr.f32.mxu0 %v92_v13  ;;  %v2979_v36 = vpack.c.bf16 %v347_v12, %v346_v28  ;;  %v204_v9 = vrot.slane %v3917_v0, 2  ;;  %v353_v13 = vld [vmem:[%s5833_s2 + $0x158] sm:$0xff]  ;;  %v102_v28 = vsel %vm87_vm0, %v99_v58, %v101_v15  ;;  %v354_v12 = vld [vmem:[%s5833_s2 + $0x160] sm:$0xff] }
  0x45   :  { %2975 = vmatprep.subr.bf16.mxu0 %v3541_v3  ;;  %526 = vmatmul.mubr.f32.vlgmr.msra.gmra.mrb[0].mxu1 %v3744_v53  ;;  %v2988_v25 = vpack.c.bf16 %v353_v13, %v352_v11  ;;  %v2991_v40 = vpack.c.bf16 %v355_v29, %v354_v12  ;;  %v1208_v12 = vld [vmem:[%s5835_s4 + $0x20] sm:$0xff]  ;;  %v1209_v29 = vld [vmem:[%s5835_s4 + $0x28] sm:$0xff] }
  0x46   :  { %530 = vmatprep.mubr.f32.mxu1 %v124_v22  ;;  %v3943_v22 = vsel %vm162_vm2, %v202_v51, %v204_v9  ;;  %v135_v51 = vrot.slane %v3979_v38, 1  ;;  %v61_v53 = vld [vmem:[%s5831_s0 + $0xc8] sm:$0xff] }
  0x47   :  { %451 = vmatmul.mubr.f32.gmra.mrb[2].mxu0 %v3639_v14 }
  0x48   :  { %2977 = vmatpush1.bf16.msra.mxu0 %v2976_v24  ;;  %455 = vmatprep.mubr.f32.mxu0 %v94_v27  ;;  %v280_v24 = vrot.slane %v3948_v23, 3  ;;  %v206_v27 = vrot.slane %v3948_v23, 2 }
  0x49   :  { %2978 = vmatprep.subr.bf16.mxu0 %v3541_v3  ;;  %531 = vmatmul.mubr.f32.gmra.mrb[2].mxu1 %v3755_v55  ;;  %v350_v55 = vld [vmem:[%s5833_s2 + $0x140] sm:$0xff] }
  0x4a   :  { %535 = vmatprep.mubr.f32.mxu1 %v126_v34  ;;  %v103_v34 = vrot.slane %v3940_v17, 1  ;;  %v3966_v35 = vsel %vm236_vm1, %v278_v5, %v280_v24  ;;  %v3974_v37 = vsel %vm162_vm2, %v204_v9, %v206_v27  ;;  %v359_v5 = vld [vmem:[%s5833_s2 + $0x188] sm:$0xff]  ;;  %v1204_v9 = vld [vmem:[%s5835_s4] sm:$0xff] }
  0x4b   :  { %456 = vmatmul.mubr.f32.gmra.mrb[4].mxu0 %v3749_v54 }
  0x4c   :  { %2980 = vmatpush1.bf16.msra.mxu0 %v2979_v36  ;;  %460 = vmatprep.mubr.f32.mxu0 %v96_v39  ;;  %v3971_v36 = vld [vmem:[%s5831_s0 + $0x48] sm:$0xff]  ;;  %v282_v39 = vrot.slane %v3979_v38, 3  ;;  %v104_v42 = vsel %vm87_vm0, %v101_v15, %v103_v34  ;;  %v1207_v15 = vld [vmem:[%s5835_s4 + $0x18] sm:$0xff]  ;;  %v1226_v38 = vld [vmem:[%s5835_s4 + $0xb0] sm:$0xff] }
  0x4d   :  { %2981 = vmatprep.subr.bf16.mxu0 %v3541_v3  ;;  %536 = vmatmul.mubr.f32.gmra.mrb[4].mxu1 %v3793_v7  ;;  %v2985_v7 = vpack.c.bf16 %v351_v56, %v350_v55  ;;  %v4009_v55 = vsel %vm162_vm2, %v206_v27, %v208_v41  ;;  %v4054_v27 = vld [vmem:[%s5831_s0 + $0x60] sm:$0xff] }
  0x4e   :  { %540 = vmatprep.mubr.f32.mxu1 %v128_v47  ;;  %v356_v47 = vld [vmem:[%s5833_s2 + $0x170] sm:$0xff] }
  0x4f   :  { %461 = vmatmul.mubr.f32.gmra.mrb[6].mxu0 %v3779_v4  ;;  %v2994_v56 = vpack.c.bf16 %v357_v48, %v356_v47  ;;  %v4076_v47 = vld [vmem:[%s5831_s0 + $0x68] sm:$0xff]  ;;  %v3027_v48 = vpack.c.bf16 %v1209_v29, %v1208_v12  ;;  %v1215_v12 = vld [vmem:[%s5835_s4 + $0x58] sm:$0xff] }
  0x50   :  { %2983 = vmatpush1.bf16.msra.mxu0 %v2982_v49  ;;  %465 = vmatprep.mubr.f32.mxu0 %v98_v52  ;;  %v105_v49 = vrot.slane %v3971_v36, 1  ;;  %v4004_v52 = vld [vmem:[%s5831_s0 + $0x50] sm:$0xff] }
  0x51   :  { %2984 = vmatprep.subr.bf16.mxu0 %v3541_v3  ;;  %541 = vmatmul.mubr.f32.gmra.mrb[6].mxu1 %v3823_v21  ;;  %v132_v21 = vsel %vm87_vm0, %v129_v50, %v131_v8  ;;  %v3998_v50 = vsel %vm236_vm1, %v280_v24, %v282_v39  ;;  %v360_v24 = vld [vmem:[%s5833_s2 + $0x190] sm:$0xff] }
  0x52   :  { %545 = vmatprep.mubr.f32.mxu1 %v130_v1  ;;  %v106_v58 = vsel %vm87_vm0, %v103_v34, %v105_v49  ;;  %v358_v1 = vld [vmem:[%s5833_s2 + $0x180] sm:$0xff] }
  0x53   :  { %466 = vmatmul.mubr.f32.gmra.mrb[8].mxu0 %v3815_v20  ;;  %v2997_v11 = vpack.c.bf16 %v359_v5, %v358_v1  ;;  %v365_v1 = vld [vmem:[%s5833_s2 + $0x1b8] sm:$0xff]  ;;  %v113_v5 = vrot.slane %v4076_v47, 1 }
  0x54   :  { %2986 = vmatpush1.bf16.msra.mxu0 %v2985_v7  ;;  %470 = vmatprep.mubr.f32.mxu0 %v100_v10  ;;  %v107_v7 = vrot.slane %v4004_v52, 1  ;;  %v1205_v10 = vld [vmem:[%s5835_s4 + $0x8] sm:$0xff] }
  0x55   :  { %2987 = vmatprep.subr.bf16.mxu0 %v3541_v3  ;;  %546 = vmatmul.mubr.f32.gmra.mrb[8].mxu1 %v3855_v33  ;;  %v134_v33 = vsel %vm87_vm0, %v131_v8, %v133_v26  ;;  %v4026_v8 = vld [vmem:[%s5831_s0 + $0x58] sm:$0xff]  ;;  %v3021_v13 = vpack.c.bf16 %v1205_v10, %v1204_v9  ;;  %v1212_v10 = vld [vmem:[%s5835_s4 + $0x40] sm:$0xff] }
  0x56   :  { %550 = vmatprep.mubr.f32.mxu1 %v132_v21  ;;  %v108_v21 = vsel %vm87_vm0, %v105_v49, %v107_v7  ;;  %v1210_v49 = vld [vmem:[%s5835_s4 + $0x30] sm:$0xff] }
  0x57   :  { %471 = vmatmul.mubr.f32.gmra.mrb[10].mxu0 %v3847_v31  ;;  %3022 = vmatpush1.bf16.msra.mxu1 %v3021_v13 }
  0x58   :  { %2989 = vmatpush1.bf16.msra.mxu0 %v2988_v25  ;;  %475 = vmatprep.mubr.f32.mxu0 %v102_v28  ;;  %v361_v25 = vld [vmem:[%s5833_s2 + $0x198] sm:$0xff] }
  0x59   :  { %2990 = vmatprep.subr.bf16.mxu0 %v3541_v3  ;;  %551 = vmatmul.mubr.f32.gmra.mrb[10].mxu1 %v3886_v46  ;;  %v136_v46 = vsel %vm87_vm0, %v133_v26, %v135_v51  ;;  %v109_v26 = vrot.slane %v4026_v8, 1  ;;  %v1211_v51 = vld [vmem:[%s5835_s4 + $0x38] sm:$0xff] }
  0x5a   :  { %555 = vmatprep.mubr.f32.mxu1 %v134_v33  ;;  %3023 = vmatprep.subr.bf16.mxu1 %v3541_v3  ;;  %v362_v33 = vld [vmem:[%s5833_s2 + $0x1a0] sm:$0xff]  ;;  %v3030_v9 = vpack.c.bf16 %v1211_v51, %v1210_v49  ;;  %v1217_v49 = vld [vmem:[%s5835_s4 + $0x68] sm:$0xff] }
  0x5b   :  { %476 = vmatmul.mubr.f32.gmra.mrb[12].mxu0 %v3878_v44  ;;  %v110_v34 = vsel %vm87_vm0, %v107_v7, %v109_v26  ;;  %v4098_v7 = vld [vmem:[%s5831_s0 + $0x70] sm:$0xff] }
  0x5c   :  { %2992 = vmatpush1.bf16.msra.mxu0 %v2991_v40  ;;  %480 = vmatprep.mubr.f32.mxu0 %v104_v42  ;;  %v363_v40 = vld [vmem:[%s5833_s2 + $0x1a8] sm:$0xff]  ;;  %v111_v42 = vrot.slane %v4054_v27, 1 }
  0x5d   :  { %2993 = vmatprep.subr.bf16.mxu0 %v3541_v3  ;;  %556 = vmatmul.mubr.f32.gmra.mrb[12].mxu1 %v3917_v0  ;;  %v1206_v0 = vld [vmem:[%s5835_s4 + $0x10] sm:$0xff] }
  0x5e   :  { %560 = vmatprep.mubr.f32.mxu1 %v136_v46  ;;  %v3024_v28 = vpack.c.bf16 %v1207_v15, %v1206_v0  ;;  %v3003_v46 = vpack.c.bf16 %v363_v40, %v362_v33  ;;  %v1213_v0 = vld [vmem:[%s5835_s4 + $0x48] sm:$0xff]  ;;  %v114_v13 = vsel %vm87_vm0, %v111_v42, %v113_v5  ;;  %v366_v15 = vld [vmem:[%s5833_s2 + $0x1c0] sm:$0xff]  ;;  %v369_v33 = vld [vmem:[%s5833_s2 + $0x1d8] sm:$0xff] }
  0x5f   :  { %481 = vmatmul.mubr.f32.gmra.mrb[14].mxu0 %v3909_v62 }
  0x60   :  { %2995 = vmatpush1.bf16.msra.mxu0 %v2994_v56  ;;  %485 = vmatprep.mubr.f32.mxu0 %v106_v58  ;;  %v112_v56 = vsel %vm87_vm0, %v109_v26, %v111_v42  ;;  %v364_v58 = vld [vmem:[%s5833_s2 + $0x1b0] sm:$0xff]  ;;  %v3033_v26 = vpack.c.bf16 %v1213_v0, %v1212_v10  ;;  %v373_v0 = vld [vmem:[%s5833_s2 + $0x1f8] sm:$0xff] }
  0x61   :  { %2996 = vmatprep.subr.bf16.mxu0 %v3541_v3  ;;  %561 = vmatmul.mubr.f32.gmra.mrb[14].mxu1 %v3948_v23  ;;  %v3000_v23 = vpack.c.bf16 %v361_v25, %v360_v24  ;;  %v115_v24 = vrot.slane %v4098_v7, 1  ;;  %v4120_v25 = vld [vmem:[%s5831_s0 + $0x78] sm:$0xff]  ;;  %v372_v10 = vld [vmem:[%s5833_s2 + $0x1f0] sm:$0xff] }
  0x62   :  { %3025 = vmatpush1.bf16.msra.mxu1 %v3024_v28  ;;  %v1214_v28 = vld [vmem:[%s5835_s4 + $0x50] sm:$0xff]  ;;  %v117_v40 = vrot.slane %v4120_v25, 1 }
  0x63   :  { %486 = vmatmul.mubr.f32.gmra.mrb[16].mxu0 %v3940_v17  ;;  %3026 = vmatprep.subr.bf16.mxu1 %v3541_v3  ;;  %v3036_v42 = vpack.c.bf16 %v1215_v12, %v1214_v28  ;;  %v166_v12 = vrot.slane %v3779_v4, 2 }
  0x64   :  { %2998 = vmatpush1.bf16.msra.mxu0 %v2997_v11  ;;  %490 = vmatprep.mubr.f32.mxu0 %v108_v21  ;;  %v3006_v11 = vpack.c.bf16 %v365_v1, %v364_v58  ;;  %v367_v21 = vld [vmem:[%s5833_s2 + $0x1c8] sm:$0xff] }
  0x65   :  { %2999 = vmatprep.subr.bf16.mxu0 %v3541_v3  ;;  %v3009_v29 = vpack.c.bf16 %v367_v21, %v366_v15  ;;  %v371_v58 = vld [vmem:[%s5833_s2 + $0x1e8] sm:$0xff]  ;;  %v163_v15 = vrot.slane %v3639_v14, 2  ;;  %v164_v21 = vrot.slane %v3749_v54, 2 }
  0x66   :  { %3028 = vmatpush1.bf16.msra.mxu1 %v3027_v48  ;;  %v1216_v48 = vld [vmem:[%s5835_s4 + $0x60] sm:$0xff] }
  0x67   :  { %491 = vmatmul.mubr.f32.gmra.mrb[18].mxu0 %v3971_v36  ;;  %3029 = vmatprep.subr.bf16.mxu1 %v3541_v3  ;;  %v3039_v1 = vpack.c.bf16 %v1217_v49, %v1216_v48  ;;  %v165_v28 = vsel %vm162_vm2, %v163_v15, %v164_v21  ;;  %v246_v48 = vrot.slane %v3878_v44, 3 }
  0x68   :  { %3001 = vmatpush1.bf16.msra.mxu0 %v3000_v23  ;;  %495 = vmatprep.mubr.f32.mxu0 %v110_v34  ;;  %v116_v23 = vsel %vm87_vm0, %v113_v5, %v115_v24  ;;  %v368_v34 = vld [vmem:[%s5833_s2 + $0x1d0] sm:$0xff] }
  0x69   :  { %3002 = vmatprep.subr.bf16.mxu0 %v3541_v3  ;;  %v3012_v51 = vpack.c.bf16 %v369_v33, %v368_v34  ;;  %v244_v33 = vrot.slane %v3847_v31, 3 }
  0x6a   :  { %3031 = vmatpush1.bf16.msra.mxu1 %v3030_v9  ;;  %v120_v9 = vsel %vm87_vm0, %v117_v40, %v119_v59  ;;  %v3018_v59 = vpack.c.bf16 %v373_v0, %v372_v10  ;;  %v252_v10 = vrot.slane %v3971_v36, 3 }
  0x6b   :  { %496 = vmatmul.mubr.f32.gmra.mrb[20].mxu0 %v4004_v52  ;;  %3032 = vmatprep.subr.bf16.mxu1 %v3541_v3 }
  0x6c   :  { %3004 = vmatpush1.bf16.msra.mxu0 %v3003_v46  ;;  %500 = vmatprep.mubr.f32.mxu0 %v112_v56  ;;  %v118_v46 = vsel %vm87_vm0, %v115_v24, %v117_v40  ;;  %v370_v56 = vld [vmem:[%s5833_s2 + $0x1e0] sm:$0xff] }
  0x6d   :  { %3005 = vmatprep.subr.bf16.mxu0 %v3541_v3  ;;  %v3015_v5 = vpack.c.bf16 %v371_v58, %v370_v56 }
  0x6e   :  { %3034 = vmatpush1.bf16.msra.mxu1 %v3033_v26  ;;  %v240_v26 = vrot.slane %v3779_v4, 3  ;;  %v170_v4 = vrot.slane %v3847_v31, 2  ;;  %v174_v31 = vrot.slane %v3909_v62, 2 }
  0x6f   :  { %501 = vmatmul.mubr.f32.gmra.mrb[22].mxu0 %v4026_v8  ;;  %3035 = vmatprep.subr.bf16.mxu1 %v3541_v3 }
  0x70   :  { %3007 = vmatpush1.bf16.msra.mxu0 %v3006_v11  ;;  %505 = vmatprep.mubr.f32.mxu0 %v114_v13  ;;  %v237_v11 = vrot.slane %v3639_v14, 3  ;;  %v238_v13 = vrot.slane %v3749_v54, 3  ;;  %v242_v14 = vrot.slane %v3815_v20, 3  ;;  %v167_v54 = vsel %vm162_vm2, %v164_v21, %v166_v12 }
  0x71   :  { %3008 = vmatprep.subr.bf16.mxu0 %v3541_v3  ;;  %v256_v21 = vrot.slane %v4026_v8, 3 }
  0x72   :  { %3037 = vmatpush1.bf16.msra.mxu1 %v3036_v42  ;;  %v239_v24 = vsel %vm236_vm1, %v237_v11, %v238_v13  ;;  %v243_v34 = vsel %vm236_vm1, %v240_v26, %v242_v14  ;;  %v245_v42 = vsel %vm236_vm1, %v242_v14, %v244_v33  ;;  %v260_v14 = vrot.slane %v4076_v47, 3 }
  0x73   :  { %506 = vmatmul.mubr.f32.gmra.mrb[24].mxu0 %v4054_v27  ;;  %3038 = vmatprep.subr.bf16.mxu1 %v3541_v3 }
  0x74   :  { %3010 = vmatpush1.bf16.msra.mxu0 %v3009_v29  ;;  %510 = vmatprep.mubr.f32.mxu0 %v116_v23  ;;  %v241_v29 = vsel %vm236_vm1, %v238_v13, %v240_v26  ;;  %v168_v23 = vrot.slane %v3815_v20, 2  ;;  %v172_v20 = vrot.slane %v3878_v44, 2  ;;  %v176_v44 = vrot.slane %v3940_v17, 2 }
  0x75   :  { %3011 = vmatprep.subr.bf16.mxu0 %v3541_v3  ;;  %v254_v13 = vrot.slane %v4004_v52, 3 }
  0x76   :  { %3040 = vmatpush1.bf16.msra.mxu1 %v3039_v1  ;;  %v169_v40 = vsel %vm162_vm2, %v166_v12, %v168_v23  ;;  %v171_v49 = vsel %vm162_vm2, %v168_v23, %v170_v4  ;;  %v173_v56 = vsel %vm162_vm2, %v170_v4, %v172_v20  ;;  %v250_v1 = vrot.slane %v3940_v17, 3 }
  0x77   :  { %511 = vmatmul.mubr.f32.gmra.mrb[26].mxu0 %v4076_v47  ;;  %3041 = vmatprep.subr.bf16.mxu1 %v3541_v3  ;;  %v177_v0 = vsel %vm162_vm2, %v174_v31, %v176_v44  ;;  %v180_v17 = vrot.slane %v4004_v52, 2  ;;  %v255_v15 = vsel %vm236_vm1, %v252_v10, %v254_v13  ;;  %v257_v26 = vsel %vm236_vm1, %v254_v13, %v256_v21 }
  0x78   :  { %3013 = vmatpush1.bf16.msra.mxu0 %v3012_v51  ;;  %515 = vmatprep.mubr.f32.mxu0 %v118_v46  ;;  %v247_v51 = vsel %vm236_vm1, %v244_v33, %v246_v48  ;;  %v248_v46 = vrot.slane %v3909_v62, 3  ;;  %v178_v62 = vrot.slane %v3971_v36, 2  ;;  %v253_v11 = vsel %vm236_vm1, %v250_v1, %v252_v10 }
  0x79   :  { %3014 = vmatprep.subr.bf16.mxu0 %v3541_v3  ;;  %v182_v36 = vrot.slane %v4026_v8, 2  ;;  %v184_v52 = vrot.slane %v4054_v27, 2  ;;  %v186_v8 = vrot.slane %v4076_v47, 2  ;;  %v264_v4 = vrot.slane %v4120_v25, 3 }
  0x7a   :  { %v249_v58 = vsel %vm236_vm1, %v246_v48, %v248_v46  ;;  %v190_v47 = vrot.slane %v4120_v25, 2 }
  0x7b   :  { %516 = vmatmul.mubr.f32.gmra.mrb[28].mxu0 %v4098_v7  ;;  %v183_v12 = vsel %vm162_vm2, %v180_v17, %v182_v36  ;;  %v187_v33 = vsel %vm162_vm2, %v184_v52, %v186_v8 }
  0x7c   :  { %3016 = vmatpush1.bf16.msra.mxu0 %v3015_v5  ;;  %520 = vmatprep.mubr.f32.mxu0 %v120_v9  ;;  %v175_v5 = vsel %vm162_vm2, %v172_v20, %v174_v31  ;;  %v251_v9 = vsel %vm236_vm1, %v248_v46, %v250_v1  ;;  %v193_v20 = vsel %vm162_vm2, %v190_v47, %v192_v60  ;;  %v1219_v60 = vld [vmem:[%s5835_s4 + $0x78] sm:$0xff]  ;;  %v1232_v31 = vld [vmem:[%s5835_s4 + $0xe0] sm:$0xff] }
  0x7d   :  { %3017 = vmatprep.subr.bf16.mxu0 %v3541_v3  ;;  %v1231_v46 = vld [vmem:[%s5835_s4 + $0xd8] sm:$0xff] }
  0x7f   :  { %521 = vmatmul.mubr.f32.gmra.mrb[30].mxu0 %v4120_v25 }
  0x80   :  { %3019 = vmatpush1.bf16.msra.mxu0 %v3018_v59  ;;  %630 = vmatprep.mubr.f32.mxu0 %v239_v24  ;;  %v179_v59 = vsel %vm162_vm2, %v176_v44, %v178_v62  ;;  %v181_v24 = vsel %vm162_vm2, %v178_v62, %v180_v17  ;;  %v1235_v44 = vld [vmem:[%s5835_s4 + $0xf8] sm:$0xff] }
  0x83   :  { %631 = vmatmul.mubr.f32.vlgmr.msra.gmra.mrb[0].mxu0 %v165_v28  ;;  %v258_v28 = vrot.slane %v4054_v27, 3  ;;  %v188_v27 = vrot.slane %v4098_v7, 2 }
  0x84   :  { %635 = vmatprep.mubr.f32.mxu0 %v241_v29 }
  0x85   :  { %v259_v29 = vsel %vm236_vm1, %v256_v21, %v258_v28  ;;  %v261_v23 = vsel %vm236_vm1, %v258_v28, %v260_v14 }
  0x87   :  { %636 = vmatmul.mubr.f32.gmra.mrb[2].mxu0 %v167_v54  ;;  %v185_v54 = vsel %vm162_vm2, %v182_v36, %v184_v52 }
  0x88   :  { %640 = vmatprep.mubr.f32.mxu0 %v243_v34  ;;  %v262_v34 = vrot.slane %v4098_v7, 3  ;;  %v267_v7 = vsel %vm236_vm1, %v264_v4, %v266_v57  ;;  %v1218_v57 = vld [vmem:[%s5835_s4 + $0x70] sm:$0xff] }
  0x8a   :  { %v265_v48 = vsel %vm236_vm1, %v262_v34, %v264_v4 }
  0x8b   :  { %641 = vmatmul.mubr.f32.gmra.mrb[4].mxu0 %v169_v40  ;;  %v263_v40 = vsel %vm236_vm1, %v260_v14, %v262_v34  ;;  %v4342_v14 = vld [vmem:[%s5834_s3] ss:$0 sm:$0xff] }
  0x8c   :  { %645 = vmatprep.mubr.f32.mxu0 %v245_v42  ;;  %v189_v42 = vsel %vm162_vm2, %v186_v8, %v188_v27 }
  0x8f   :  { %646 = vmatmul.mubr.f32.gmra.mrb[6].mxu0 %v171_v49  ;;  %v191_v49 = vsel %vm162_vm2, %v188_v27, %v190_v47 }
  0x90   :  { %650 = vmatprep.mubr.f32.mxu0 %v247_v51  ;;  %v1230_v51 = vld [vmem:[%s5835_s4 + $0xd0] sm:$0xff] }
  0x93   :  { %651 = vmatmul.mubr.f32.gmra.mrb[8].mxu0 %v173_v56  ;;  %v3060_v56 = vpack.c.bf16 %v1231_v46, %v1230_v51 }
  0x94   :  { %655 = vmatprep.mubr.f32.mxu0 %v249_v58  ;;  %v1233_v58 = vld [vmem:[%s5835_s4 + $0xe8] sm:$0xff] }
  0x95   :  { %v3063_v1 = vpack.c.bf16 %v1233_v58, %v1232_v31 }
  0x97   :  { %656 = vmatmul.mubr.f32.gmra.mrb[10].mxu0 %v175_v5  ;;  %v1234_v5 = vld [vmem:[%s5835_s4 + $0xf0] sm:$0xff] }
  0x98   :  { %660 = vmatprep.mubr.f32.mxu0 %v251_v9  ;;  %v3066_v9 = vpack.c.bf16 %v1235_v44, %v1234_v5 }
  0x9b   :  { %661 = vmatmul.mubr.f32.gmra.mrb[12].mxu0 %v177_v0 }
  0x9c   :  { %665 = vmatprep.mubr.f32.mxu0 %v253_v11 }
  0x9f   :  { %666 = vmatmul.mubr.f32.gmra.mrb[14].mxu0 %v179_v59 }
  0xa0   :  { %670 = vmatprep.mubr.f32.mxu0 %v255_v15 }
  0xa3   :  { %671 = vmatmul.mubr.f32.gmra.mrb[16].mxu0 %v181_v24 }
  0xa4   :  { %675 = vmatprep.mubr.f32.mxu0 %v257_v26 }
  0xa7   :  { %676 = vmatmul.mubr.f32.gmra.mrb[18].mxu0 %v183_v12 }
  0xa8   :  { %680 = vmatprep.mubr.f32.mxu0 %v259_v29 }
  0xab   :  { %681 = vmatmul.mubr.f32.gmra.mrb[20].mxu0 %v185_v54 }
  0xac   :  { %685 = vmatprep.mubr.f32.mxu0 %v261_v23 }
  0xaf   :  { %686 = vmatmul.mubr.f32.gmra.mrb[22].mxu0 %v187_v33 }
  0xb0   :  { %690 = vmatprep.mubr.f32.mxu0 %v263_v40 }
  0xb3   :  { %691 = vmatmul.mubr.f32.gmra.mrb[24].mxu0 %v189_v42 }
  0xb4   :  { %695 = vmatprep.mubr.f32.mxu0 %v265_v48 }
  0xb7   :  { %696 = vmatmul.mubr.f32.gmra.mrb[26].mxu0 %v191_v49 }
  0xb8   :  { %700 = vmatprep.mubr.f32.mxu0 %v267_v7 }
  0xbb   :  { %701 = vmatmul.mubr.f32.gmra.mrb[28].mxu0 %v193_v20 }
  0xbc   :  { %705 = vmatprep.mubr.f32.mxu0 %v3774_v2  ;;  %v3042_v2 = vpack.c.bf16 %v1219_v60, %v1218_v57 }
  0xbe   :  { %3043 = vmatpush1.bf16.msra.mxu1 %v3042_v2 }
  0xbf   :  { %706 = vmatmul.mubr.f32.gmra.mrb[30].mxu0 %v3788_v6  ;;  %v284_v6 = vrot.slane %v61_v53, 3  ;;  %3044 = vmatprep.subr.bf16.mxu1 %v3541_v3 }
  0xc0   :  { %710 = vmatprep.mubr.f32.mxu0 %v3810_v19  ;;  %v1220_v19 = vld [vmem:[%s5835_s4 + $0x80] sm:$0xff] }
  0xc3   :  { %711 = vmatmul.mubr.f32.gmra.mrb[32].mxu0 %v3818_v18  ;;  %v1221_v18 = vld [vmem:[%s5835_s4 + $0x88] sm:$0xff] }
  0xc4   :  { %715 = vmatprep.mubr.f32.mxu0 %v3842_v30  ;;  %v210_v30 = vrot.slane %v61_v53, 2 }
  0xc7   :  { %716 = vmatmul.mubr.f32.gmra.mrb[34].mxu0 %v3850_v32  ;;  %v3045_v32 = vpack.c.bf16 %v1221_v18, %v1220_v19 }
  0xc8   :  { %720 = vmatprep.mubr.f32.mxu0 %v3873_v43  ;;  %v285_v43 = vsel %vm236_vm1, %v282_v39, %v284_v6  ;;  %v1227_v39 = vld [vmem:[%s5835_s4 + $0xb8] sm:$0xff] }
  0xc9   :  { %3046 = vmatpush1.bf16.msra.mxu1 %v3045_v32 }
  0xca   :  { %3047 = vmatprep.subr.bf16.mxu1 %v3541_v3 }
  0xcb   :  { %721 = vmatmul.mubr.f32.gmra.mrb[36].mxu0 %v3881_v45  ;;  %v1222_v45 = vld [vmem:[%s5835_s4 + $0x90] sm:$0xff] }
  0xcc   :  { %725 = vmatprep.mubr.f32.mxu0 %v3904_v61  ;;  %v1223_v61 = vld [vmem:[%s5835_s4 + $0x98] sm:$0xff] }
  0xcf   :  { %726 = vmatmul.mubr.f32.gmra.mrb[38].mxu0 %v3912_v63  ;;  %v211_v63 = vsel %vm162_vm2, %v208_v41, %v210_v30  ;;  %v3054_v41 = vpack.c.bf16 %v1227_v39, %v1226_v38 }
  0xd0   :  { %730 = vmatprep.mubr.f32.mxu0 %v3935_v16  ;;  %v3048_v16 = vpack.c.bf16 %v1223_v61, %v1222_v45 }
  0xd2   :  { %3049 = vmatpush1.bf16.msra.mxu1 %v3048_v16 }
  0xd3   :  { %731 = vmatmul.mubr.f32.gmra.mrb[40].mxu0 %v3943_v22  ;;  %3050 = vmatprep.subr.bf16.mxu1 %v3541_v3  ;;  %v1224_v22 = vld [vmem:[%s5835_s4 + $0xa0] sm:$0xff] }
  0xd4   :  { %735 = vmatprep.mubr.f32.mxu0 %v3966_v35  ;;  %v1225_v35 = vld [vmem:[%s5835_s4 + $0xa8] sm:$0xff] }
  0xd7   :  { %736 = vmatmul.mubr.f32.gmra.mrb[42].mxu0 %v3974_v37  ;;  %v3051_v37 = vpack.c.bf16 %v1225_v35, %v1224_v22 }
  0xd8   :  { %740 = vmatprep.mubr.f32.mxu0 %v3998_v50  ;;  %v1228_v50 = vld [vmem:[%s5835_s4 + $0xc0] sm:$0xff] }
  0xd9   :  { %3052 = vmatpush1.bf16.msra.mxu1 %v3051_v37 }
  0xda   :  { %3053 = vmatprep.subr.bf16.mxu1 %v3541_v3 }
  0xdb   :  { %741 = vmatmul.mubr.f32.gmra.mrb[44].mxu0 %v4009_v55  ;;  %v1229_v55 = vld [vmem:[%s5835_s4 + $0xc8] sm:$0xff] }
  0xdc   :  { %745 = vmatprep.mubr.f32.mxu0 %v285_v43  ;;  %v3057_v25 = vpack.c.bf16 %v1229_v55, %v1228_v50 }
  0xdd   :  { %3055 = vmatpush1.bf16.msra.mxu1 %v3054_v41 }
  0xde   :  { %3056 = vmatprep.subr.bf16.mxu1 %v3541_v3 }
  0xdf   :  { %746 = vmatmul.mubr.f32.gmra.mrb[46].mxu0 %v211_v63 }
  0xe1   :  { %3058 = vmatpush1.bf16.msra.mxu1 %v3057_v25 }
  0xe2   :  { %3059 = vmatprep.subr.bf16.mxu1 %v3541_v3 }
  0xe5   :  { %3061 = vmatpush1.bf16.msra.mxu1 %v3060_v56 }
  0xe6   :  { %3062 = vmatprep.subr.bf16.mxu1 %v3541_v3 }
  0xe9   :  { %3064 = vmatpush1.bf16.msra.mxu1 %v3063_v1 }
  0xea   :  { %3065 = vmatprep.subr.bf16.mxu1 %v3541_v3 }
  0xed   :  { %3067 = vmatpush1.bf16.msra.mxu1 %v3066_v9 }
  0xee   :  { %3068 = vmatprep.subr.bf16.mxu1 %v3541_v3 }
 0x118   :  { %v4323_v10 = vpop.f32.mrb[0].mxu1 }
 0x119   :  { %v529_v0 = vpop.f32.mrb[1].mxu1 }
 0x11c   :  { %v4325_v62 = vpop.f32.mrb[2].mxu1 }
 0x11d   :  { %v534_v11 = vpop.f32.mrb[3].mxu1 }
 0x120   :  { %v4327_v13 = vpop.f32.mrb[4].mxu1 }
 0x121   :  { %v539_v59 = vpop.f32.mrb[5].mxu1 }
 0x124   :  { %v4329_v17 = vpop.f32.mrb[6].mxu1 }
 0x125   :  { %v544_v15 = vpop.f32.mrb[7].mxu1 }
 0x128   :  { %v4331_v21 = vpop.f32.mrb[8].mxu1 }
 0x129   :  { %v549_v24 = vpop.f32.mrb[9].mxu1 }
 0x12c   :  { %v4333_v36 = vpop.f32.mrb[10].mxu1 }
 0x12d   :  { %v554_v26 = vpop.f32.mrb[11].mxu1 }
 0x130   :  { %v4335_v28 = vpop.f32.mrb[12].mxu1 }
 0x131   :  { %v559_v12 = vpop.f32.mrb[13].mxu1 }
 0x134   :  { %v4337_v52 = vpop.f32.mrb[14].mxu1 }
 0x135   :  { %v564_v29 = vpop.f32.mrb[15].mxu1 }
 0x156   :  { %v632_v54 = vpop.f32.mrb[0].mxu0 }
 0x157   :  { %v3388_v8 = vadd.f32 %v4342_v14, %v632_v54  ;;  %v634_v23 = vpop.f32.mrb[1].mxu0 }
 0x158   :  { %v1237_v23 = vld [vmem:[%s5835_s4 + $0x108] sm:$0xff] }
 0x159   :  { %v751_v33 = vmax.f32 %v3388_v8, 0.0  ;;  %v1236_v8 = vld [vmem:[%s5835_s4 + $0x100] sm:$0xff] }
 0x15a   :  { %v637_v34 = vpop.f32.mrb[2].mxu0 }
 0x15b   :  { %v3389_v27 = vadd.f32 %v4342_v14, %v637_v34  ;;  %v639_v40 = vpop.f32.mrb[3].mxu0  ;;  %v798_v47 = vrot.slane %v751_v33, 1 }
 0x15c   :  { %v4386_v40 = vld [vmem:[%s5835_s4 + $0x120] sm:$0xff] }
 0x15d   :  { %v752_v4 = vmax.f32 %v3389_v27, 0.0  ;;  %v4381_v27 = vld [vmem:[%s5835_s4 + $0x118] sm:$0xff] }
 0x15e   :  { %v642_v42 = vpop.f32.mrb[4].mxu0 }
 0x15f   :  { %v799_v48 = vrot.slane %v752_v4, 1  ;;  %v3390_v49 = vadd.f32 %v4342_v14, %v642_v42  ;;  %v644_v7 = vpop.f32.mrb[5].mxu0 }
 0x160   :  { %v4398_v7 = vld [vmem:[%s5835_s4 + $0x130] sm:$0xff] }
 0x161   :  { %v800_v20 = vsel %vm87_vm0, %v798_v47, %v799_v48  ;;  %v753_v53 = vmax.f32 %v3390_v49, 0.0  ;;  %v4393_v49 = vld [vmem:[%s5835_s4 + $0x128] sm:$0xff] }
 0x162   :  { %v865_v57 = vmax.f32 %v751_v33, %v800_v20  ;;  %v647_v60 = vpop.f32.mrb[6].mxu0  ;;  %v4376_v33 = vld [vmem:[%s5835_s4 + $0x110] sm:$0xff]  ;;  %v4403_v20 = vld [vmem:[%s5835_s4 + $0x138] sm:$0xff] }
 0x163   :  { %v801_v2 = vrot.slane %v753_v53, 1  ;;  %v3391_v6 = vadd.f32 %v4342_v14, %v647_v60  ;;  %v649_v19 = vpop.f32.mrb[7].mxu0 }
 0x164   :  { %v4416_v19 = vld [vmem:[%s5835_s4 + $0x148] sm:$0xff] }
 0x165   :  { %v802_v18 = vsel %vm87_vm0, %v799_v48, %v801_v2  ;;  %v754_v30 = vmax.f32 %v3391_v6, 0.0  ;;  %v4411_v6 = vld [vmem:[%s5835_s4 + $0x140] sm:$0xff] }
 0x166   :  { %v866_v32 = vmax.f32 %v752_v4, %v802_v18  ;;  %v652_v43 = vpop.f32.mrb[8].mxu0 }
 0x167   :  { %v803_v45 = vrot.slane %v754_v30, 1  ;;  %v3392_v61 = vadd.f32 %v4342_v14, %v652_v43  ;;  %v654_v63 = vpop.f32.mrb[9].mxu0 }
 0x168   :  { %v917_v50 = vrot.slane %v866_v32, 2  ;;  %v4430_v63 = vld [vmem:[%s5835_s4 + $0x158] sm:$0xff] }
 0x169   :  { %v804_v16 = vsel %vm87_vm0, %v801_v2, %v803_v45  ;;  %v755_v22 = vmax.f32 %v3392_v61, 0.0  ;;  %v3069_v2 = vpack.c.bf16 %v1237_v23, %v1236_v8  ;;  %v4425_v61 = vld [vmem:[%s5835_s4 + $0x150] sm:$0xff] }
 0x16a   :  { %v867_v35 = vmax.f32 %v753_v53, %v804_v16  ;;  %v657_v37 = vpop.f32.mrb[10].mxu0 }
 0x16b   :  { %v805_v38 = vrot.slane %v755_v22, 1  ;;  %v3393_v39 = vadd.f32 %v4342_v14, %v657_v37  ;;  %v659_v41 = vpop.f32.mrb[11].mxu0  ;;  %v3075_v37 = vpack.c.bf16 %v4393_v49, %v4386_v40 }
 0x16c   :  { %v918_v55 = vrot.slane %v867_v35, 2 }
 0x16d   :  { %v806_v25 = vsel %vm87_vm0, %v803_v45, %v805_v38  ;;  %v756_v51 = vmax.f32 %v3393_v39, 0.0 }
 0x16e   :  { %v4354_v46 = vmax.f32 %v754_v30, %v806_v25  ;;  %v662_v56 = vpop.f32.mrb[12].mxu0  ;;  %v919_v31 = vsel %vm162_vm2, %v917_v50, %v918_v55  ;;  %v3081_v50 = vpack.c.bf16 %v4416_v19, %v4411_v6  ;;  %v4451_v25 = vld [vmem:[%s5835_s4 + $0x168] sm:$0xff] }
 0x16f   :  { %v807_v58 = vrot.slane %v756_v51, 1  ;;  %v3394_v1 = vadd.f32 %v4342_v14, %v662_v56  ;;  %v664_v5 = vpop.f32.mrb[13].mxu0  ;;  %v984_v44 = vmax.f32 %v865_v57, %v919_v31 }
 0x170   :  { %v920_v9 = vrot.slane %v4354_v46, 2 }
 0x171   :  { %v808_v0 = vsel %vm87_vm0, %v805_v38, %v807_v58  ;;  %v757_v11 = vmax.f32 %v3394_v1, 0.0  ;;  %v1026_v47 = vrot.slane %v984_v44, 2  ;;  %v3084_v1 = vpack.c.bf16 %v4430_v63, %v4425_v61  ;;  %v1830_v61 = vld [vmem:[%s5837_s6 + $0x190] sm:$0xff]  ;;  %v1831_v63 = vld [vmem:[%s5837_s6 + $0x198] sm:$0xff] }
 0x172   :  { %v4360_v59 = vmax.f32 %v755_v22, %v808_v0  ;;  %v667_v15 = vpop.f32.mrb[14].mxu0  ;;  %v921_v24 = vsel %vm162_vm2, %v918_v55, %v920_v9  ;;  %v3072_v22 = vpack.c.bf16 %v4381_v27, %v4376_v33  ;;  %v4446_v55 = vld [vmem:[%s5835_s4 + $0x160] sm:$0xff] }
 0x173   :  { %v809_v26 = vrot.slane %v757_v11, 1  ;;  %v4364_v12 = vadd.f32 %v4342_v14, %v667_v15  ;;  %v669_v29 = vpop.f32.mrb[15].mxu0  ;;  %v985_v54 = vmax.f32 %v866_v32, %v921_v24  ;;  %v3087_v24 = vpack.c.bf16 %v4451_v25, %v4446_v55 }
 0x174   :  { %v922_v34 = vrot.slane %v4360_v59, 2 }
 0x175   :  { %v810_v4 = vsel %vm87_vm0, %v807_v58, %v809_v26  ;;  %v758_v42 = vmax.f32 %v4364_v12, 0.0  ;;  %v1027_v48 = vrot.slane %v985_v54, 2  ;;  %v4458_v58 = vadd.f32 %v4342_v14, %v4323_v10 }
 0x176   :  { %v923_v53 = vsel %vm162_vm2, %v920_v9, %v922_v34  ;;  %v4406_v57 = vmax.f32 %v756_v51, %v810_v4  ;;  %v672_v60 = vpop.f32.mrb[16].mxu0  ;;  %v4471_v10 = vadd.f32 %v4342_v14, %v4325_v62  ;;  %v4485_v62 = vld [vmem:[%s5835_s4 + $0x178] sm:$0xff] }
 0x177   :  { %v811_v18 = vrot.slane %v758_v42, 1  ;;  %v4419_v30 = vadd.f32 %v4342_v14, %v672_v60  ;;  %v674_v32 = vpop.f32.mrb[17].mxu0  ;;  %v1028_v43 = vsel %vm162_vm2, %v1026_v47, %v1027_v48  ;;  %v986_v45 = vmax.f32 %v867_v35, %v923_v53 }
 0x178   :  { %v924_v16 = vrot.slane %v4406_v57, 2  ;;  %1339 = vmatprep.mubr.f32.mxu1 %v1028_v43  ;;  %v3078_v35 = vpack.c.bf16 %v4403_v20, %v4398_v7  ;;  %v4510_v43 = vld [vmem:[%s5835_s4 + $0x180] sm:$0xff] }
 0x179   :  { %v812_v38 = vsel %vm87_vm0, %v809_v26, %v811_v18  ;;  %v759_v39 = vmax.f32 %v4419_v30, 0.0  ;;  %1340 = vmatmul.mubr.f32.vlgmr.msra.gmra.mrb[16].mxu1 %v984_v44  ;;  %v1029_v41 = vrot.slane %v986_v45, 2  ;;  %v1146_v26 = vrot.slane %v986_v45, 6 }
 0x17a   :  { %v925_v51 = vsel %vm162_vm2, %v922_v34, %v924_v16  ;;  %v4454_v56 = vmax.f32 %v757_v11, %v812_v38  ;;  %v677_v31 = vpop.f32.mrb[18].mxu0  ;;  %3070 = vmatpush1.bf16.msra.mxu1 %v3069_v2  ;;  %v1087_v40 = vrot.slane %v986_v45, 4 }
 0x17b   :  { %v813_v5 = vrot.slane %v759_v39, 1  ;;  %v4463_v44 = vadd.f32 %v4342_v14, %v677_v31  ;;  %v679_v9 = vpop.f32.mrb[19].mxu0  ;;  %v1030_v0 = vsel %vm162_vm2, %v1027_v48, %v1029_v41  ;;  %v987_v15 = vmax.f32 %v4354_v46, %v925_v51  ;;  %3071 = vmatprep.subr.bf16.mxu1 %v3541_v3  ;;  %v4480_v46 = vld [vmem:[%s5835_s4 + $0x170] sm:$0xff] }
 0x17c   :  { %v926_v11 = vrot.slane %v4454_v56, 2  ;;  %1344 = vmatprep.mubr.f32.mxu1 %v1030_v0 }
 0x17d   :  { %v814_v12 = vsel %vm87_vm0, %v811_v18, %v813_v5  ;;  %v760_v29 = vmax.f32 %v4463_v44, 0.0  ;;  %1345 = vmatmul.mubr.f32.gmra.mrb[18].mxu1 %v985_v54  ;;  %v1031_v8 = vrot.slane %v987_v15, 2  ;;  %v1147_v23 = vrot.slane %v987_v15, 6 }
 0x17e   :  { %v927_v34 = vsel %vm162_vm2, %v924_v16, %v926_v11  ;;  %v4488_v33 = vmax.f32 %v758_v42, %v814_v12  ;;  %v682_v27 = vpop.f32.mrb[20].mxu0  ;;  %3073 = vmatpush1.bf16.msra.mxu1 %v3072_v22  ;;  %v1088_v54 = vrot.slane %v987_v15, 4  ;;  %v3090_v42 = vpack.c.bf16 %v4485_v62, %v4480_v46  ;;  %v4515_v16 = vld [vmem:[%s5835_s4 + $0x188] sm:$0xff]  ;;  %v1832_v46 = vld [vmem:[%s5837_s6 + $0x1a0] sm:$0xff] }
 0x17f   :  { %v815_v4 = vrot.slane %v760_v29, 1  ;;  %v4491_v47 = vadd.f32 %v4342_v14, %v682_v27  ;;  %v684_v48 = vpop.f32.mrb[21].mxu0  ;;  %v1032_v49 = vsel %vm162_vm2, %v1029_v41, %v1031_v8  ;;  %v988_v53 = vmax.f32 %v4360_v59, %v927_v34  ;;  %3074 = vmatprep.subr.bf16.mxu1 %v3541_v3  ;;  %v4544_v34 = vld [vmem:[%s5835_s4 + $0x190] sm:$0xff]  ;;  %v4549_v27 = vld [vmem:[%s5835_s4 + $0x198] sm:$0xff] }
 0x180   :  { %v928_v60 = vrot.slane %v4488_v33, 2  ;;  %1349 = vmatprep.mubr.f32.mxu1 %v1032_v49  ;;  %v4500_v2 = vsel %vm1145_vm3, %v1146_v26, %v1147_v23  ;;  %v4503_v18 = vsel %vm1086_vm4, %v1087_v40, %v1088_v54 }
 0x181   :  { %v816_v30 = vsel %vm87_vm0, %v813_v5, %v815_v4  ;;  %v761_v32 = vmax.f32 %v4491_v47, 0.0  ;;  %1350 = vmatmul.mubr.f32.gmra.mrb[20].mxu1 %v986_v45  ;;  %v1033_v59 = vrot.slane %v988_v53, 2  ;;  %v1149_v22 = vrot.slane %v988_v53, 6 }
 0x182   :  { %v929_v38 = vsel %vm162_vm2, %v926_v11, %v928_v60  ;;  %v4518_v41 = vmax.f32 %v759_v39, %v816_v30  ;;  %v687_v51 = vpop.f32.mrb[22].mxu0  ;;  %3076 = vmatpush1.bf16.msra.mxu1 %v3075_v37  ;;  %v4522_v45 = vadd.f32 %v4342_v14, %v4327_v13  ;;  %v1090_v31 = vrot.slane %v988_v53, 4 }
 0x183   :  { %v817_v5 = vrot.slane %v761_v32, 1  ;;  %v4525_v44 = vadd.f32 %v4342_v14, %v687_v51  ;;  %v689_v9 = vpop.f32.mrb[23].mxu0  ;;  %v1034_v0 = vsel %vm162_vm2, %v1031_v8, %v1033_v59  ;;  %v989_v26 = vmax.f32 %v4406_v57, %v929_v38  ;;  %3077 = vmatprep.subr.bf16.mxu1 %v3541_v3  ;;  %v4581_v51 = vld [vmem:[%s5835_s4 + $0x1a0] sm:$0xff] }
 0x184   :  { %v930_v39 = vrot.slane %v4518_v41, 2  ;;  %1354 = vmatprep.mubr.f32.mxu1 %v1034_v0  ;;  %v4534_v13 = vsel %vm1145_vm3, %v1147_v23, %v1149_v22  ;;  %v4537_v11 = vsel %vm1086_vm4, %v1088_v54, %v1090_v31 }
 0x185   :  { %v818_v12 = vsel %vm87_vm0, %v815_v4, %v817_v5  ;;  %v762_v8 = vmax.f32 %v4525_v44, 0.0  ;;  %1355 = vmatmul.mubr.f32.gmra.mrb[22].mxu1 %v987_v15  ;;  %v1035_v57 = vrot.slane %v989_v26, 2  ;;  %v1151_v23 = vrot.slane %v989_v26, 6  ;;  %v4586_v44 = vld [vmem:[%s5835_s4 + $0x1a8] sm:$0xff] }
 0x186   :  { %v931_v40 = vsel %vm162_vm2, %v928_v60, %v930_v39  ;;  %v4552_v54 = vmax.f32 %v760_v29, %v818_v12  ;;  %v692_v4 = vpop.f32.mrb[24].mxu0  ;;  %3079 = vmatpush1.bf16.msra.mxu1 %v3078_v35  ;;  %v4559_v15 = vadd.f32 %v4342_v14, %v4329_v17  ;;  %v1092_v47 = vrot.slane %v989_v26, 4 }
 0x187   :  { %v819_v48 = vrot.slane %v762_v8, 1  ;;  %v4562_v49 = vadd.f32 %v4342_v14, %v692_v4  ;;  %v694_v30 = vpop.f32.mrb[25].mxu0  ;;  %v1036_v38 = vsel %vm162_vm2, %v1033_v59, %v1035_v57  ;;  %v990_v29 = vmax.f32 %v4454_v56, %v931_v40  ;;  %3080 = vmatprep.subr.bf16.mxu1 %v3541_v3 }
 0x188   :  { %v932_v60 = vrot.slane %v4552_v54, 2  ;;  %1359 = vmatprep.mubr.f32.mxu1 %v1036_v38  ;;  %v4571_v17 = vsel %vm1145_vm3, %v1149_v22, %v1151_v23  ;;  %v4574_v20 = vsel %vm1086_vm4, %v1090_v31, %v1092_v47  ;;  %v1828_v38 = vld [vmem:[%s5837_s6 + $0x180] sm:$0xff] }
 0x189   :  { %v820_v35 = vsel %vm87_vm0, %v817_v5, %v819_v48  ;;  %v763_v59 = vmax.f32 %v4562_v49, 0.0  ;;  %1360 = vmatmul.mubr.f32.gmra.mrb[24].mxu1 %v988_v53  ;;  %v1037_v56 = vrot.slane %v990_v29, 2  ;;  %v1153_v22 = vrot.slane %v990_v29, 6 }
 0x18a   :  { %v933_v31 = vsel %vm162_vm2, %v930_v39, %v932_v60  ;;  %v4589_v9 = vmax.f32 %v761_v32, %v820_v35  ;;  %v697_v5 = vpop.f32.mrb[26].mxu0  ;;  %3082 = vmatpush1.bf16.msra.mxu1 %v3081_v50  ;;  %v4596_v53 = vadd.f32 %v4342_v14, %v4331_v21  ;;  %v1094_v0 = vrot.slane %v990_v29, 4 }
 0x18b   :  { %v821_v12 = vrot.slane %v763_v59, 1  ;;  %v4599_v40 = vadd.f32 %v4342_v14, %v697_v5  ;;  %v699_v4 = vpop.f32.mrb[27].mxu0  ;;  %v1038_v49 = vsel %vm162_vm2, %v1035_v57, %v1037_v56  ;;  %v4603_v32 = vmax.f32 %v4488_v33, %v933_v31  ;;  %3083 = vmatprep.subr.bf16.mxu1 %v3541_v3 }
 0x18c   :  { %v934_v6 = vrot.slane %v4589_v9, 2  ;;  %1364 = vmatprep.mubr.f32.mxu1 %v1038_v49  ;;  %v4610_v19 = vsel %vm1145_vm3, %v1151_v23, %v1153_v22  ;;  %v4613_v50 = vsel %vm1086_vm4, %v1092_v47, %v1094_v0  ;;  %v1829_v23 = vld [vmem:[%s5837_s6 + $0x188] sm:$0xff]  ;;  %v1812_v47 = vld [vmem:[%s5837_s6 + $0x100] sm:$0xff] }
 0x18d   :  { %v822_v39 = vsel %vm87_vm0, %v819_v48, %v821_v12  ;;  %v764_v57 = vmax.f32 %v4599_v40, 0.0  ;;  %1365 = vmatmul.mubr.f32.gmra.mrb[26].mxu1 %v989_v26  ;;  %v1039_v33 = vrot.slane %v4603_v32, 2  ;;  %v1155_v30 = vrot.slane %v4603_v32, 6  ;;  %v1813_v4 = vld [vmem:[%s5837_s6 + $0x108] sm:$0xff] }
 0x18e   :  { %v935_v48 = vsel %vm162_vm2, %v932_v60, %v934_v6  ;;  %v4629_v35 = vmax.f32 %v762_v8, %v822_v39  ;;  %v702_v26 = vpop.f32.mrb[28].mxu0  ;;  %3085 = vmatpush1.bf16.msra.mxu1 %v3084_v1  ;;  %v1096_v31 = vrot.slane %v4603_v32, 4  ;;  %v3148_v5 = vpack.c.bf16 %v1829_v23, %v1828_v38 }
 0x18f   :  { %v823_v49 = vrot.slane %v764_v57, 1  ;;  %v4641_v21 = vadd.f32 %v4342_v14, %v702_v26  ;;  %v704_v8 = vpop.f32.mrb[29].mxu0  ;;  %v1040_v60 = vsel %vm162_vm2, %v1037_v56, %v1039_v33  ;;  %v4645_v39 = vmax.f32 %v4518_v41, %v935_v48  ;;  %3086 = vmatprep.subr.bf16.mxu1 %v3541_v3 }
 0x190   :  { %v936_v1 = vrot.slane %v4629_v35, 2  ;;  %1369 = vmatprep.mubr.f32.mxu1 %v1040_v60  ;;  %v4656_v38 = vsel %vm1145_vm3, %v1153_v22, %v1155_v30  ;;  %v4659_v56 = vsel %vm1086_vm4, %v1094_v0, %v1096_v31  ;;  %3149 = vmatprep.subr.bf16.mxu0 %v3148_v5  ;;  %v3150_v41 = vpack.c.bf16 %v1813_v4, %v1812_v47  ;;  %v1814_v60 = vld [vmem:[%s5837_s6 + $0x110] sm:$0xff]  ;;  %v1815_v22 = vld [vmem:[%s5837_s6 + $0x118] sm:$0xff] }
 0x191   :  { %v824_v23 = vsel %vm87_vm0, %v821_v12, %v823_v49  ;;  %v765_v48 = vmax.f32 %v4641_v21, 0.0  ;;  %1370 = vmatmul.mubr.f32.gmra.mrb[28].mxu1 %v990_v29  ;;  %v1041_v26 = vrot.slane %v4645_v39, 2  ;;  %v1157_v8 = vrot.slane %v4645_v39, 6 }
 0x192   :  { %v937_v0 = vsel %vm162_vm2, %v934_v6, %v936_v1  ;;  %v4672_v47 = vmax.f32 %v763_v59, %v824_v23  ;;  %v707_v12 = vpop.f32.mrb[30].mxu0  ;;  %3088 = vmatpush1.bf16.msra.mxu1 %v3087_v24  ;;  %v1098_v29 = vrot.slane %v4645_v39, 4  ;;  %3151 = vmatpush3.bf16.msra.mxu0 %v3150_v41  ;;  %v3152_v21 = vpack.c.bf16 %v1831_v63, %v1830_v61 }
 0x193   :  { %v825_v5 = vrot.slane %v765_v48, 1  ;;  %v4679_v4 = vadd.f32 %v4342_v14, %v707_v12  ;;  %v709_v7 = vpop.f32.mrb[31].mxu0  ;;  %v1042_v37 = vsel %vm162_vm2, %v1039_v33, %v1041_v26  ;;  %v993_v6 = vmax.f32 %v4552_v54, %v937_v0  ;;  %3089 = vmatprep.subr.bf16.mxu1 %v3541_v3  ;;  %v4697_v33 = vld [vmem:[%s5835_s4 + $0x1b0] sm:$0xff] }
 0x194   :  { %v938_v59 = vrot.slane %v4672_v47, 2  ;;  %1374 = vmatprep.mubr.f32.mxu1 %v1042_v37  ;;  %v4686_v55 = vsel %vm1145_vm3, %v1155_v30, %v1157_v8  ;;  %v4689_v25 = vsel %vm1086_vm4, %v1096_v31, %v1098_v29  ;;  %3153 = vmatprep.subr.bf16.mxu0 %v3152_v21  ;;  %v3154_v24 = vpack.c.bf16 %v1815_v22, %v1814_v60  ;;  %v4702_v37 = vld [vmem:[%s5835_s4 + $0x1b8] sm:$0xff]  ;;  %v1816_v21 = vld [vmem:[%s5837_s6 + $0x120] sm:$0xff] }
 0x195   :  { %v826_v61 = vsel %vm87_vm0, %v823_v49, %v825_v5  ;;  %v766_v7 = vmax.f32 %v4679_v4, 0.0  ;;  %1375 = vmatmul.mubr.f32.gmra.mrb[30].mxu1 %v4603_v32  ;;  %v1043_v54 = vrot.slane %v993_v6, 2  ;;  %v1159_v30 = vrot.slane %v993_v6, 6 }
 0x196   :  { %v939_v31 = vsel %vm162_vm2, %v936_v1, %v938_v59  ;;  %v4707_v49 = vmax.f32 %v764_v57, %v826_v61  ;;  %v712_v63 = vpop.f32.mrb[32].mxu0  ;;  %3091 = vmatpush1.bf16.msra.mxu1 %v3090_v42  ;;  %v4714_v32 = vadd.f32 %v4342_v14, %v4333_v36  ;;  %v1100_v41 = vrot.slane %v993_v6, 4  ;;  %3155 = vmatpush3.bf16.msra.mxu0 %v3154_v24  ;;  %v1833_v36 = vld [vmem:[%s5837_s6 + $0x1a8] sm:$0xff] }
 0x197   :  { %v827_v23 = vrot.slane %v766_v7, 1  ;;  %v4717_v60 = vadd.f32 %v712_v63, %v4458_v58  ;;  %v714_v1 = vpop.f32.mrb[33].mxu0  ;;  %v1044_v40 = vsel %vm162_vm2, %v1041_v26, %v1043_v54  ;;  %v4721_v57 = vmax.f32 %v4589_v9, %v939_v31  ;;  %3092 = vmatprep.subr.bf16.mxu1 %v3541_v3 }
 0x198   :  { %v940_v62 = vrot.slane %v4707_v49, 2  ;;  %1379 = vmatprep.mubr.f32.mxu1 %v1044_v40  ;;  %v3102_v58 = vpack.c.bf16 %v4702_v37, %v4697_v33  ;;  %v4734_v42 = vsel %vm1145_vm3, %v1157_v8, %v1159_v30  ;;  %v4737_v9 = vsel %vm1086_vm4, %v1098_v29, %v1100_v41  ;;  %v1817_v8 = vld [vmem:[%s5837_s6 + $0x128] sm:$0xff]  ;;  %v4880_v33 = vld [vmem:[%s5835_s4 + $0x1e0] sm:$0xff] }
 0x199   :  { %v828_v26 = vsel %vm87_vm0, %v825_v5, %v827_v23  ;;  %v767_v22 = vmax.f32 %v4717_v60, 0.0  ;;  %1380 = vmatmul.mubr.f32.gmra.mrb[32].mxu1 %v4645_v39  ;;  %v1045_v0 = vrot.slane %v4721_v57, 2  ;;  %v1161_v12 = vrot.slane %v4721_v57, 6  ;;  %v4885_v37 = vld [vmem:[%s5835_s4 + $0x1e8] sm:$0xff] }
 0x19a   :  { %v941_v29 = vsel %vm162_vm2, %v938_v59, %v940_v62  ;;  %v4751_v4 = vmax.f32 %v765_v48, %v828_v26  ;;  %v717_v5 = vpop.f32.mrb[34].mxu0  ;;  %v5842_v39 = vpack.c.bf16 %v4515_v16, %v4510_v43  ;;  %v1102_v24 = vrot.slane %v4721_v57, 4 }
 0x19b   :  { %v3156_v61 = vpack.c.bf16 %v1833_v36, %v1832_v46  ;;  %v829_v31 = vrot.slane %v767_v22, 1  ;;  %v4758_v63 = vadd.f32 %v717_v5, %v4471_v10  ;;  %v719_v60 = vpop.f32.mrb[35].mxu0  ;;  %v1046_v1 = vsel %vm162_vm2, %v1043_v54, %v1045_v0 }
 0x19c   :  { %3094 = vmatpush1.bf16.msra.mxu1 %v5842_v39  ;;  %v995_v40 = vmax.f32 %v4629_v35, %v941_v29  ;;  %v942_v48 = vrot.slane %v4751_v4, 2  ;;  %1384 = vmatprep.mubr.f32.mxu1 %v1046_v1  ;;  %v4765_v43 = vsel %vm1145_vm3, %v1159_v30, %v1161_v12  ;;  %v4768_v16 = vsel %vm1086_vm4, %v1100_v41, %v1102_v24  ;;  %v4775_v35 = vld [vmem:[%s5835_s4 + $0x1c0] sm:$0xff]  ;;  %v4780_v30 = vld [vmem:[%s5835_s4 + $0x1c8] sm:$0xff] }
 0x19d   :  { %3095 = vmatprep.subr.bf16.mxu1 %v3541_v3  ;;  %3157 = vmatprep.subr.bf16.mxu0 %v3156_v61  ;;  %v3158_v59 = vpack.c.bf16 %v1817_v8, %v1816_v21  ;;  %v830_v10 = vsel %vm87_vm0, %v827_v23, %v829_v31  ;;  %v768_v46 = vmax.f32 %v4758_v63, 0.0  ;;  %v4790_v21 = vadd.f32 %v4342_v14, %v4335_v28  ;;  %v1835_v28 = vld [vmem:[%s5837_s6 + $0x1b8] sm:$0xff] }
 0x19e   :  { %1385 = vmatmul.mubr.f32.gmra.mrb[34].mxu1 %v993_v6  ;;  %v1047_v54 = vrot.slane %v995_v40, 2  ;;  %v1163_v41 = vrot.slane %v995_v40, 6  ;;  %v943_v36 = vsel %vm162_vm2, %v940_v62, %v942_v48  ;;  %v4783_v26 = vmax.f32 %v766_v7, %v830_v10  ;;  %v722_v23 = vpop.f32.mrb[36].mxu0 }
 0x19f   :  { %v5843_v6 = vpack.c.bf16 %v4549_v27, %v4544_v34  ;;  %v1104_v8 = vrot.slane %v995_v40, 4  ;;  %3159 = vmatpush3.bf16.msra.mxu0 %v3158_v59  ;;  %v831_v29 = vrot.slane %v768_v46, 1  ;;  %v4793_v5 = vadd.f32 %v722_v23, %v4522_v45  ;;  %v724_v39 = vpop.f32.mrb[37].mxu0  ;;  %v1834_v34 = vld [vmem:[%s5837_s6 + $0x1b0] sm:$0xff] }
 0x1a0   :  { %v1048_v62 = vsel %vm162_vm2, %v1045_v0, %v1047_v54  ;;  %v4797_v7 = vmax.f32 %v4672_v47, %v943_v36  ;;  %v944_v27 = vrot.slane %v4783_v26, 2  ;;  %v3105_v45 = vpack.c.bf16 %v4780_v30, %v4775_v35  ;;  %v1836_v35 = vld [vmem:[%s5837_s6 + $0x1c0] sm:$0xff]  ;;  %v1837_v30 = vld [vmem:[%s5837_s6 + $0x1c8] sm:$0xff] }
 0x1a1   :  { %3097 = vmatpush1.bf16.msra.mxu1 %v5843_v6  ;;  %1389 = vmatprep.mubr.f32.mxu1 %v1048_v62  ;;  %v4810_v0 = vsel %vm1145_vm3, %v1161_v12, %v1163_v41  ;;  %v4813_v47 = vsel %vm1086_vm4, %v1102_v24, %v1104_v8  ;;  %v832_v61 = vsel %vm87_vm0, %v829_v31, %v831_v29  ;;  %v769_v63 = vmax.f32 %v4793_v5, 0.0 }
 0x1a2   :  { %3098 = vmatprep.subr.bf16.mxu1 %v3541_v3  ;;  %1390 = vmatmul.mubr.f32.gmra.mrb[36].mxu1 %v4721_v57  ;;  %v1049_v60 = vrot.slane %v4797_v7, 2  ;;  %v1165_v1 = vrot.slane %v4797_v7, 6  ;;  %v945_v59 = vsel %vm162_vm2, %v942_v48, %v944_v27  ;;  %v4821_v10 = vmax.f32 %v767_v22, %v832_v61  ;;  %v727_v36 = vpop.f32.mrb[38].mxu0 }
 0x1a3   :  { %v5844_v12 = vpack.c.bf16 %v4586_v44, %v4581_v51  ;;  %v1106_v24 = vrot.slane %v4797_v7, 4  ;;  %v3160_v31 = vpack.c.bf16 %v1835_v28, %v1834_v34  ;;  %v833_v23 = vrot.slane %v769_v63, 1  ;;  %v729_v57 = vpop.f32.mrb[39].mxu0  ;;  %v1818_v51 = vld [vmem:[%s5837_s6 + $0x130] sm:$0xff]  ;;  %v1819_v44 = vld [vmem:[%s5837_s6 + $0x138] sm:$0xff] }
 0x1a4   :  { %v4828_v6 = vadd.f32 %v727_v36, %v4559_v15  ;;  %v1050_v5 = vsel %vm162_vm2, %v1047_v54, %v1049_v60  ;;  %v4832_v39 = vmax.f32 %v4707_v49, %v945_v59  ;;  %v946_v22 = vrot.slane %v4821_v10, 2  ;;  %v1262_v28 = vld [vmem:[%s5835_s4 + $0x1d0] sm:$0xff] }
 0x1a5   :  { %3100 = vmatpush1.bf16.msra.mxu1 %v5844_v12  ;;  %1394 = vmatprep.mubr.f32.mxu1 %v1050_v5  ;;  %v4844_v15 = vadd.f32 %v4342_v14, %v4337_v52  ;;  %v4847_v49 = vsel %vm1145_vm3, %v1163_v41, %v1165_v1  ;;  %v4850_v48 = vsel %vm1086_vm4, %v1104_v8, %v1106_v24  ;;  %v1263_v52 = vld [vmem:[%s5835_s4 + $0x1d8] sm:$0xff]  ;;  %v4901_v5 = vld [vmem:[%s5835_s4 + $0x1f0] sm:$0xff] }
 0x1a6   :  { %3101 = vmatprep.subr.bf16.mxu1 %v3541_v3  ;;  %3161 = vmatprep.subr.bf16.mxu0 %v3160_v31  ;;  %v834_v54 = vsel %vm87_vm0, %v831_v29, %v833_v23  ;;  %v770_v62 = vmax.f32 %v4828_v6, 0.0  ;;  %v1051_v34 = vrot.slane %v4832_v39, 2  ;;  %v1167_v14 = vrot.slane %v4832_v39, 6  ;;  %v732_v29 = vpop.f32.mrb[40].mxu0 }
 0x1a7   :  { %1395 = vmatmul.mubr.f32.gmra.mrb[38].mxu1 %v995_v40  ;;  %v947_v41 = vsel %vm162_vm2, %v944_v27, %v946_v22  ;;  %v4863_v8 = vmax.f32 %v768_v46, %v834_v54  ;;  %v1108_v40 = vrot.slane %v4832_v39, 4  ;;  %v3162_v61 = vpack.c.bf16 %v1819_v44, %v1818_v51  ;;  %v734_v12 = vpop.f32.mrb[41].mxu0 }
 0x1a8   :  { %v835_v59 = vrot.slane %v770_v62, 1  ;;  %v4870_v36 = vadd.f32 %v732_v29, %v4596_v53  ;;  %v1052_v31 = vsel %vm162_vm2, %v1049_v60, %v1051_v34  ;;  %v4874_v6 = vmax.f32 %v4751_v4, %v947_v41 }
 0x1a9   :  { %3103 = vmatpush1.bf16.msra.mxu1 %v3102_v58  ;;  %v948_v53 = vrot.slane %v4863_v8, 2  ;;  %1399 = vmatprep.mubr.f32.mxu1 %v1052_v31  ;;  %v3108_v58 = vpack.c.bf16 %v1263_v52, %v1262_v28  ;;  %v4889_v46 = vsel %vm1145_vm3, %v1165_v1, %v1167_v14  ;;  %v4892_v4 = vsel %vm1086_vm4, %v1106_v24, %v1108_v40  ;;  %v4906_v1 = vld [vmem:[%s5835_s4 + $0x1f8] sm:$0xff]  ;;  %v1820_v31 = vld [vmem:[%s5837_s6 + $0x140] sm:$0xff] }
 0x1aa   :  { %3104 = vmatprep.subr.bf16.mxu1 %v3541_v3  ;;  %3163 = vmatpush3.bf16.msra.mxu0 %v3162_v61  ;;  %v836_v27 = vsel %vm87_vm0, %v833_v23, %v835_v59  ;;  %v771_v60 = vmax.f32 %v4870_v36, 0.0  ;;  %v1053_v57 = vrot.slane %v4874_v6, 2  ;;  %v1169_v24 = vrot.slane %v4874_v6, 6  ;;  %v737_v44 = vpop.f32.mrb[42].mxu0 }
 0x1ab   :  { %1400 = vmatmul.mubr.f32.gmra.mrb[40].mxu1 %v4797_v7  ;;  %v949_v23 = vsel %vm162_vm2, %v946_v22, %v948_v53  ;;  %v4910_v51 = vmax.f32 %v769_v63, %v836_v27  ;;  %v3111_v7 = vpack.c.bf16 %v4885_v37, %v4880_v33  ;;  %v1110_v54 = vrot.slane %v4874_v6, 4  ;;  %v739_v41 = vpop.f32.mrb[43].mxu0 }
 0x1ac   :  { %v837_v28 = vrot.slane %v771_v60, 1  ;;  %v4919_v52 = vadd.f32 %v737_v44, %v4714_v32  ;;  %v1054_v29 = vsel %vm162_vm2, %v1051_v34, %v1053_v57  ;;  %v999_v63 = vmax.f32 %v4783_v26, %v949_v23 }
 0x1ad   :  { %3106 = vmatpush1.bf16.msra.mxu1 %v3105_v45  ;;  %v950_v45 = vrot.slane %v4910_v51, 2  ;;  %1404 = vmatprep.mubr.f32.mxu1 %v1054_v29  ;;  %v3114_v32 = vpack.c.bf16 %v4906_v1, %v4901_v5  ;;  %v4934_v22 = vsel %vm1145_vm3, %v1167_v14, %v1169_v24  ;;  %v4937_v26 = vsel %vm1086_vm4, %v1108_v40, %v1110_v54  ;;  %v1821_v14 = vld [vmem:[%s5837_s6 + $0x148] sm:$0xff] }
 0x1ae   :  { %3107 = vmatprep.subr.bf16.mxu1 %v3541_v3  ;;  %v838_v34 = vsel %vm87_vm0, %v835_v59, %v837_v28  ;;  %v772_v61 = vmax.f32 %v4919_v52, 0.0  ;;  %v1055_v36 = vrot.slane %v999_v63, 2  ;;  %v1171_v12 = vrot.slane %v999_v63, 6  ;;  %v742_v37 = vpop.f32.mrb[44].mxu0 }
 0x1af   :  { %1405 = vmatmul.mubr.f32.gmra.mrb[42].mxu1 %v4832_v39  ;;  %v951_v33 = vsel %vm162_vm2, %v948_v53, %v950_v45  ;;  %v4949_v40 = vmax.f32 %v770_v62, %v838_v34  ;;  %v1112_v59 = vrot.slane %v999_v63, 4  ;;  %v3164_v27 = vpack.c.bf16 %v1837_v30, %v1836_v35  ;;  %v744_v1 = vpop.f32.mrb[45].mxu0  ;;  %v1796_v53 = vld [vmem:[%s5837_s6 + $0x80] sm:$0xff]  ;;  %v1797_v62 = vld [vmem:[%s5837_s6 + $0x88] sm:$0xff] }
 0x1b0   :  { %v839_v5 = vrot.slane %v772_v61, 1  ;;  %v743_v39 = vadd.f32 %v742_v37, %v4790_v21  ;;  %v1056_v23 = vsel %vm162_vm2, %v1053_v57, %v1055_v36  ;;  %v1000_v44 = vmax.f32 %v4821_v10, %v951_v33 }
 0x1b1   :  { %3109 = vmatpush1.bf16.msra.mxu1 %v3108_v58  ;;  %v952_v58 = vrot.slane %v4949_v40, 2  ;;  %1409 = vmatprep.mubr.f32.mxu1 %v1056_v23  ;;  %v4963_v21 = vsel %vm1145_vm3, %v1169_v24, %v1171_v12  ;;  %v4966_v57 = vsel %vm1086_vm4, %v1110_v54, %v1112_v59  ;;  %v3166_v10 = vpack.c.bf16 %v1821_v14, %v1820_v31 }
 0x1b2   :  { %3110 = vmatprep.subr.bf16.mxu1 %v3541_v3  ;;  %3165 = vmatprep.subr.bf16.mxu0 %v3164_v27  ;;  %v840_v52 = vsel %vm87_vm0, %v837_v28, %v839_v5  ;;  %v773_v41 = vmax.f32 %v743_v39, 0.0  ;;  %v1057_v29 = vrot.slane %v1000_v44, 2  ;;  %v1173_v35 = vrot.slane %v1000_v44, 6  ;;  %v747_v33 = vpop.f32.mrb[46].mxu0 }
 0x1b3   :  { %1410 = vmatmul.mubr.f32.gmra.mrb[44].mxu1 %v4874_v6  ;;  %v953_v30 = vsel %vm162_vm2, %v950_v45, %v952_v58  ;;  %v885_v34 = vmax.f32 %v771_v60, %v840_v52  ;;  %v1114_v37 = vrot.slane %v1000_v44, 4  ;;  %v3116_v24 = vpack.c.bf16 %v1797_v62, %v1796_v53  ;;  %3167 = vmatpush3.bf16.msra.mxu0 %v3166_v10  ;;  %v749_v6 = vpop.f32.mrb[47].mxu0 }
 0x1b4   :  { %v841_v1 = vrot.slane %v773_v41, 1  ;;  %v748_v54 = vadd.f32 %v747_v33, %v4844_v15  ;;  %v1058_v31 = vsel %vm162_vm2, %v1055_v36, %v1057_v29  ;;  %v1001_v28 = vmax.f32 %v4863_v8, %v953_v30 }
 0x1b5   :  { %3112 = vmatpush1.bf16.msra.mxu1 %v3111_v7  ;;  %v954_v14 = vrot.slane %v885_v34, 2  ;;  %1414 = vmatprep.mubr.f32.mxu1 %v1058_v31  ;;  %v4976_v45 = vsel %vm1145_vm3, %v1171_v12, %v1173_v35  ;;  %v4979_v60 = vsel %vm1086_vm4, %v1112_v59, %v1114_v37 }
 0x1b6   :  { %3113 = vmatprep.subr.bf16.mxu1 %v3541_v3  ;;  %v842_v7 = vsel %vm87_vm0, %v839_v5, %v841_v1  ;;  %v774_v27 = vmax.f32 %v748_v54, 0.0  ;;  %v1059_v15 = vrot.slane %v1001_v28, 2  ;;  %v1175_v39 = vrot.slane %v1001_v28, 6 }
 0x1b7   :  { %1415 = vmatmul.mubr.f32.gmra.mrb[46].mxu1 %v999_v63  ;;  %v955_v36 = vsel %vm162_vm2, %v952_v58, %v954_v14  ;;  %v886_v8 = vmax.f32 %v772_v61, %v842_v7  ;;  %v1116_v3 = vrot.slane %v1001_v28, 4 }
 0x1b8   :  { %v888_v23 = vrot.slane %v774_v27, 1  ;;  %v1060_v53 = vsel %vm162_vm2, %v1057_v29, %v1059_v15  ;;  %v1002_v12 = vmax.f32 %v4910_v51, %v955_v36  ;;  %v4986_v62 = vsel %vm1145_vm3, %v1173_v35, %v1175_v39  ;;  %v1799_v36 = vld [vmem:[%s5837_s6 + $0x98] sm:$0xff] }
 0x1b9   :  { %3115 = vmatpush1.bf16.msra.mxu1 %v3114_v32  ;;  %v956_v59 = vrot.slane %v886_v8, 2  ;;  %1419 = vmatprep.mubr.f32.mxu1 %v1060_v53  ;;  %v4989_v63 = vsel %vm1086_vm4, %v1114_v37, %v1116_v3 }
 0x1ba   :  { %3117 = vmatprep.subr.bf16.mxu1 %v3116_v24  ;;  %v889_v5 = vsel %vm87_vm0, %v841_v1, %v888_v23  ;;  %v893_v58 = vmax.f32 %v774_v27, %v888_v23  ;;  %v1061_v32 = vrot.slane %v1002_v12, 2  ;;  %v1177_v61 = vrot.slane %v1002_v12, 6  ;;  %v1781_v27 = vld [vmem:[%s5837_s6 + $0x8] sm:$0xff] }
 0x1bb   :  { %1420 = vmatmul.mubr.f32.gmra.mrb[48].mxu1 %v1000_v44  ;;  %v892_v10 = vmax.f32 %v773_v41, %v889_v5  ;;  %v957_v52 = vsel %vm162_vm2, %v954_v14, %v956_v59  ;;  %v1118_v29 = vrot.slane %v1002_v12, 4 }
 0x1bc   :  { %v960_v51 = vrot.slane %v893_v58, 2  ;;  %v1062_v35 = vsel %vm162_vm2, %v1059_v15, %v1061_v32  ;;  %v1003_v30 = vmax.f32 %v4949_v40, %v957_v52  ;;  %v4996_v33 = vsel %vm1145_vm3, %v1175_v39, %v1177_v61  ;;  %v1798_v39 = vld [vmem:[%s5837_s6 + $0x90] sm:$0xff]  ;;  %v1801_v52 = vld [vmem:[%s5837_s6 + $0xa8] sm:$0xff] }
 0x1bd   :  { %v958_v37 = vrot.slane %v892_v10, 2  ;;  %1424 = vmatprep.mubr.f32.mxu1 %v1062_v35  ;;  %v4999_v24 = vsel %vm1086_vm4, %v1116_v3, %v1118_v29  ;;  %v3120_v58 = vpack.c.bf16 %v1799_v36, %v1798_v39  ;;  %v1800_v10 = vld [vmem:[%s5837_s6 + $0xa0] sm:$0xff]  ;;  %v1843_v39 = vld [vmem:[%s5837_s6 + $0x1f8] sm:$0xff] }
 0x1be   :  { %v1063_v44 = vrot.slane %v1003_v30, 2  ;;  %v1179_v1 = vrot.slane %v1003_v30, 6  ;;  %v1120_v41 = vrot.slane %v1003_v30, 4  ;;  %v1784_v35 = vld [vmem:[%s5837_s6 + $0x20] sm:$0xff]  ;;  %v1785_v30 = vld [vmem:[%s5837_s6 + $0x28] sm:$0xff] }
 0x1bf   :  { %1425 = vmatmul.mubr.f32.gmra.mrb[50].mxu1 %v1001_v28  ;;  %v961_v54 = vsel %vm162_vm2, %v958_v37, %v960_v51  ;;  %v959_v31 = vsel %vm162_vm2, %v956_v59, %v958_v37  ;;  %v1780_v28 = vld [vmem:[%s5837_s6] sm:$0xff]  ;;  %v3124_v51 = vpack.c.bf16 %v1801_v52, %v1800_v10  ;;  %v1802_v37 = vld [vmem:[%s5837_s6 + $0xb0] sm:$0xff] }
 0x1c0   :  { %v1064_v6 = vsel %vm162_vm2, %v1061_v32, %v1063_v44  ;;  %v5005_v40 = vsel %vm1145_vm3, %v1177_v61, %v1179_v1  ;;  %v5008_v14 = vsel %vm1086_vm4, %v1118_v29, %v1120_v41  ;;  %v1004_v7 = vmax.f32 %v885_v34, %v959_v31  ;;  %v1782_v32 = vld [vmem:[%s5837_s6 + $0x10] sm:$0xff] }
 0x1c1   :  { %1429 = vmatprep.mubr.f32.mxu1 %v1064_v6  ;;  %v1005_v15 = vmax.f32 %v886_v8, %v961_v54  ;;  %v3118_v59 = vpack.c.bf16 %v1781_v27, %v1780_v28  ;;  %v1804_v54 = vld [vmem:[%s5837_s6 + $0xc0] sm:$0xff]  ;;  %v1825_v28 = vld [vmem:[%s5837_s6 + $0x168] sm:$0xff] }
 0x1c2   :  { %v1181_v34 = vrot.slane %v1004_v7, 6  ;;  %v1122_v3 = vrot.slane %v1004_v7, 4  ;;  %v1788_v6 = vld [vmem:[%s5837_s6 + $0x40] sm:$0xff]  ;;  %v1789_v7 = vld [vmem:[%s5837_s6 + $0x48] sm:$0xff] }
 0x1c3   :  { %1430 = vmatmul.mubr.f32.gmra.mrb[52].mxu1 %v1002_v12  ;;  %v1183_v23 = vrot.slane %v1005_v15, 6  ;;  %v1124_v53 = vrot.slane %v1005_v15, 4  ;;  %v1783_v12 = vld [vmem:[%s5837_s6 + $0x18] sm:$0xff]  ;;  %v1842_v15 = vld [vmem:[%s5837_s6 + $0x1f0] sm:$0xff] }
 0x1c4   :  { %1499 = vmatprep.mubr.f32.mxu1 %v4500_v2  ;;  %v5024_v5 = vsel %vm1145_vm3, %v1179_v1, %v1181_v34  ;;  %v5027_v8 = vsel %vm1086_vm4, %v1120_v41, %v1122_v3  ;;  %v3122_v29 = vpack.c.bf16 %v1783_v12, %v1782_v32  ;;  %v1786_v1 = vld [vmem:[%s5837_s6 + $0x30] sm:$0xff]  ;;  %v1787_v41 = vld [vmem:[%s5837_s6 + $0x38] sm:$0xff]  ;;  %v3176_v36 = vpack.c.bf16 %v1843_v39, %v1842_v15 }
 0x1c5   :  { %v5036_v2 = vsel %vm1145_vm3, %v1181_v34, %v1183_v23  ;;  %v5039_v61 = vsel %vm1086_vm4, %v1122_v3, %v1124_v53  ;;  %v1826_v34 = vld [vmem:[%s5837_s6 + $0x170] sm:$0xff]  ;;  %v1827_v3 = vld [vmem:[%s5837_s6 + $0x178] sm:$0xff]  ;;  %v5189_v53 = vld [vmem:[%s5836_s5] ss:$0 sm:$0xff] }
 0x1c6   :  { %v3178_v23 = vpack.c.bf16 %v1827_v3, %v1826_v34 }
 0x1c7   :  { %1500 = vmatmul.mubr.f32.vlgmr.msra.gmra.mrb[16].mxu1 %v4503_v18  ;;  %v1803_v18 = vld [vmem:[%s5837_s6 + $0xb8] sm:$0xff] }
 0x1c8   :  { %1504 = vmatprep.mubr.f32.mxu1 %v4534_v13  ;;  %3119 = vmatpush3.bf16.msra.mxu1 %v3118_v59  ;;  %v3126_v13 = vpack.c.bf16 %v1785_v30, %v1784_v35  ;;  %v3128_v44 = vpack.c.bf16 %v1803_v18, %v1802_v37 }
 0x1c9   :  { %3121 = vmatprep.subr.bf16.mxu1 %v3120_v58 }
 0x1cb   :  { %1505 = vmatmul.mubr.f32.gmra.mrb[18].mxu1 %v4537_v11  ;;  %v1805_v11 = vld [vmem:[%s5837_s6 + $0xc8] sm:$0xff] }
 0x1cc   :  { %1509 = vmatprep.mubr.f32.mxu1 %v4571_v17  ;;  %3123 = vmatpush3.bf16.msra.mxu1 %v3122_v29  ;;  %v3130_v17 = vpack.c.bf16 %v1787_v41, %v1786_v1  ;;  %v3132_v31 = vpack.c.bf16 %v1805_v11, %v1804_v54 }
 0x1cd   :  { %3125 = vmatprep.subr.bf16.mxu1 %v3124_v51 }
 0x1cf   :  { %1510 = vmatmul.mubr.f32.gmra.mrb[20].mxu1 %v4574_v20  ;;  %v3134_v20 = vpack.c.bf16 %v1789_v7, %v1788_v6 }
 0x1d0   :  { %1514 = vmatprep.mubr.f32.mxu1 %v4610_v19  ;;  %3127 = vmatpush3.bf16.msra.mxu1 %v3126_v13  ;;  %v1806_v19 = vld [vmem:[%s5837_s6 + $0xd0] sm:$0xff] }
 0x1d1   :  { %3129 = vmatprep.subr.bf16.mxu1 %v3128_v44 }
 0x1d3   :  { %1515 = vmatmul.mubr.f32.gmra.mrb[22].mxu1 %v4613_v50  ;;  %v1807_v50 = vld [vmem:[%s5837_s6 + $0xd8] sm:$0xff] }
 0x1d4   :  { %1519 = vmatprep.mubr.f32.mxu1 %v4656_v38  ;;  %3131 = vmatpush3.bf16.msra.mxu1 %v3130_v17  ;;  %v3136_v38 = vpack.c.bf16 %v1807_v50, %v1806_v19 }
 0x1d5   :  { %3133 = vmatprep.subr.bf16.mxu1 %v3132_v31 }
 0x1d7   :  { %1520 = vmatmul.mubr.f32.gmra.mrb[24].mxu1 %v4659_v56  ;;  %v1790_v56 = vld [vmem:[%s5837_s6 + $0x50] sm:$0xff] }
 0x1d8   :  { %1524 = vmatprep.mubr.f32.mxu1 %v4686_v55  ;;  %3135 = vmatpush3.bf16.msra.mxu1 %v3134_v20  ;;  %v1791_v55 = vld [vmem:[%s5837_s6 + $0x58] sm:$0xff] }
 0x1d9   :  { %3137 = vmatprep.subr.bf16.mxu1 %v3136_v38 }
 0x1db   :  { %1525 = vmatmul.mubr.f32.gmra.mrb[26].mxu1 %v4689_v25  ;;  %v3138_v25 = vpack.c.bf16 %v1791_v55, %v1790_v56 }
 0x1dc   :  { %1529 = vmatprep.mubr.f32.mxu1 %v4734_v42  ;;  %v1808_v42 = vld [vmem:[%s5837_s6 + $0xe0] sm:$0xff] }
 0x1dd   :  { %3139 = vmatpush3.bf16.msra.mxu1 %v3138_v25 }
 0x1df   :  { %1530 = vmatmul.mubr.f32.gmra.mrb[28].mxu1 %v4737_v9  ;;  %v1809_v9 = vld [vmem:[%s5837_s6 + $0xe8] sm:$0xff] }
 0x1e0   :  { %1534 = vmatprep.mubr.f32.mxu1 %v4765_v43  ;;  %v3140_v43 = vpack.c.bf16 %v1809_v9, %v1808_v42 }
 0x1e2   :  { %3141 = vmatprep.subr.bf16.mxu1 %v3140_v43 }
 0x1e3   :  { %1535 = vmatmul.mubr.f32.gmra.mrb[30].mxu1 %v4768_v16  ;;  %v1792_v16 = vld [vmem:[%s5837_s6 + $0x60] sm:$0xff] }
 0x1e4   :  { %1539 = vmatprep.mubr.f32.mxu1 %v4810_v0  ;;  %v1793_v0 = vld [vmem:[%s5837_s6 + $0x68] sm:$0xff] }
 0x1e7   :  { %1540 = vmatmul.mubr.f32.gmra.mrb[32].mxu1 %v4813_v47  ;;  %v1838_v47 = vld [vmem:[%s5837_s6 + $0x1d0] sm:$0xff] }
 0x1e8   :  { %1544 = vmatprep.mubr.f32.mxu1 %v4847_v49  ;;  %v1839_v49 = vld [vmem:[%s5837_s6 + $0x1d8] sm:$0xff] }
 0x1eb   :  { %1545 = vmatmul.mubr.f32.gmra.mrb[34].mxu1 %v4850_v48  ;;  %v3142_v48 = vpack.c.bf16 %v1793_v0, %v1792_v16 }
 0x1ec   :  { %1549 = vmatprep.mubr.f32.mxu1 %v4889_v46  ;;  %v3168_v46 = vpack.c.bf16 %v1839_v49, %v1838_v47 }
 0x1ed   :  { %3143 = vmatpush3.bf16.msra.mxu1 %v3142_v48 }
 0x1ee   :  { %3169 = vmatprep.subr.bf16.mxu0 %v3168_v46 }
 0x1ef   :  { %1550 = vmatmul.mubr.f32.gmra.mrb[36].mxu1 %v4892_v4  ;;  %v1810_v4 = vld [vmem:[%s5837_s6 + $0xf0] sm:$0xff] }
 0x1f0   :  { %1554 = vmatprep.mubr.f32.mxu1 %v4934_v22  ;;  %v1811_v22 = vld [vmem:[%s5837_s6 + $0xf8] sm:$0xff] }
 0x1f3   :  { %1555 = vmatmul.mubr.f32.gmra.mrb[38].mxu1 %v4937_v26  ;;  %v1822_v26 = vld [vmem:[%s5837_s6 + $0x150] sm:$0xff] }
 0x1f4   :  { %1559 = vmatprep.mubr.f32.mxu1 %v4963_v21  ;;  %v1823_v21 = vld [vmem:[%s5837_s6 + $0x158] sm:$0xff] }
 0x1f7   :  { %1560 = vmatmul.mubr.f32.gmra.mrb[40].mxu1 %v4966_v57  ;;  %v3144_v57 = vpack.c.bf16 %v1811_v22, %v1810_v4 }
 0x1f8   :  { %1564 = vmatprep.mubr.f32.mxu1 %v4976_v45  ;;  %v1794_v45 = vld [vmem:[%s5837_s6 + $0x70] sm:$0xff] }
 0x1f9   :  { %3145 = vmatprep.subr.bf16.mxu1 %v3144_v57 }
 0x1fb   :  { %1565 = vmatmul.mubr.f32.gmra.mrb[42].mxu1 %v4979_v60  ;;  %v3170_v60 = vpack.c.bf16 %v1823_v21, %v1822_v26 }
 0x1fc   :  { %1569 = vmatprep.mubr.f32.mxu1 %v4986_v62  ;;  %v1795_v62 = vld [vmem:[%s5837_s6 + $0x78] sm:$0xff] }
 0x1fd   :  { %3171 = vmatpush3.bf16.msra.mxu0 %v3170_v60 }
 0x1ff   :  { %1570 = vmatmul.mubr.f32.gmra.mrb[44].mxu1 %v4989_v63  ;;  %v3146_v63 = vpack.c.bf16 %v1795_v62, %v1794_v45 }
 0x200   :  { %1574 = vmatprep.mubr.f32.mxu1 %v4996_v33  ;;  %v1840_v33 = vld [vmem:[%s5837_s6 + $0x1e0] sm:$0xff] }
 0x201   :  { %3147 = vmatpush3.bf16.msra.mxu1 %v3146_v63 }
 0x203   :  { %1575 = vmatmul.mubr.f32.gmra.mrb[46].mxu1 %v4999_v24  ;;  %v1841_v24 = vld [vmem:[%s5837_s6 + $0x1e8] sm:$0xff] }
 0x204   :  { %1579 = vmatprep.mubr.f32.mxu1 %v5005_v40  ;;  %v3172_v40 = vpack.c.bf16 %v1841_v24, %v1840_v33 }
 0x206   :  { %3173 = vmatprep.subr.bf16.mxu0 %v3172_v40 }
 0x207   :  { %1580 = vmatmul.mubr.f32.gmra.mrb[48].mxu1 %v5008_v14  ;;  %v1824_v14 = vld [vmem:[%s5837_s6 + $0x160] sm:$0xff] }
 0x208   :  { %1584 = vmatprep.mubr.f32.mxu1 %v5024_v5  ;;  %v3174_v27 = vpack.c.bf16 %v1825_v28, %v1824_v14 }
 0x20a   :  { %3175 = vmatpush3.bf16.msra.mxu0 %v3174_v27 }
 0x20b   :  { %1585 = vmatmul.mubr.f32.gmra.mrb[50].mxu1 %v5027_v8  ;;  %3177 = vmatprep.subr.bf16.mxu0 %v3176_v36 }
 0x20c   :  { %1589 = vmatprep.mubr.f32.mxu1 %v5036_v2 }
 0x20e   :  { %3179 = vmatpush3.bf16.msra.mxu0 %v3178_v23 }
 0x20f   :  { %1590 = vmatmul.mubr.f32.gmra.mrb[52].mxu1 %v5039_v61 }
 0x29a   :  { %v1501_v59 = vpop.f32.mrb[16].mxu1 }
 0x29b   :  { %v3420_v5 = vadd.f32 %v5189_v53, %v1501_v59  ;;  %v1503_v8 = vpop.f32.mrb[17].mxu1 }
 0x29d   :  { %v1595_v32 = vmax.f32 %v3420_v5, 0.0 }
 0x29e   :  { %v1506_v58 = vpop.f32.mrb[18].mxu1 }
 0x29f   :  { %v3421_v12 = vadd.f32 %v5189_v53, %v1506_v58  ;;  %v1508_v2 = vpop.f32.mrb[19].mxu1  ;;  %v1631_v52 = vrot.slane %v1595_v32, 2 }
 0x2a1   :  { %v1596_v61 = vmax.f32 %v3421_v12, 0.0 }
 0x2a2   :  { %v1511_v10 = vpop.f32.mrb[20].mxu1 }
 0x2a3   :  { %v1632_v29 = vrot.slane %v1596_v61, 2  ;;  %v3422_v51 = vadd.f32 %v5189_v53, %v1511_v10  ;;  %v1513_v35 = vpop.f32.mrb[21].mxu1 }
 0x2a5   :  { %v1597_v30 = vmax.f32 %v3422_v51, 0.0  ;;  %v1633_v37 = vsel %vm162_vm2, %v1631_v52, %v1632_v29 }
 0x2a6   :  { %v1516_v18 = vpop.f32.mrb[22].mxu1  ;;  %1915 = vmatprep.mubr.f32.mxu1 %v1633_v37 }
 0x2a7   :  { %v3423_v13 = vadd.f32 %v5189_v53, %v1516_v18  ;;  %v1518_v44 = vpop.f32.mrb[23].mxu1  ;;  %1916 = vmatmul.mubr.f32.vlgmr.msra.gmra.mrb[54].mxu1 %v1595_v32  ;;  %v1634_v1 = vrot.slane %v1597_v30, 2  ;;  %v1682_v11 = vrot.slane %v1597_v30, 4  ;;  %v1731_v31 = vrot.slane %v1597_v30, 6 }
 0x2a9   :  { %v1598_v41 = vmax.f32 %v3423_v13, 0.0  ;;  %v1635_v54 = vsel %vm162_vm2, %v1632_v29, %v1634_v1 }
 0x2aa   :  { %v1521_v17 = vpop.f32.mrb[24].mxu1  ;;  %1920 = vmatprep.mubr.f32.mxu1 %v1635_v54 }
 0x2ab   :  { %v1683_v6 = vrot.slane %v1598_v41, 4  ;;  %v3424_v7 = vadd.f32 %v5189_v53, %v1521_v17  ;;  %v1523_v20 = vpop.f32.mrb[25].mxu1  ;;  %1921 = vmatmul.mubr.f32.gmra.mrb[56].mxu1 %v1596_v61  ;;  %v1636_v19 = vrot.slane %v1598_v41, 2  ;;  %v1732_v50 = vrot.slane %v1598_v41, 6 }
 0x2ad   :  { %v1599_v38 = vmax.f32 %v3424_v7, 0.0  ;;  %v1637_v56 = vsel %vm162_vm2, %v1634_v1, %v1636_v19  ;;  %v1733_v55 = vsel %vm1145_vm3, %v1731_v31, %v1732_v50  ;;  %v1684_v25 = vsel %vm1086_vm4, %v1682_v11, %v1683_v6 }
 0x2ae   :  { %v1526_v42 = vpop.f32.mrb[26].mxu1  ;;  %1925 = vmatprep.mubr.f32.mxu1 %v1637_v56  ;;  %2060 = vmatprep.mubr.f32.mxu0 %v1733_v55 }
 0x2af   :  { %v3425_v9 = vadd.f32 %v5189_v53, %v1526_v42  ;;  %v1528_v43 = vpop.f32.mrb[27].mxu1  ;;  %1926 = vmatmul.mubr.f32.gmra.mrb[58].mxu1 %v1597_v30  ;;  %2061 = vmatmul.mubr.f32.vlgmr.msra.gmra.mrb[48].mxu0 %v1684_v25  ;;  %v1638_v16 = vrot.slane %v1599_v38, 2  ;;  %v1734_v0 = vrot.slane %v1599_v38, 6  ;;  %v1685_v47 = vrot.slane %v1599_v38, 4 }
 0x2b1   :  { %v1600_v49 = vmax.f32 %v3425_v9, 0.0  ;;  %v1639_v48 = vsel %vm162_vm2, %v1636_v19, %v1638_v16  ;;  %v1735_v46 = vsel %vm1145_vm3, %v1732_v50, %v1734_v0  ;;  %v1686_v4 = vsel %vm1086_vm4, %v1683_v6, %v1685_v47 }
 0x2b2   :  { %v1531_v22 = vpop.f32.mrb[28].mxu1  ;;  %1930 = vmatprep.mubr.f32.mxu1 %v1639_v48  ;;  %2065 = vmatprep.mubr.f32.mxu0 %v1735_v46 }
 0x2b3   :  { %v3426_v26 = vadd.f32 %v5189_v53, %v1531_v22  ;;  %v1533_v21 = vpop.f32.mrb[29].mxu1  ;;  %1931 = vmatmul.mubr.f32.gmra.mrb[60].mxu1 %v1598_v41  ;;  %2066 = vmatmul.mubr.f32.gmra.mrb[50].mxu0 %v1686_v4  ;;  %v1640_v57 = vrot.slane %v1600_v49, 2  ;;  %v1736_v45 = vrot.slane %v1600_v49, 6  ;;  %v1687_v60 = vrot.slane %v1600_v49, 4 }
 0x2b5   :  { %v1601_v62 = vmax.f32 %v3426_v26, 0.0  ;;  %v1641_v63 = vsel %vm162_vm2, %v1638_v16, %v1640_v57  ;;  %v1737_v33 = vsel %vm1145_vm3, %v1734_v0, %v1736_v45  ;;  %v1688_v24 = vsel %vm1086_vm4, %v1685_v47, %v1687_v60 }
 0x2b6   :  { %v1536_v40 = vpop.f32.mrb[30].mxu1  ;;  %1935 = vmatprep.mubr.f32.mxu1 %v1641_v63  ;;  %2070 = vmatprep.mubr.f32.mxu0 %v1737_v33 }
 0x2b7   :  { %v3427_v14 = vadd.f32 %v5189_v53, %v1536_v40  ;;  %v1538_v28 = vpop.f32.mrb[31].mxu1  ;;  %1936 = vmatmul.mubr.f32.gmra.mrb[62].mxu1 %v1599_v38  ;;  %2071 = vmatmul.mubr.f32.gmra.mrb[52].mxu0 %v1688_v24  ;;  %v1642_v27 = vrot.slane %v1601_v62, 2  ;;  %v1738_v15 = vrot.slane %v1601_v62, 6  ;;  %v1689_v39 = vrot.slane %v1601_v62, 4 }
 0x2b9   :  { %v1602_v36 = vmax.f32 %v3427_v14, 0.0  ;;  %v1643_v34 = vsel %vm162_vm2, %v1640_v57, %v1642_v27  ;;  %v1739_v3 = vsel %vm1145_vm3, %v1736_v45, %v1738_v15  ;;  %v1690_v23 = vsel %vm1086_vm4, %v1687_v60, %v1689_v39 }
 0x2ba   :  { %v1541_v59 = vpop.f32.mrb[32].mxu1  ;;  %1940 = vmatprep.mubr.f32.mxu1 %v1643_v34  ;;  %2075 = vmatprep.mubr.f32.mxu0 %v1739_v3 }
 0x2bb   :  { %v3428_v5 = vadd.f32 %v5189_v53, %v1541_v59  ;;  %v1543_v8 = vpop.f32.mrb[33].mxu1  ;;  %1941 = vmatmul.mubr.f32.gmra.mrb[64].mxu1 %v1600_v49  ;;  %2076 = vmatmul.mubr.f32.gmra.mrb[54].mxu0 %v1690_v23  ;;  %v1644_v58 = vrot.slane %v1602_v36, 2  ;;  %v1740_v32 = vrot.slane %v1602_v36, 6  ;;  %v1691_v12 = vrot.slane %v1602_v36, 4 }
 0x2bd   :  { %v1603_v2 = vmax.f32 %v3428_v5, 0.0  ;;  %v1645_v61 = vsel %vm162_vm2, %v1642_v27, %v1644_v58  ;;  %v1741_v10 = vsel %vm1145_vm3, %v1738_v15, %v1740_v32  ;;  %v1692_v52 = vsel %vm1086_vm4, %v1689_v39, %v1691_v12 }
 0x2be   :  { %v1546_v29 = vpop.f32.mrb[34].mxu1  ;;  %1945 = vmatprep.mubr.f32.mxu1 %v1645_v61  ;;  %2080 = vmatprep.mubr.f32.mxu0 %v1741_v10 }
 0x2bf   :  { %v3429_v51 = vadd.f32 %v5189_v53, %v1546_v29  ;;  %v1548_v35 = vpop.f32.mrb[35].mxu1  ;;  %1946 = vmatmul.mubr.f32.gmra.mrb[66].mxu1 %v1601_v62  ;;  %2081 = vmatmul.mubr.f32.gmra.mrb[56].mxu0 %v1692_v52  ;;  %v1646_v30 = vrot.slane %v1603_v2, 2  ;;  %v1742_v37 = vrot.slane %v1603_v2, 6  ;;  %v1693_v18 = vrot.slane %v1603_v2, 4 }
 0x2c1   :  { %v1604_v13 = vmax.f32 %v3429_v51, 0.0  ;;  %v1647_v44 = vsel %vm162_vm2, %v1644_v58, %v1646_v30  ;;  %v1743_v1 = vsel %vm1145_vm3, %v1740_v32, %v1742_v37  ;;  %v1694_v41 = vsel %vm1086_vm4, %v1691_v12, %v1693_v18 }
 0x2c2   :  { %v1551_v54 = vpop.f32.mrb[36].mxu1  ;;  %1950 = vmatprep.mubr.f32.mxu1 %v1647_v44  ;;  %2085 = vmatprep.mubr.f32.mxu0 %v1743_v1 }
 0x2c3   :  { %v3430_v11 = vadd.f32 %v5189_v53, %v1551_v54  ;;  %v1553_v17 = vpop.f32.mrb[37].mxu1  ;;  %1951 = vmatmul.mubr.f32.gmra.mrb[68].mxu1 %v1602_v36  ;;  %2086 = vmatmul.mubr.f32.gmra.mrb[58].mxu0 %v1694_v41  ;;  %v1648_v31 = vrot.slane %v1604_v13, 2  ;;  %v1744_v6 = vrot.slane %v1604_v13, 6  ;;  %v1695_v7 = vrot.slane %v1604_v13, 4 }
 0x2c5   :  { %v1605_v20 = vmax.f32 %v3430_v11, 0.0  ;;  %v1649_v19 = vsel %vm162_vm2, %v1646_v30, %v1648_v31  ;;  %v1745_v50 = vsel %vm1145_vm3, %v1742_v37, %v1744_v6  ;;  %v1696_v38 = vsel %vm1086_vm4, %v1693_v18, %v1695_v7 }
 0x2c6   :  { %v1556_v56 = vpop.f32.mrb[38].mxu1  ;;  %1955 = vmatprep.mubr.f32.mxu1 %v1649_v19  ;;  %2090 = vmatprep.mubr.f32.mxu0 %v1745_v50 }
 0x2c7   :  { %v3431_v55 = vadd.f32 %v5189_v53, %v1556_v56  ;;  %v1558_v25 = vpop.f32.mrb[39].mxu1  ;;  %1956 = vmatmul.mubr.f32.gmra.mrb[70].mxu1 %v1603_v2  ;;  %2091 = vmatmul.mubr.f32.gmra.mrb[60].mxu0 %v1696_v38  ;;  %v1650_v42 = vrot.slane %v1605_v20, 2  ;;  %v1746_v9 = vrot.slane %v1605_v20, 6  ;;  %v1697_v43 = vrot.slane %v1605_v20, 4 }
 0x2c9   :  { %v1606_v16 = vmax.f32 %v3431_v55, 0.0  ;;  %v1651_v0 = vsel %vm162_vm2, %v1648_v31, %v1650_v42  ;;  %v1747_v47 = vsel %vm1145_vm3, %v1744_v6, %v1746_v9  ;;  %v1698_v49 = vsel %vm1086_vm4, %v1695_v7, %v1697_v43 }
 0x2ca   :  { %v1561_v48 = vpop.f32.mrb[40].mxu1  ;;  %1960 = vmatprep.mubr.f32.mxu1 %v1651_v0  ;;  %2095 = vmatprep.mubr.f32.mxu0 %v1747_v47 }
 0x2cb   :  { %v3432_v46 = vadd.f32 %v5189_v53, %v1561_v48  ;;  %v1563_v4 = vpop.f32.mrb[41].mxu1  ;;  %1961 = vmatmul.mubr.f32.gmra.mrb[72].mxu1 %v1604_v13  ;;  %2096 = vmatmul.mubr.f32.gmra.mrb[62].mxu0 %v1698_v49  ;;  %v1652_v22 = vrot.slane %v1606_v16, 2  ;;  %v1748_v26 = vrot.slane %v1606_v16, 6  ;;  %v1699_v21 = vrot.slane %v1606_v16, 4 }
 0x2cd   :  { %v1607_v57 = vmax.f32 %v3432_v46, 0.0  ;;  %v1653_v45 = vsel %vm162_vm2, %v1650_v42, %v1652_v22  ;;  %v1749_v60 = vsel %vm1145_vm3, %v1746_v9, %v1748_v26  ;;  %v1700_v62 = vsel %vm1086_vm4, %v1697_v43, %v1699_v21 }
 0x2ce   :  { %v1566_v63 = vpop.f32.mrb[42].mxu1  ;;  %1965 = vmatprep.mubr.f32.mxu1 %v1653_v45  ;;  %2100 = vmatprep.mubr.f32.mxu0 %v1749_v60 }
 0x2cf   :  { %v3433_v33 = vadd.f32 %v5189_v53, %v1566_v63  ;;  %v1568_v24 = vpop.f32.mrb[43].mxu1  ;;  %1966 = vmatmul.mubr.f32.gmra.mrb[74].mxu1 %v1605_v20  ;;  %2101 = vmatmul.mubr.f32.gmra.mrb[64].mxu0 %v1700_v62  ;;  %v1654_v40 = vrot.slane %v1607_v57, 2  ;;  %v1750_v14 = vrot.slane %v1607_v57, 6  ;;  %v1701_v28 = vrot.slane %v1607_v57, 4  ;;  %v2443_v63 = vld [vmem:[%s5840_s9 + $0x18] sm:$0xff] }
 0x2d0   :  { %v3542_v62 = vmov 0.0  }
 0x2d1   :  { %v1608_v27 = vmax.f32 %v3433_v33, 0.0  ;;  %v1655_v15 = vsel %vm162_vm2, %v1652_v22, %v1654_v40  ;;  %v1751_v39 = vsel %vm1145_vm3, %v1748_v26, %v1750_v14  ;;  %v1702_v36 = vsel %vm1086_vm4, %v1699_v21, %v1701_v28  ;;  %v2440_v33 = vld [vmem:[%s5840_s9] sm:$0xff] }
 0x2d2   :  { %v1571_v34 = vpop.f32.mrb[44].mxu1  ;;  %1970 = vmatprep.mubr.f32.mxu1 %v1655_v15  ;;  %2105 = vmatprep.mubr.f32.mxu0 %v1751_v39  ;;  %v2444_v39 = vld [vmem:[%s5840_s9 + $0x20] sm:$0xff] }
 0x2d3   :  { %v3434_v3 = vadd.f32 %v5189_v53, %v1571_v34  ;;  %v1573_v23 = vpop.f32.mrb[45].mxu1  ;;  %1971 = vmatmul.mubr.f32.gmra.mrb[76].mxu1 %v1606_v16  ;;  %2106 = vmatmul.mubr.f32.gmra.mrb[66].mxu0 %v1702_v36  ;;  %v1656_v59 = vrot.slane %v1608_v27, 2  ;;  %v1752_v5 = vrot.slane %v1608_v27, 6  ;;  %v1703_v8 = vrot.slane %v1608_v27, 4  ;;  %v2446_v36 = vld [vmem:[%s5840_s9 + $0x30] sm:$0xff]  ;;  %v2449_v34 = vld [vmem:[%s5840_s9 + $0x48] sm:$0xff] }
 0x2d4   :  { %v3234_v23 = vpack.c.bf16 %v2446_v36, %v2444_v39 }
 0x2d5   :  { %v1609_v58 = vmax.f32 %v3434_v3, 0.0  ;;  %v1657_v32 = vsel %vm162_vm2, %v1654_v40, %v1656_v59  ;;  %v1753_v12 = vsel %vm1145_vm3, %v1750_v14, %v1752_v5  ;;  %v1704_v2 = vsel %vm1086_vm4, %v1701_v28, %v1703_v8  ;;  %v2442_v40 = vld [vmem:[%s5840_s9 + $0x10] sm:$0xff]  ;;  %v2445_v14 = vld [vmem:[%s5840_s9 + $0x28] sm:$0xff]  ;;  %v2447_v28 = vld [vmem:[%s5840_s9 + $0x38] sm:$0xff] }
 0x2d6   :  { %v1576_v61 = vpop.f32.mrb[46].mxu1  ;;  %1975 = vmatprep.mubr.f32.mxu1 %v1657_v32  ;;  %2110 = vmatprep.mubr.f32.mxu0 %v1753_v12  ;;  %v3232_v15 = vpack.c.bf16 %v2447_v28, %v2445_v14  ;;  %v2451_v3 = vld [vmem:[%s5840_s9 + $0x58] sm:$0xff] }
 0x2d7   :  { %v3435_v10 = vadd.f32 %v5189_v53, %v1576_v61  ;;  %v1578_v52 = vpop.f32.mrb[47].mxu1  ;;  %1976 = vmatmul.mubr.f32.gmra.mrb[78].mxu1 %v1607_v57  ;;  %2111 = vmatmul.mubr.f32.gmra.mrb[68].mxu0 %v1704_v2  ;;  %v1658_v29 = vrot.slane %v1609_v58, 2  ;;  %v1754_v51 = vrot.slane %v1609_v58, 6  ;;  %v1705_v35 = vrot.slane %v1609_v58, 4  ;;  %v2455_v32 = vld [vmem:[%s5840_s9 + $0x78] sm:$0xff]  ;;  %v2452_v61 = vld [vmem:[%s5840_s9 + $0x60] sm:$0xff] }
 0x2d8   :  { %v2457_v52 = vld [vmem:[%s5840_s9 + $0x88] sm:$0xff] }
 0x2d9   :  { %v1610_v30 = vmax.f32 %v3435_v10, 0.0  ;;  %v1659_v37 = vsel %vm162_vm2, %v1656_v59, %v1658_v29  ;;  %v1755_v18 = vsel %vm1145_vm3, %v1752_v5, %v1754_v51  ;;  %v1706_v13 = vsel %vm1086_vm4, %v1703_v8, %v1705_v35  ;;  %v2448_v5 = vld [vmem:[%s5840_s9 + $0x40] sm:$0xff]  ;;  %v2450_v8 = vld [vmem:[%s5840_s9 + $0x50] sm:$0xff] }
 0x2da   :  { %v1581_v44 = vpop.f32.mrb[48].mxu1  ;;  %1980 = vmatprep.mubr.f32.mxu1 %v1659_v37  ;;  %2115 = vmatprep.mubr.f32.mxu0 %v1755_v18  ;;  %v3236_v59 = vpack.c.bf16 %v2451_v3, %v2449_v34  ;;  %v3238_v12 = vpack.c.bf16 %v2450_v8, %v2448_v5  ;;  %v2454_v10 = vld [vmem:[%s5840_s9 + $0x70] sm:$0xff]  ;;  %v2461_v18 = vld [vmem:[%s5840_s9 + $0xa8] sm:$0xff] }
 0x2db   :  { %v3436_v1 = vadd.f32 %v5189_v53, %v1581_v44  ;;  %v1583_v41 = vpop.f32.mrb[49].mxu1  ;;  %1981 = vmatmul.mubr.f32.gmra.mrb[80].mxu1 %v1608_v27  ;;  %2116 = vmatmul.mubr.f32.gmra.mrb[70].mxu0 %v1706_v13  ;;  %v1660_v54 = vrot.slane %v1610_v30, 2  ;;  %v1756_v11 = vrot.slane %v1610_v30, 6  ;;  %v1707_v17 = vrot.slane %v1610_v30, 4  ;;  %v2458_v37 = vld [vmem:[%s5840_s9 + $0x90] sm:$0xff]  ;;  %v2463_v13 = vld [vmem:[%s5840_s9 + $0xb8] sm:$0xff] }
 0x2dc   :  { %v3230_v27 = vpack.c.bf16 %v2442_v40, %v2440_v33  ;;  %v2460_v41 = vld [vmem:[%s5840_s9 + $0xa0] sm:$0xff]  ;;  %v2483_v40 = vld [vmem:[%s5840_s9 + $0x158] sm:$0xff]  ;;  %v2482_v5 = vld [vmem:[%s5840_s9 + $0x150] sm:$0xff] }
 0x2dd   :  { %v1611_v31 = vmax.f32 %v3436_v1, 0.0  ;;  %v1661_v6 = vsel %vm162_vm2, %v1658_v29, %v1660_v54  ;;  %v1757_v7 = vsel %vm1145_vm3, %v1754_v51, %v1756_v11  ;;  %v1708_v20 = vsel %vm1086_vm4, %v1705_v35, %v1707_v17  ;;  %v2459_v29 = vld [vmem:[%s5840_s9 + $0x98] sm:$0xff]  ;;  %v5382_v33 = vld [vmem:[%s5838_s7] ss:$0 sm:$0xff]  ;;  %v2485_v8 = vld [vmem:[%s5840_s9 + $0x168] sm:$0xff] }
 0x2de   :  { %v1586_v19 = vpop.f32.mrb[50].mxu1  ;;  %1985 = vmatprep.mubr.f32.mxu1 %v1661_v6  ;;  %2120 = vmatprep.mubr.f32.mxu0 %v1757_v7  ;;  %v3242_v51 = vpack.c.bf16 %v2454_v10, %v2452_v61  ;;  %v3244_v35 = vpack.c.bf16 %v2459_v29, %v2457_v52  ;;  %v3248_v1 = vpack.c.bf16 %v2463_v13, %v2461_v18  ;;  %v2464_v7 = vld [vmem:[%s5840_s9 + $0xc0] sm:$0xff]  ;;  %v2486_v18 = vld [vmem:[%s5840_s9 + $0x170] sm:$0xff]  ;;  %v2489_v13 = vld [vmem:[%s5840_s9 + $0x188] sm:$0xff] }
 0x2df   :  { %v1662_v50 = vrot.slane %v1611_v31, 2  ;;  %v1709_v38 = vrot.slane %v1611_v31, 4  ;;  %v1758_v56 = vrot.slane %v1611_v31, 6  ;;  %v3437_v55 = vadd.f32 %v5189_v53, %v1586_v19  ;;  %v1588_v25 = vpop.f32.mrb[51].mxu1  ;;  %1986 = vmatmul.mubr.f32.gmra.mrb[82].mxu1 %v1609_v58  ;;  %2121 = vmatmul.mubr.f32.gmra.mrb[72].mxu0 %v1708_v20  ;;  %v2453_v58 = vld [vmem:[%s5840_s9 + $0x68] sm:$0xff]  ;;  %v2466_v20 = vld [vmem:[%s5840_s9 + $0xd0] sm:$0xff] }
 0x2e0   :  { %v3240_v2 = vpack.c.bf16 %v2455_v32, %v2453_v58  ;;  %v2469_v19 = vld [vmem:[%s5840_s9 + $0xe8] sm:$0xff]  ;;  %v2470_v25 = vld [vmem:[%s5840_s9 + $0xf0] sm:$0xff]  ;;  %v2487_v58 = vld [vmem:[%s5840_s9 + $0x178] sm:$0xff] }
 0x2e1   :  { %v1612_v42 = vmax.f32 %v3437_v55, 0.0  ;;  %v1663_v9 = vsel %vm162_vm2, %v1660_v54, %v1662_v50  ;;  %v1759_v43 = vsel %vm1145_vm3, %v1756_v11, %v1758_v56  ;;  %v1710_v16 = vsel %vm1086_vm4, %v1707_v17, %v1709_v38  ;;  %v2462_v54 = vld [vmem:[%s5840_s9 + $0xb0] sm:$0xff]  ;;  %v2465_v11 = vld [vmem:[%s5840_s9 + $0xc8] sm:$0xff]  ;;  %v2467_v17 = vld [vmem:[%s5840_s9 + $0xd8] sm:$0xff] }
 0x2e2   :  { %v1591_v0 = vpop.f32.mrb[52].mxu1  ;;  %1990 = vmatprep.mubr.f32.mxu1 %v1663_v9  ;;  %2125 = vmatprep.mubr.f32.mxu0 %v1759_v43  ;;  %v3250_v31 = vpack.c.bf16 %v2462_v54, %v2460_v41  ;;  %v3252_v6 = vpack.c.bf16 %v2467_v17, %v2465_v11  ;;  %v2471_v50 = vld [vmem:[%s5840_s9 + $0xf8] sm:$0xff]  ;;  %v2468_v55 = vld [vmem:[%s5840_s9 + $0xe0] sm:$0xff] }
 0x2e3   :  { %v1711_v47 = vrot.slane %v1612_v42, 4  ;;  %v1760_v49 = vrot.slane %v1612_v42, 6  ;;  %v3438_v48 = vadd.f32 %v5189_v53, %v1591_v0  ;;  %v1593_v46 = vpop.f32.mrb[53].mxu1  ;;  %1991 = vmatmul.mubr.f32.gmra.mrb[84].mxu1 %v1610_v30  ;;  %2126 = vmatmul.mubr.f32.gmra.mrb[74].mxu0 %v1710_v16  ;;  %v2441_v53 = vld [vmem:[%s5840_s9 + $0x8] sm:$0xff]  ;;  %v2456_v30 = vld [vmem:[%s5840_s9 + $0x80] sm:$0xff]  ;;  %v2475_v9 = vld [vmem:[%s5840_s9 + $0x118] sm:$0xff]  ;;  %v3258_v0 = vpack.c.bf16 %v2470_v25, %v2468_v55 }
 0x2e4   :  { %2362 = vmatprep.mubr.f32.mxu1 %v3542_v62  ;;  %v3228_v24 = vpack.c.bf16 %v2443_v63, %v2441_v53  ;;  %v3246_v44 = vpack.c.bf16 %v2458_v37, %v2456_v30  ;;  %v2473_v42 = vld [vmem:[%s5840_s9 + $0x108] sm:$0xff]  ;;  %v2474_v46 = vld [vmem:[%s5840_s9 + $0x110] sm:$0xff]  ;;  %v2476_v53 = vld [vmem:[%s5840_s9 + $0x120] sm:$0xff]  ;;  %v3272_v37 = vpack.c.bf16 %v2487_v58, %v2485_v8 }
 0x2e5   :  { %v1613_v4 = vmax.f32 %v3438_v48, 0.0  ;;  %v1761_v22 = vsel %vm1145_vm3, %v1758_v56, %v1760_v49  ;;  %v1712_v26 = vsel %vm1086_vm4, %v1709_v38, %v1711_v47  ;;  %v3254_v38 = vpack.c.bf16 %v2466_v20, %v2464_v7  ;;  %v2472_v48 = vld [vmem:[%s5840_s9 + $0x100] sm:$0xff]  ;;  %v2478_v63 = vld [vmem:[%s5840_s9 + $0x130] sm:$0xff]  ;;  %v2493_v25 = vld [vmem:[%s5840_s9 + $0x1a8] sm:$0xff] }
 0x2e6   :  { %2130 = vmatprep.mubr.f32.mxu0 %v1761_v22  ;;  %3229 = vmatprep.subr.bf16.mxu0 %v3228_v24  ;;  %v3256_v56 = vpack.c.bf16 %v2471_v50, %v2469_v19  ;;  %v2479_v22 = vld [vmem:[%s5840_s9 + $0x138] sm:$0xff]  ;;  %v2481_v24 = vld [vmem:[%s5840_s9 + $0x148] sm:$0xff]  ;;  %v3266_v39 = vpack.c.bf16 %v2478_v63, %v2476_v53  ;;  %v2484_v29 = vld [vmem:[%s5840_s9 + $0x160] sm:$0xff] }
 0x2e7   :  { %v1713_v21 = vrot.slane %v1613_v4, 4  ;;  %v1762_v57 = vrot.slane %v1613_v4, 6  ;;  %2131 = vmatmul.mubr.f32.gmra.mrb[76].mxu0 %v1712_v26  ;;  %v2477_v4 = vld [vmem:[%s5840_s9 + $0x128] sm:$0xff]  ;;  %v2488_v20 = vld [vmem:[%s5840_s9 + $0x180] sm:$0xff]  ;;  %v2490_v55 = vld [vmem:[%s5840_s9 + $0x190] sm:$0xff] }
 0x2e8   :  { %3231 = vmatpush1.bf16.msra.mxu0 %v3230_v27  ;;  %v2494_v63 = vld [vmem:[%s5840_s9 + $0x1b0] sm:$0xff] }
 0x2e9   :  { %v1763_v45 = vsel %vm1145_vm3, %v1760_v49, %v1762_v57  ;;  %v1714_v60 = vsel %vm1086_vm4, %v1711_v47, %v1713_v21  ;;  %3233 = vmatprep.subr.bf16.mxu0 %v3232_v15  ;;  %v3260_v49 = vpack.c.bf16 %v2475_v9, %v2473_v42  ;;  %v3262_v57 = vpack.c.bf16 %v2474_v46, %v2472_v48  ;;  %v2495_v42 = vld [vmem:[%s5840_s9 + $0x1b8] sm:$0xff] }
 0x2ea   :  { %2135 = vmatprep.mubr.f32.mxu0 %v1763_v45 }
 0x2eb   :  { %2136 = vmatmul.mubr.f32.gmra.mrb[78].mxu0 %v1714_v60  ;;  %v3264_v60 = vpack.c.bf16 %v2479_v22, %v2477_v4  ;;  %v3278_v22 = vpack.c.bf16 %v2490_v55, %v2488_v20 }
 0x2ec   :  { %3235 = vmatpush1.bf16.msra.mxu0 %v3234_v23  ;;  %v3268_v23 = vpack.c.bf16 %v2483_v40, %v2481_v24  ;;  %v2497_v24 = vld [vmem:[%s5840_s9 + $0x1c8] sm:$0xff]  ;;  %v2499_v40 = vld [vmem:[%s5840_s9 + $0x1d8] sm:$0xff] }
 0x2ed   :  { %3237 = vmatprep.subr.bf16.mxu0 %v3236_v59  ;;  %v2480_v59 = vld [vmem:[%s5840_s9 + $0x140] sm:$0xff]  ;;  %v3284_v58 = vpack.c.bf16 %v2499_v40, %v2497_v24 }
 0x2ee   :  { %v3270_v52 = vpack.c.bf16 %v2482_v5, %v2480_v59 }
 0x2f0   :  { %3239 = vmatpush1.bf16.msra.mxu0 %v3238_v12 }
 0x2f1   :  { %3241 = vmatprep.subr.bf16.mxu0 %v3240_v2 }
 0x2f4   :  { %3243 = vmatpush1.bf16.msra.mxu0 %v3242_v51 }
 0x2f5   :  { %3245 = vmatprep.subr.bf16.mxu0 %v3244_v35 }
 0x2f8   :  { %3247 = vmatpush1.bf16.msra.mxu0 %v3246_v44  ;;  %v2491_v44 = vld [vmem:[%s5840_s9 + $0x198] sm:$0xff] }
 0x2f9   :  { %3249 = vmatprep.subr.bf16.mxu0 %v3248_v1  ;;  %v3276_v7 = vpack.c.bf16 %v2491_v44, %v2489_v13 }
 0x2fc   :  { %3251 = vmatpush1.bf16.msra.mxu0 %v3250_v31 }
 0x2fd   :  { %3253 = vmatprep.subr.bf16.mxu0 %v3252_v6  ;;  %v3274_v6 = vpack.c.bf16 %v2486_v18, %v2484_v29 }
 0x300   :  { %3255 = vmatpush1.bf16.msra.mxu0 %v3254_v38 }
 0x301   :  { %3257 = vmatprep.subr.bf16.mxu0 %v3256_v56 }
 0x304   :  { %3259 = vmatpush1.bf16.msra.mxu0 %v3258_v0 }
 0x305   :  { %3261 = vmatprep.subr.bf16.mxu0 %v3260_v49 }
 0x308   :  { %3263 = vmatpush1.bf16.msra.mxu0 %v3262_v57 }
 0x309   :  { %3265 = vmatprep.subr.bf16.mxu0 %v3264_v60 }
 0x30c   :  { %3267 = vmatpush1.bf16.msra.mxu0 %v3266_v39 }
 0x30d   :  { %3269 = vmatprep.subr.bf16.mxu0 %v3268_v23 }
 0x310   :  { %3271 = vmatpush1.bf16.msra.mxu0 %v3270_v52 }
 0x311   :  { %3273 = vmatprep.subr.bf16.mxu0 %v3272_v37 }
 0x314   :  { %3275 = vmatpush1.bf16.msra.mxu0 %v3274_v6 }
 0x315   :  { %3277 = vmatprep.subr.bf16.mxu0 %v3276_v7 }
 0x318   :  { %3279 = vmatpush1.bf16.msra.mxu0 %v3278_v22 }
 0x37a   :  { %v2796_v43 = vpop.f32.mrb[54].mxu1 }
 0x37b   :  { %v2797_v16 = vpop.f32.mrb[55].mxu1 }
 0x37c   :  { %v2798_v47 = vadd.f32 %v2797_v16, %v2796_v43 }
 0x37e   :  { %v2799_v26 = vpop.f32.mrb[56].mxu1  ;;  %v1918_v36 = vadd.f32 %v2798_v47, %v5382_v33 }
 0x37f   :  { %v2800_v21 = vpop.f32.mrb[57].mxu1 }
 0x380   :  { %v2801_v45 = vadd.f32 %v2800_v21, %v2799_v26  ;;  %v3280_v26 = vpack.c.bf16 %v2495_v42, %v2493_v25  ;;  %v2492_v21 = vld [vmem:[%s5840_s9 + $0x1a0] sm:$0xff] }
 0x381   :  { %v3282_v8 = vpack.c.bf16 %v2494_v63, %v2492_v21 }
 0x382   :  { %v2802_v14 = vpop.f32.mrb[58].mxu1  ;;  %v2876_v28 = vpop.f32.mrb[48].mxu0  ;;  %v1923_v51 = vadd.f32 %v2801_v45, %v5382_v33  ;;  %3281 = vmatprep.subr.bf16.mxu0 %v3280_v26 }
 0x383   :  { %v2803_v27 = vpop.f32.mrb[59].mxu1  ;;  %v2877_v15 = vpop.f32.mrb[49].mxu0  ;;  %3283 = vmatpush1.bf16.msra.mxu0 %v3282_v8 }
 0x384   :  { %v2804_v34 = vadd.f32 %v2803_v27, %v2802_v14  ;;  %v2878_v3 = vadd.f32 %v2877_v15, %v2876_v28  ;;  %v2496_v14 = vld [vmem:[%s5840_s9 + $0x1c0] sm:$0xff]  ;;  %3285 = vmatprep.subr.bf16.mxu0 %v3284_v58 }
 0x386   :  { %v2063_v32 = vadd.f32 %v2878_v3, %v1918_v36  ;;  %v2805_v12 = vpop.f32.mrb[60].mxu1  ;;  %v2879_v2 = vpop.f32.mrb[50].mxu0  ;;  %v1928_v19 = vadd.f32 %v2804_v34, %v5382_v33  ;;  %v2498_v36 = vld [vmem:[%s5840_s9 + $0x1d0] sm:$0xff]  ;;  %v2501_v34 = vld [vmem:[%s5840_s9 + $0x1e8] sm:$0xff]  ;;  %v2503_v3 = vld [vmem:[%s5840_s9 + $0x1f8] sm:$0xff] }
 0x387   :  { %v2806_v61 = vpop.f32.mrb[61].mxu1  ;;  %v2880_v10 = vpop.f32.mrb[51].mxu0  ;;  %v3286_v52 = vpack.c.bf16 %v2498_v36, %v2496_v14  ;;  %v3288_v29 = vpack.c.bf16 %v2503_v3, %v2501_v34 }
 0x388   :  { %v2807_v35 = vadd.f32 %v2806_v61, %v2805_v12  ;;  %v2881_v30 = vadd.f32 %v2880_v10, %v2879_v2  ;;  %v2141_v1 = vmax.f32 %v2063_v32, 0.0 }
 0x389   :  { %3287 = vmatpush1.bf16.msra.mxu0 %v3286_v52 }
 0x38a   :  { %v2068_v41 = vadd.f32 %v2881_v30, %v1923_v51  ;;  %v2808_v54 = vpop.f32.mrb[62].mxu1  ;;  %v2882_v11 = vpop.f32.mrb[52].mxu0  ;;  %v2171_v9 = vrot.slane %v2141_v1, 2  ;;  %v1933_v48 = vadd.f32 %v2807_v35, %v5382_v33  ;;  %3289 = vmatprep.subr.bf16.mxu0 %v3288_v29 }
 0x38b   :  { %v2809_v17 = vpop.f32.mrb[63].mxu1  ;;  %v2883_v31 = vpop.f32.mrb[53].mxu0 }
 0x38c   :  { %v2142_v50 = vmax.f32 %v2068_v41, 0.0  ;;  %v2810_v38 = vadd.f32 %v2809_v17, %v2808_v54  ;;  %v2884_v56 = vadd.f32 %v2883_v31, %v2882_v11 }
 0x38e   :  { %v2172_v43 = vrot.slane %v2142_v50, 2  ;;  %v3182_v16 = vpack.c.bf16 %v2142_v50, %v2141_v1  ;;  %v2073_v0 = vadd.f32 %v2884_v56, %v1928_v19  ;;  %v2811_v47 = vpop.f32.mrb[64].mxu1  ;;  %v2885_v49 = vpop.f32.mrb[54].mxu0  ;;  %v1938_v23 = vadd.f32 %v2810_v38, %v5382_v33  ;;  %v2500_v19 = vld [vmem:[%s5840_s9 + $0x1e0] sm:$0xff]  ;;  %v2502_v50 = vld [vmem:[%s5840_s9 + $0x1f0] sm:$0xff] }
 0x38f   :  { %v2812_v46 = vpop.f32.mrb[65].mxu1  ;;  %v2886_v4 = vpop.f32.mrb[55].mxu0 }
 0x390   :  { %v5433_v57 = vmax.f32 %v2073_v0, 0.0  ;;  %v2813_v45 = vadd.f32 %v2812_v46, %v2811_v47  ;;  %v2887_v60 = vadd.f32 %v2886_v4, %v2885_v49  ;;  %v2173_v53 = vsel %vm162_vm2, %v2171_v9, %v2172_v43 }
 0x392   :  { %v2078_v28 = vadd.f32 %v2887_v60, %v1933_v48  ;;  %v2814_v27 = vpop.f32.mrb[66].mxu1  ;;  %v2888_v15 = vpop.f32.mrb[56].mxu0  ;;  %v2174_v39 = vrot.slane %v5433_v57, 2  ;;  %v2213_v51 = vrot.slane %v5433_v57, 4  ;;  %v1943_v44 = vadd.f32 %v2813_v45, %v5382_v33 }
 0x393   :  { %v2815_v59 = vpop.f32.mrb[67].mxu1  ;;  %v2889_v5 = vpop.f32.mrb[57].mxu0  ;;  %v2253_v11 = vrot.slane %v5433_v57, 6  ;;  %v3290_v48 = vpack.c.bf16 %v2502_v50, %v2500_v19 }
 0x394   :  { %v5459_v32 = vmax.f32 %v2078_v28, 0.0  ;;  %v2816_v12 = vadd.f32 %v2815_v59, %v2814_v27  ;;  %v2890_v2 = vadd.f32 %v2889_v5, %v2888_v15  ;;  %v2175_v61 = vsel %vm162_vm2, %v2172_v43, %v2174_v39 }
 0x395   :  { %v3180_v10 = vpack.c.bf16 %v2175_v61, %v2173_v53  ;;  %3291 = vmatpush1.bf16.msra.mxu0 %v3290_v48 }
 0x396   :  { %v2214_v35 = vrot.slane %v5459_v32, 4  ;;  %v2083_v30 = vadd.f32 %v2890_v2, %v1938_v23  ;;  %v2817_v37 = vpop.f32.mrb[68].mxu1  ;;  %v2891_v18 = vpop.f32.mrb[58].mxu0  ;;  %v2176_v13 = vrot.slane %v5459_v32, 2  ;;  %v3186_v54 = vpack.c.bf16 %v5459_v32, %v5433_v57 }
 0x397   :  { %v2818_v1 = vpop.f32.mrb[69].mxu1  ;;  %v2892_v41 = vpop.f32.mrb[59].mxu0  ;;  %3181 = vmatprep.subr.bf16.mxu1 %v3180_v10  ;;  %v2254_v17 = vrot.slane %v5459_v32, 6 }
 0x398   :  { %v5470_v31 = vmax.f32 %v2083_v30, 0.0  ;;  %v2819_v6 = vadd.f32 %v2818_v1, %v2817_v37  ;;  %v2893_v7 = vadd.f32 %v2892_v41, %v2891_v18  ;;  %3183 = vmatpush1.bf16.msra.mxu1 %v3182_v16  ;;  %v2177_v20 = vsel %vm162_vm2, %v2174_v39, %v2176_v13 }
 0x399   :  { %v5480_v38 = vsel %vm1145_vm3, %v2253_v11, %v2254_v17  ;;  %v5483_v56 = vsel %vm1086_vm4, %v2213_v51, %v2214_v35  ;;  %v1948_v16 = vadd.f32 %v2816_v12, %v5382_v33 }
 0x39a   :  { %v2216_v55 = vrot.slane %v5470_v31, 4  ;;  %v2088_v25 = vadd.f32 %v2893_v7, %v1943_v44  ;;  %v2820_v42 = vpop.f32.mrb[70].mxu1  ;;  %v2894_v9 = vpop.f32.mrb[60].mxu0  ;;  %v2178_v43 = vrot.slane %v5470_v31, 2  ;;  %v2256_v49 = vrot.slane %v5470_v31, 6 }
 0x39b   :  { %v2821_v0 = vpop.f32.mrb[71].mxu1  ;;  %v2895_v47 = vpop.f32.mrb[61].mxu0  ;;  %v1953_v60 = vadd.f32 %v2819_v6, %v5382_v33 }
 0x39c   :  { %v2146_v46 = vmax.f32 %v2088_v25, 0.0  ;;  %v2822_v4 = vadd.f32 %v2821_v0, %v2820_v42  ;;  %v2896_v22 = vadd.f32 %v2895_v47, %v2894_v9  ;;  %v2179_v26 = vsel %vm162_vm2, %v2176_v13, %v2178_v43 }
 0x39d   :  { %v3184_v21 = vpack.c.bf16 %v2179_v26, %v2177_v20  ;;  %v5491_v57 = vsel %vm1145_vm3, %v2254_v17, %v2256_v49  ;;  %v5494_v45 = vsel %vm1086_vm4, %v2214_v35, %v2216_v55 }
 0x39e   :  { %v2218_v53 = vrot.slane %v2146_v46, 4  ;;  %v2093_v63 = vadd.f32 %v2896_v22, %v1948_v16  ;;  %v2823_v24 = vpop.f32.mrb[72].mxu1  ;;  %v2897_v40 = vpop.f32.mrb[62].mxu0  ;;  %v2180_v14 = vrot.slane %v2146_v46, 2  ;;  %v3190_v15 = vpack.c.bf16 %v2146_v46, %v5470_v31 }
 0x39f   :  { %v2824_v28 = vpop.f32.mrb[73].mxu1  ;;  %v2898_v27 = vpop.f32.mrb[63].mxu0  ;;  %3185 = vmatprep.subr.bf16.mxu1 %v3184_v21  ;;  %v3204_v39 = vpack.c.bf16 %v5491_v57, %v5480_v38  ;;  %v3206_v36 = vpack.c.bf16 %v5494_v45, %v5483_v56  ;;  %v2258_v34 = vrot.slane %v2146_v46, 6  ;;  %v1958_v52 = vadd.f32 %v2822_v4, %v5382_v33  ;;  %v2505_v38 = vld [vmem:[%s5840_s9 + $0x208] sm:$0xff]  ;;  %v2507_v56 = vld [vmem:[%s5840_s9 + $0x218] sm:$0xff] }
 0x3a0   :  { %v5502_v3 = vmax.f32 %v2093_v63, 0.0  ;;  %v2825_v23 = vadd.f32 %v2824_v28, %v2823_v24  ;;  %v2899_v59 = vadd.f32 %v2898_v27, %v2897_v40  ;;  %3187 = vmatpush1.bf16.msra.mxu1 %v3186_v54  ;;  %v2181_v5 = vsel %vm162_vm2, %v2178_v43, %v2180_v14  ;;  %v2710_v45 = vld [vmem:[%s5832_s1] sm:$0x3] }
 0x3a1   :  { %v5506_v8 = vsel %vm1145_vm3, %v2256_v49, %v2258_v34  ;;  %v5509_v58 = vsel %vm1086_vm4, %v2216_v55, %v2218_v53  ;;  %v3292_v57 = vpack.c.bf16 %v2507_v56, %v2505_v38  ;;  %v2540_v38 = vld [vmem:[%s5840_s9 + $0x320] sm:$0xff]  ;;  %v2542_v56 = vld [vmem:[%s5840_s9 + $0x330] sm:$0xff] }
 0x3a2   :  { %v2220_v32 = vrot.slane %v5502_v3, 4  ;;  %v2098_v12 = vadd.f32 %v2899_v59, %v1953_v60  ;;  %v2826_v2 = vpop.f32.mrb[74].mxu1  ;;  %v2900_v61 = vpop.f32.mrb[64].mxu0  ;;  %v2182_v10 = vrot.slane %v5502_v3, 2  ;;  %v2260_v35 = vrot.slane %v5502_v3, 6 }
 0x3a3   :  { %v2827_v29 = vpop.f32.mrb[75].mxu1  ;;  %v2901_v51 = vpop.f32.mrb[65].mxu0  ;;  %v1963_v54 = vadd.f32 %v2825_v23, %v5382_v33  ;;  %3293 = vmatprep.subr.bf16.mxu0 %v3292_v57  ;;  %v2545_v57 = vld [vmem:[%s5840_s9 + $0x348] sm:$0xff] }
 0x3a4   :  { %v2148_v30 = vmax.f32 %v2098_v12, 0.0  ;;  %v2828_v37 = vadd.f32 %v2827_v29, %v2826_v2  ;;  %v2902_v18 = vadd.f32 %v2901_v51, %v2900_v61  ;;  %v2183_v13 = vsel %vm162_vm2, %v2180_v14, %v2182_v10 }
 0x3a5   :  { %v3188_v44 = vpack.c.bf16 %v2183_v13, %v2181_v5  ;;  %v5517_v1 = vsel %vm1145_vm3, %v2258_v34, %v2260_v35  ;;  %v5520_v41 = vsel %vm1086_vm4, %v2218_v53, %v2220_v32 }
 0x3a6   :  { %v2222_v11 = vrot.slane %v2148_v30, 4  ;;  %v2103_v17 = vadd.f32 %v2902_v18, %v1958_v52  ;;  %v2829_v31 = vpop.f32.mrb[76].mxu1  ;;  %v2903_v6 = vpop.f32.mrb[66].mxu0  ;;  %v2184_v7 = vrot.slane %v2148_v30, 2  ;;  %v3194_v50 = vpack.c.bf16 %v2148_v30, %v5502_v3 }
 0x3a7   :  { %v2830_v20 = vpop.f32.mrb[77].mxu1  ;;  %v2904_v19 = vpop.f32.mrb[67].mxu0  ;;  %3189 = vmatprep.subr.bf16.mxu1 %v3188_v44  ;;  %v3208_v55 = vpack.c.bf16 %v5517_v1, %v5506_v8  ;;  %v3210_v25 = vpack.c.bf16 %v5520_v41, %v5509_v58  ;;  %v2262_v42 = vrot.slane %v2148_v30, 6  ;;  %v1968_v21 = vadd.f32 %v2828_v37, %v5382_v33  ;;  %v2506_v8 = vld [vmem:[%s5840_s9 + $0x210] sm:$0xff]  ;;  %v2509_v58 = vld [vmem:[%s5840_s9 + $0x228] sm:$0xff]  ;;  %v2511_v1 = vld [vmem:[%s5840_s9 + $0x238] sm:$0xff] }
 0x3a8   :  { %v5528_v9 = vmax.f32 %v2103_v17, 0.0  ;;  %v2831_v43 = vadd.f32 %v2830_v20, %v2829_v31  ;;  %v2905_v16 = vadd.f32 %v2904_v19, %v2903_v6  ;;  %3191 = vmatpush1.bf16.msra.mxu1 %v3190_v15  ;;  %v2185_v0 = vsel %vm162_vm2, %v2182_v10, %v2184_v7 }
 0x3a9   :  { %v5532_v47 = vsel %vm1145_vm3, %v2260_v35, %v2262_v42  ;;  %v5535_v49 = vsel %vm1086_vm4, %v2220_v32, %v2222_v11 }
 0x3aa   :  { %v2224_v48 = vrot.slane %v5528_v9, 4  ;;  %v2108_v46 = vadd.f32 %v2905_v16, %v1963_v54  ;;  %v2832_v4 = vpop.f32.mrb[78].mxu1  ;;  %v2906_v22 = vpop.f32.mrb[68].mxu0  ;;  %v2186_v26 = vrot.slane %v5528_v9, 2  ;;  %v2264_v63 = vrot.slane %v5528_v9, 6 }
 0x3ab   :  { %v2833_v60 = vpop.f32.mrb[79].mxu1  ;;  %v2907_v53 = vpop.f32.mrb[69].mxu0  ;;  %v1973_v3 = vadd.f32 %v2831_v43, %v5382_v33 }
 0x3ac   :  { %v2150_v24 = vmax.f32 %v2108_v46, 0.0  ;;  %v2834_v40 = vadd.f32 %v2833_v60, %v2832_v4  ;;  %v2908_v14 = vadd.f32 %v2907_v53, %v2906_v22  ;;  %v2187_v28 = vsel %vm162_vm2, %v2184_v7, %v2186_v26 }
 0x3ad   :  { %v3192_v27 = vpack.c.bf16 %v2187_v28, %v2185_v0  ;;  %v5543_v15 = vsel %vm1145_vm3, %v2262_v42, %v2264_v63  ;;  %v5546_v34 = vsel %vm1086_vm4, %v2222_v11, %v2224_v48 }
 0x3ae   :  { %v2226_v23 = vrot.slane %v2150_v24, 4  ;;  %v2113_v59 = vadd.f32 %v2908_v14, %v1968_v21  ;;  %v2835_v5 = vpop.f32.mrb[80].mxu1  ;;  %v2909_v32 = vpop.f32.mrb[70].mxu0  ;;  %v2188_v12 = vrot.slane %v2150_v24, 2  ;;  %v3198_v10 = vpack.c.bf16 %v2150_v24, %v5528_v9 }
 0x3af   :  { %v2836_v2 = vpop.f32.mrb[81].mxu1  ;;  %v2910_v61 = vpop.f32.mrb[71].mxu0  ;;  %3193 = vmatprep.subr.bf16.mxu1 %v3192_v27  ;;  %v3212_v52 = vpack.c.bf16 %v5543_v15, %v5532_v47  ;;  %v3214_v29 = vpack.c.bf16 %v5546_v34, %v5535_v49  ;;  %v2266_v51 = vrot.slane %v2150_v24, 6  ;;  %v1978_v7 = vadd.f32 %v2834_v40, %v5382_v33  ;;  %v2508_v49 = vld [vmem:[%s5840_s9 + $0x220] sm:$0xff]  ;;  %v2510_v15 = vld [vmem:[%s5840_s9 + $0x230] sm:$0xff]  ;;  %v2513_v34 = vld [vmem:[%s5840_s9 + $0x248] sm:$0xff] }
 0x3b0   :  { %v5554_v35 = vmax.f32 %v2113_v59, 0.0  ;;  %v2837_v30 = vadd.f32 %v2836_v2, %v2835_v5  ;;  %v2911_v37 = vadd.f32 %v2910_v61, %v2909_v32  ;;  %3195 = vmatpush1.bf16.msra.mxu1 %v3194_v50  ;;  %v2189_v18 = vsel %vm162_vm2, %v2186_v26, %v2188_v12 }
 0x3b1   :  { %v5558_v13 = vsel %vm1145_vm3, %v2264_v63, %v2266_v51  ;;  %v5561_v44 = vsel %vm1086_vm4, %v2224_v48, %v2226_v23  ;;  %v3296_v47 = vpack.c.bf16 %v2511_v1, %v2509_v58  ;;  %v2546_v58 = vld [vmem:[%s5840_s9 + $0x350] sm:$0xff]  ;;  %v2549_v1 = vld [vmem:[%s5840_s9 + $0x368] sm:$0xff] }
 0x3b2   :  { %v2228_v54 = vrot.slane %v5554_v35, 4  ;;  %v2118_v11 = vadd.f32 %v2911_v37, %v1973_v3  ;;  %v2838_v17 = vpop.f32.mrb[82].mxu1  ;;  %v2912_v31 = vpop.f32.mrb[72].mxu0  ;;  %v2190_v6 = vrot.slane %v5554_v35, 2  ;;  %v2268_v50 = vrot.slane %v5554_v35, 6 }
 0x3b3   :  { %v2839_v20 = vpop.f32.mrb[83].mxu1  ;;  %v2913_v19 = vpop.f32.mrb[73].mxu0  ;;  %v1983_v0 = vadd.f32 %v2837_v30, %v5382_v33 }
 0x3b4   :  { %v2152_v42 = vmax.f32 %v2118_v11, 0.0  ;;  %v2840_v9 = vadd.f32 %v2839_v20, %v2838_v17  ;;  %v2914_v43 = vadd.f32 %v2913_v19, %v2912_v31  ;;  %v2191_v16 = vsel %vm162_vm2, %v2188_v12, %v2190_v6 }
 0x3b5   :  { %v3196_v48 = vpack.c.bf16 %v2191_v16, %v2189_v18  ;;  %v5570_v46 = vsel %vm1145_vm3, %v2266_v51, %v2268_v50  ;;  %v5573_v4 = vsel %vm1086_vm4, %v2226_v23, %v2228_v54 }
 0x3b6   :  { %v2230_v22 = vrot.slane %v2152_v42, 4  ;;  %v1988_v26 = vadd.f32 %v2840_v9, %v5382_v33  ;;  %v2123_v21 = vadd.f32 %v2914_v43, %v1978_v7  ;;  %v2841_v60 = vpop.f32.mrb[84].mxu1  ;;  %v2915_v53 = vpop.f32.mrb[74].mxu0  ;;  %v2192_v63 = vrot.slane %v2152_v42, 2 }
 0x3b7   :  { %v2842_v24 = vpop.f32.mrb[85].mxu1  ;;  %v2916_v40 = vpop.f32.mrb[75].mxu0  ;;  %3197 = vmatprep.subr.bf16.mxu1 %v3196_v48  ;;  %v3202_v14 = vpack.c.bf16 %v2152_v42, %v5554_v35  ;;  %v3216_v28 = vpack.c.bf16 %v5570_v46, %v5558_v13  ;;  %v3218_v27 = vpack.c.bf16 %v5573_v4, %v5561_v44  ;;  %v2270_v3 = vrot.slane %v2152_v42, 6 }
 0x3b8   :  { %v2153_v23 = vmax.f32 %v2123_v21, 0.0  ;;  %v2843_v59 = vadd.f32 %v2842_v24, %v2841_v60  ;;  %v2917_v5 = vadd.f32 %v2916_v40, %v2915_v53  ;;  %3199 = vmatpush1.bf16.msra.mxu1 %v3198_v10  ;;  %v2193_v32 = vsel %vm162_vm2, %v2190_v6, %v2192_v63 }
 0x3b9   :  { %v2271_v12 = vsel %vm1145_vm3, %v2268_v50, %v2270_v3  ;;  %v2231_v2 = vsel %vm1086_vm4, %v2228_v54, %v2230_v22 }
 0x3ba   :  { %v2232_v61 = vrot.slane %v2153_v23, 4  ;;  %v1993_v51 = vadd.f32 %v2843_v59, %v5382_v33  ;;  %v2128_v35 = vadd.f32 %v2917_v5, %v1983_v0  ;;  %v2918_v30 = vpop.f32.mrb[76].mxu0  ;;  %v2194_v37 = vrot.slane %v2153_v23, 2  ;;  %v2514_v5 = vld [vmem:[%s5840_s9 + $0x250] sm:$0xff] }
 0x3bb   :  { %v2919_v18 = vpop.f32.mrb[77].mxu0  ;;  %v2272_v13 = vrot.slane %v2153_v23, 6 }
 0x3bc   :  { %v2154_v44 = vmax.f32 %v2128_v35, 0.0  ;;  %v2920_v11 = vadd.f32 %v2919_v18, %v2918_v30  ;;  %v2195_v17 = vsel %vm162_vm2, %v2192_v63, %v2194_v37  ;;  %v2233_v10 = vsel %vm1086_vm4, %v2230_v22, %v2232_v61  ;;  %v2518_v35 = vld [vmem:[%s5840_s9 + $0x270] sm:$0xff]  ;;  %v2521_v30 = vld [vmem:[%s5840_s9 + $0x288] sm:$0xff] }
 0x3bd   :  { %v3200_v31 = vpack.c.bf16 %v2195_v17, %v2193_v32  ;;  %v2273_v6 = vsel %vm1145_vm3, %v2270_v3, %v2272_v13  ;;  %v3222_v7 = vpack.c.bf16 %v2233_v10, %v2231_v2  ;;  %v2517_v32 = vld [vmem:[%s5840_s9 + $0x268] sm:$0xff]  ;;  %v2527_v10 = vld [vmem:[%s5840_s9 + $0x2b8] sm:$0xff] }
 0x3be   :  { %v2234_v20 = vrot.slane %v2154_v44, 4  ;;  %v2274_v54 = vrot.slane %v2154_v44, 6  ;;  %v2133_v19 = vadd.f32 %v2920_v11, %v1988_v26  ;;  %v2921_v50 = vpop.f32.mrb[78].mxu0  ;;  %v2196_v33 = vrot.slane %v2154_v44, 2  ;;  %v2293_v26 = vld [vmem:[%s5839_s8] sm:$0x3] }
 0x3bf   :  { %v2922_v42 = vpop.f32.mrb[79].mxu0  ;;  %3201 = vmatprep.subr.bf16.mxu1 %v3200_v31  ;;  %v3220_v9 = vpack.c.bf16 %v2273_v6, %v2271_v12  ;;  %v2519_v12 = vld [vmem:[%s5840_s9 + $0x278] sm:$0xff]  ;;  %v2520_v44 = vld [vmem:[%s5840_s9 + $0x280] sm:$0xff]  ;;  %v2522_v11 = vld [vmem:[%s5840_s9 + $0x290] sm:$0xff] }
 0x3c0   :  { %v2155_v43 = vmax.f32 %v2133_v19, 0.0  ;;  %v2923_v16 = vadd.f32 %v2922_v42, %v2921_v50  ;;  %3203 = vmatpush1.bf16.msra.mxu1 %v3202_v14  ;;  %v2197_v0 = vsel %vm162_vm2, %v2194_v37, %v2196_v33  ;;  %v2275_v48 = vsel %vm1145_vm3, %v2272_v13, %v2274_v54  ;;  %v2523_v37 = vld [vmem:[%s5840_s9 + $0x298] sm:$0xff]  ;;  %v2525_v17 = vld [vmem:[%s5840_s9 + $0x2a8] sm:$0xff]  ;;  %v2528_v42 = vld [vmem:[%s5840_s9 + $0x2c0] sm:$0xff] }
 0x3c1   :  { %2322 = vmatprep.subr.mxu1 %v2197_v0  ;;  %v2235_v46 = vsel %vm1086_vm4, %v2232_v61, %v2234_v20  ;;  %v3304_v61 = vpack.c.bf16 %v2519_v12, %v2517_v32  ;;  %v3308_v13 = vpack.c.bf16 %v2523_v37, %v2521_v30  ;;  %v3310_v31 = vpack.c.bf16 %v2522_v11, %v2520_v44  ;;  %v2531_v19 = vld [vmem:[%s5840_s9 + $0x2d8] sm:$0xff]  ;;  %v2562_v44 = vld [vmem:[%s5840_s9 + $0x3d0] sm:$0xff]  ;;  %v2565_v11 = vld [vmem:[%s5840_s9 + $0x3e8] sm:$0xff] }
 0x3c2   :  { %v2236_v4 = vrot.slane %v2155_v43, 4  ;;  %v2276_v22 = vrot.slane %v2155_v43, 6  ;;  %v2138_v21 = vadd.f32 %v2923_v16, %v1993_v51  ;;  %v2516_v51 = vld [vmem:[%s5840_s9 + $0x260] sm:$0xff]  ;;  %v3312_v6 = vpack.c.bf16 %v2527_v10, %v2525_v17  ;;  %v2533_v43 = vld [vmem:[%s5840_s9 + $0x2e8] sm:$0xff]  ;;  %v2535_v16 = vld [vmem:[%s5840_s9 + $0x2f8] sm:$0xff] }
 0x3c3   :  { %v3306_v18 = vpack.c.bf16 %v2518_v35, %v2516_v51  ;;  %v2559_v32 = vld [vmem:[%s5840_s9 + $0x3b8] sm:$0xff]  ;;  %v2558_v51 = vld [vmem:[%s5840_s9 + $0x3b0] sm:$0xff]  ;;  %v2561_v35 = vld [vmem:[%s5840_s9 + $0x3c8] sm:$0xff] }
 0x3c4   :  { %v2156_v60 = vmax.f32 %v2138_v21, 0.0  ;;  %2323 = vmatpush1.msra.mxu1 %v2153_v23  ;;  %v2277_v53 = vsel %vm1145_vm3, %v2274_v54, %v2276_v22  ;;  %v2237_v63 = vsel %vm1086_vm4, %v2234_v20, %v2236_v4  ;;  %v2526_v20 = vld [vmem:[%s5840_s9 + $0x2b0] sm:$0xff]  ;;  %v2529_v54 = vld [vmem:[%s5840_s9 + $0x2c8] sm:$0xff]  ;;  %v2539_v21 = vld [vmem:[%s5840_s9 + $0x318] sm:$0xff] }
 0x3c5   :  { %2761 = vmatmul.mubr.msk.f32.vlgmr.msra.gmra.mrb[86].mxu1 %vm2294_vm5, %v2293_v26  ;;  %3205 = vmatprep.subr.bf16.mxu1 %v3204_v39  ;;  %v3224_v24 = vpack.c.bf16 %v2277_v53, %v2275_v48  ;;  %v3226_v40 = vpack.c.bf16 %v2237_v63, %v2235_v46  ;;  %v3543_v39 = vmov 0   ;;  %v3316_v33 = vpack.c.bf16 %v2531_v19, %v2529_v54  ;;  %v2532_v46 = vld [vmem:[%s5840_s9 + $0x2e0] sm:$0xff]  ;;  %v2563_v30 = vld [vmem:[%s5840_s9 + $0x3d8] sm:$0xff] }
 0x3c6   :  { %v2238_v14 = vrot.slane %v2156_v60, 4  ;;  %v2278_v3 = vrot.slane %v2156_v60, 6  ;;  %3207 = vmatpush1.bf16.msra.mxu1 %v3206_v36  ;;  %2433 = vmatprep.mubr.f32.mxu1 %v3542_v62  ;;  %v2504_v36 = vld [vmem:[%s5840_s9 + $0x200] sm:$0xff]  ;;  %v3320_v48 = vpack.c.bf16 %v2535_v16, %v2533_v43  ;;  %v2567_v17 = vld [vmem:[%s5840_s9 + $0x3f8] sm:$0xff]  ;;  %v2711_v54 = vlaneseq }
 0x3c7   :  { %3209 = vmatprep.subr.bf16.mxu1 %v3208_v55  ;;  %3516 = vset.pattern.permute.xlu0 %v3543_v39  ;;  %v3294_v55 = vpack.c.bf16 %v2506_v8, %v2504_v36  ;;  %v3330_v39 = vpack.c.bf16 %v2542_v56, %v2540_v38  ;;  %v2544_v8 = vld [vmem:[%s5840_s9 + $0x340] sm:$0xff]  ;;  %v3544_v19 = vmov 1983009808  }
 0x3c8   :  { %v2279_v23 = vsel %vm1145_vm3, %v2276_v22, %v2278_v3  ;;  %v2239_v59 = vsel %vm1086_vm4, %v2236_v4, %v2238_v14  ;;  %2714 = vperm.xlu0 %3516, %v2710_v45   ;;  %v2534_v4 = vld [vmem:[%s5840_s9 + $0x2f0] sm:$0xff]  ;;  %v2537_v22 = vld [vmem:[%s5840_s9 + $0x308] sm:$0xff]  ;;  %v2543_v3 = vld [vmem:[%s5840_s9 + $0x338] sm:$0xff]  ;;  %v2727_v43 = vshrl.u32 %v2711_v54, 7 }
 0x3c9   :  { %v3322_v53 = vpack.c.bf16 %v2534_v4, %v2532_v46  ;;  %v3324_v63 = vpack.c.bf16 %v2539_v21, %v2537_v22  ;;  %v2541_v14 = vld [vmem:[%s5840_s9 + $0x328] sm:$0xff]  ;;  %v2547_v45 = vld [vmem:[%s5840_s9 + $0x358] sm:$0xff] }
 0x3ca   :  { %3211 = vmatpush1.bf16.msra.mxu1 %v3210_v25  ;;  %v3332_v36 = vpack.c.bf16 %v2547_v45, %v2545_v57 }
 0x3cb   :  { %3213 = vmatprep.subr.bf16.mxu1 %v3212_v52  ;;  %v2515_v52 = vld [vmem:[%s5840_s9 + $0x258] sm:$0xff] }
 0x3ce   :  { %3215 = vmatpush1.bf16.msra.mxu1 %v3214_v29  ;;  %v3298_v29 = vpack.c.bf16 %v2510_v15, %v2508_v49  ;;  %v2550_v49 = vld [vmem:[%s5840_s9 + $0x370] sm:$0xff]  ;;  %v2553_v15 = vld [vmem:[%s5840_s9 + $0x388] sm:$0xff] }
 0x3cf   :  { %3217 = vmatprep.subr.bf16.mxu1 %v3216_v28  ;;  %v3300_v28 = vpack.c.bf16 %v2515_v52, %v2513_v34  ;;  %v2555_v34 = vld [vmem:[%s5840_s9 + $0x398] sm:$0xff] }
 0x3d2   :  { %3219 = vmatpush1.bf16.msra.mxu1 %v3218_v27  ;;  %v2512_v27 = vld [vmem:[%s5840_s9 + $0x240] sm:$0xff] }
 0x3d3   :  { %3221 = vmatprep.subr.bf16.mxu1 %v3220_v9  ;;  %v3302_v2 = vpack.c.bf16 %v2514_v5, %v2512_v27  ;;  %v2530_v9 = vld [vmem:[%s5840_s9 + $0x2d0] sm:$0xff]  ;;  %v2557_v5 = vld [vmem:[%s5840_s9 + $0x3a8] sm:$0xff] }
 0x3d4   :  { %v3318_v0 = vpack.c.bf16 %v2530_v9, %v2528_v42  ;;  %v2554_v27 = vld [vmem:[%s5840_s9 + $0x390] sm:$0xff] }
 0x3d6   :  { %3223 = vmatpush1.bf16.msra.mxu1 %v3222_v7  ;;  %v2524_v7 = vld [vmem:[%s5840_s9 + $0x2a0] sm:$0xff] }
 0x3d7   :  { %3225 = vmatprep.subr.bf16.mxu1 %v3224_v24  ;;  %v3314_v50 = vpack.c.bf16 %v2526_v20, %v2524_v7  ;;  %v2536_v24 = vld [vmem:[%s5840_s9 + $0x300] sm:$0xff]  ;;  %v2566_v7 = vld [vmem:[%s5840_s9 + $0x3f0] sm:$0xff] }
 0x3da   :  { %3227 = vmatpush1.bf16.msra.mxu1 %v3226_v40  ;;  %v2538_v40 = vld [vmem:[%s5840_s9 + $0x310] sm:$0xff] }
 0x3db   :  { %2393 = vmatprep.subr.mxu1 %v2279_v23  ;;  %v3326_v23 = vpack.c.bf16 %v2538_v40, %v2536_v24 }
 0x3de   :  { %2394 = vmatpush1.msra.mxu1 %v2239_v59  ;;  %v3328_v59 = vpack.c.bf16 %v2543_v3, %v2541_v14 }
 0x3df   :  { %2762 = vmatmul.mubr.msk.f32.vlgmr.msra.gmra.mrb[88].mxu1 %vm2294_vm5, %v2293_v26 }
 0x447   :  { %v2715_v42 = vpop.permute.xlu0 %2714 }
 0x498   :  { %v2364_v41 = vpop.f32.mrb[86].mxu1 }
 0x499   :  { %v2366_v25 = vpop.f32.mrb[87].mxu1 }
 0x49a   :  { %2632 = vmatprep.mubr.f32.mxu0 %v2366_v25 }
 0x49b   :  { %2633 = vmatmul.mubr.f32.vlgmr.msra.gmra.mrb[80].mxu0 %v2364_v41  ;;  %v2551_v41 = vld [vmem:[%s5840_s9 + $0x378] sm:$0xff] }
 0x49c   :  { %3295 = vmatpush1.bf16.msra.mxu0 %v3294_v55  ;;  %v3334_v55 = vpack.c.bf16 %v2546_v58, %v2544_v8  ;;  %v3336_v25 = vpack.c.bf16 %v2551_v41, %v2549_v1 }
 0x49d   :  { %3297 = vmatprep.subr.bf16.mxu0 %v3296_v47  ;;  %v2548_v47 = vld [vmem:[%s5840_s9 + $0x360] sm:$0xff] }
 0x49e   :  { %v3338_v52 = vpack.c.bf16 %v2550_v49, %v2548_v47 }
 0x4a0   :  { %3299 = vmatpush1.bf16.msra.mxu0 %v3298_v29  ;;  %v3340_v29 = vpack.c.bf16 %v2555_v34, %v2553_v15 }
 0x4a1   :  { %3301 = vmatprep.subr.bf16.mxu0 %v3300_v28  ;;  %v2552_v28 = vld [vmem:[%s5840_s9 + $0x380] sm:$0xff] }
 0x4a2   :  { %v3342_v12 = vpack.c.bf16 %v2554_v27, %v2552_v28 }
 0x4a4   :  { %3303 = vmatpush1.bf16.msra.mxu0 %v3302_v2  ;;  %v3344_v2 = vpack.c.bf16 %v2559_v32, %v2557_v5 }
 0x4a5   :  { %3305 = vmatprep.subr.bf16.mxu0 %v3304_v61  ;;  %v2556_v61 = vld [vmem:[%s5840_s9 + $0x3a0] sm:$0xff] }
 0x4a6   :  { %v3346_v37 = vpack.c.bf16 %v2558_v51, %v2556_v61 }
 0x4a8   :  { %3307 = vmatpush1.bf16.msra.mxu0 %v3306_v18  ;;  %v3348_v18 = vpack.c.bf16 %v2563_v30, %v2561_v35 }
 0x4a9   :  { %3309 = vmatprep.subr.bf16.mxu0 %v3308_v13  ;;  %v2560_v13 = vld [vmem:[%s5840_s9 + $0x3c0] sm:$0xff] }
 0x4aa   :  { %v3350_v10 = vpack.c.bf16 %v2562_v44, %v2560_v13 }
 0x4ac   :  { %3311 = vmatpush1.bf16.msra.mxu0 %v3310_v31  ;;  %v3352_v31 = vpack.c.bf16 %v2567_v17, %v2565_v11 }
 0x4ad   :  { %3313 = vmatprep.subr.bf16.mxu0 %v3312_v6  ;;  %v2564_v6 = vld [vmem:[%s5840_s9 + $0x3e0] sm:$0xff]  ;;  %s3545_s9 = smov [#allocation2]  }
 0x4ae   :  { %v3354_v20 = vpack.c.bf16 %v2566_v7, %v2564_v6  ;;  %s2750_s1 = sshll.u32 %s3545_s9, 4  ;;  %s2751_s1 = int_to_ptr.vmem [resolvable:$true] %s2750_s1 }
 0x4af   :  { %s3517_s27 = scalar_lea.vmem %s2751_s1, 96  ;;  %p3522_p1 = scmp.lt.s32.totalorder %s2751_s1, %s2751_s1 }
 0x4b0   :  { %3315 = vmatpush1.bf16.msra.mxu0 %v3314_v50  ;;  %v2724_v50 = vunpack.c.l.s4 %v3544_v19  ;;  %p3518_p0 = scmp.ne.s32.totalorder %s2751_s1, %s3517_s27  ;;  %p3523_p2 = scmp.lt.s32.totalorder %s3517_s27, %s3517_s27 }
 0x4b1   :  { %3317 = vmatprep.subr.bf16.mxu0 %v3316_v33  ;;  %v2712_v33 = vand.u32 127, %v2711_v54 }
 0x4b2   :  { %v5724_v26 = vpop.f32.mrb[88].mxu1  ;;  %v2725_v9 = vunpack.c.0.s8 %v2724_v50  ;;  %p3524_p3 = por %p3523_p2, %p3522_p1 }
 0x4b3   :  { %v2437_v60 = vpop.f32.mrb[89].mxu1  ;;  %vm2716_vm6 = vcmp.eq.s32.totalorder %v2712_v33, %v2715_v42 }
 0x4b4   :  { %3319 = vmatpush1.bf16.msra.mxu0 %v3318_v0  ;;  %2703 = vmatprep.mubr.f32.mxu0 %v2437_v60  ;;  %v2728_v16 = vsub.s32 %v2725_v9, %v2727_v43  ;;  %v2763_v0 = vsel %vm2716_vm6, 1.0, %v3542_v62  ;;  %p3525_p4 = pnand %p3524_p3, %p3518_p0 }
 0x4b5   :  { %3321 = vmatprep.subr.bf16.mxu0 %v3320_v48 }
 0x4b6   :  { %v2736_v4 = vrot.slane %v2763_v0, %v2728_v16 }
 0x4b8   :  { %3323 = vmatpush1.bf16.msra.mxu0 %v3322_v53 }
 0x4b9   :  { %3325 = vmatprep.subr.bf16.mxu0 %v3324_v63 }
 0x4bc   :  { %3327 = vmatpush1.bf16.msra.mxu0 %v3326_v23 }
 0x4bd   :  { %3329 = vmatprep.subr.bf16.mxu0 %v3328_v59 }
 0x4c0   :  { %3331 = vmatpush1.bf16.msra.mxu0 %v3330_v39 }
 0x4c1   :  { %3333 = vmatprep.subr.bf16.mxu0 %v3332_v36 }
 0x4c4   :  { %3335 = vmatpush1.bf16.msra.mxu0 %v3334_v55 }
 0x4c5   :  { %3337 = vmatprep.subr.bf16.mxu0 %v3336_v25 }
 0x4c8   :  { %3339 = vmatpush1.bf16.msra.mxu0 %v3338_v52 }
 0x4c9   :  { %3341 = vmatprep.subr.bf16.mxu0 %v3340_v29 }
 0x4cc   :  { %3343 = vmatpush1.bf16.msra.mxu0 %v3342_v12 }
 0x4cd   :  { %3345 = vmatprep.subr.bf16.mxu0 %v3344_v2 }
 0x4d0   :  { %3347 = vmatpush1.bf16.msra.mxu0 %v3346_v37 }
 0x4d1   :  { %3349 = vmatprep.subr.bf16.mxu0 %v3348_v18 }
 0x4d4   :  { %3351 = vmatpush1.bf16.msra.mxu0 %v3350_v10 }
 0x4d5   :  { %3353 = vmatprep.subr.bf16.mxu0 %v3352_v31 }
 0x4d8   :  { %3355 = vmatpush1.bf16.msra.mxu0 %v3354_v20 }
 0x4db   :  { %2704 = vmatmul.mubr.f32.vlgmr.msra.gmra.mrb[80].mxu0 %v5724_v26 }
 0x5ae   :  { %v2705_v48 = vpop.f32.mrb[80].mxu0 }
 0x5af   :  { %v2707_v46 = vpop.f32.mrb[81].mxu0 }
 0x5b0   :  { %v2722_v22 = vcombine.low %v2705_v48, %v2707_v46 }
 0x5b2   :  { %v2729_v21 = vrot.slane %v2722_v22, %v2728_v16 }
 0x5b4   :  { %v2737_v26 = vcombine.low %v2729_v21, %v2736_v4 }
 0x5b6   :  { %2743 = vst.msk [vmem:[#allocation2] sm:$0x3f] %vm2742_vm10, %v2737_v26 }
 0x5b7   :  { %3528 = shalt.err (!%p3525_p4)
}
 0x5b8   :  { %s3529_s30 = scalar_lea.hbm %s5841_s10, 96 }
 0x5b9   :  { %p3530_p5 = scmp.ne.s32.totalorder %s5841_s10, %s3529_s30  ;;  %p3533_p6 = scmp.lt.u32.totalorder %s3529_s30, %s5841_s10 }
 0x5bb   :  { %p3535_p7 = pnand %p3533_p6, %p3530_p5 }
 0x5bd   :  { %3538 = shalt.err (!%p3535_p7)
}
 0x5be   :  { %2753 = dma.vmem_to_hbm [thread:$0]  %s2751_s1, 96, %s5841_s10, [#allocation3]  }
 0x5bf   :  { %3539 = dma.done.wait [#allocation3], 96  }
 0x5c0   :  { %3540 = vsyncadd [#allocation3], 4294967200 }
 0x5c1   :  { %2757 = vsyncpa [#allocation3], 1 }

</bundles_post_ra>
